<compile_context>
chip_gen: v7x
topology: tpu7x:2x2x1
jax: 0.10.0
libtpu: 0.0.40
codegen_flags: <defaults>
</compile_context>

<pallas_src>
import numpy as np
import jax
import jax.numpy as jnp
from jax.experimental import pallas as pl
from jax.experimental.pallas import tpu as pltpu


def _conv_block_kernel(xpad_ref, w1_ref, sb1_ref, w2_ref, sb2_ref, o_ref, mid_ref):
    # xpad_ref: (1, H+2, W+2, Cin)   spatially pre-padded input slab (one n)
    # w1_ref:   (9, Cin, Cm)         conv1 weights, tap-major
    # sb1_ref:  (2, 1, Cm)           folded BN1 [scale; bias]
    # w2_ref:   (9, Cm, Co)          conv2 weights, tap-major
    # sb2_ref:  (2, 1, Co)           folded BN2 [scale; bias]
    # o_ref:    (1, H, W, Co)
    # mid_ref:  VMEM scratch (H+2, W+2, Cm) f32 (zero-padded intermediate)
    _, H, W, Co = o_ref.shape
    Cin = xpad_ref.shape[3]
    Cm = w1_ref.shape[2]

    x = xpad_ref[0].astype(jnp.float32)                      # (H+2, W+2, Cin)

    # ---- conv1: 9 tap matmuls, M = H*W folded into one MXU op per tap ----
    acc = jnp.zeros((H * W, Cm), jnp.float32)
    for t in range(9):
        dy, dx = divmod(t, 3)
        patch = x[dy:dy + H, dx:dx + W, :].reshape(H * W, Cin)
        acc = acc + jnp.dot(patch, w1_ref[t], preferred_element_type=jnp.float32)
    # folded BN1 (+ conv1 bias) + ReLU on the f32 accumulator
    h1 = jnp.maximum(acc * sb1_ref[0] + sb1_ref[1], 0.0)     # (H*W, Cm)

    # stage the zero-padded intermediate entirely in VMEM (no HBM round trip)
    mid_ref[...] = jnp.zeros_like(mid_ref)
    mid_ref[1:H + 1, 1:W + 1, :] = h1.reshape(H, W, Cm)

    # ---- conv2: same structure on the padded intermediate ----
    m = mid_ref[...]                                         # (H+2, W+2, Cm)
    acc2 = jnp.zeros((H * W, Co), jnp.float32)
    for t in range(9):
        dy, dx = divmod(t, 3)
        patch = m[dy:dy + H, dx:dx + W, :].reshape(H * W, Cm)
        acc2 = acc2 + jnp.dot(patch, w2_ref[t], preferred_element_type=jnp.float32)
    h2 = jnp.maximum(acc2 * sb2_ref[0] + sb2_ref[1], 0.0)    # folded BN2 + ReLU

    o_ref[0] = h2.reshape(H, W, Co).astype(o_ref.dtype)


def unet_conv2d_block_forward(x, w1, b1, g1, beta1, m1, v1,
                              w2, b2, g2, beta2, m2, v2, *, eps=1e-5):
    """Equivalent of UnetConv2dBlock.forward (inference-mode BN). NCHW in/out."""
    N, Cin, H, W = x.shape
    Cm = w1.shape[0]
    Co = w2.shape[0]

    # NCHW -> NHWC (channels on lanes) and zero ring for padding=1.
    x_nhwc = jnp.transpose(x, (0, 2, 3, 1))
    x_pad = jnp.pad(x_nhwc, ((0, 0), (1, 1), (1, 1), (0, 0)))

    # (Cout, Cin, 3, 3) -> (9, Cin, Cout), tap-major.
    w1t = jnp.transpose(w1, (2, 3, 1, 0)).reshape(9, Cin, Cm)
    w2t = jnp.transpose(w2, (2, 3, 1, 0)).reshape(9, Cm, Co)

    # Fold conv bias + BatchNorm (running stats) into per-channel scale & bias.
    s1 = g1 / jnp.sqrt(v1 + eps)
    sb1 = jnp.stack([s1, beta1 + (b1 - m1) * s1])[:, None, :]    # (2, 1, Cm)
    s2 = g2 / jnp.sqrt(v2 + eps)
    sb2 = jnp.stack([s2, beta2 + (b2 - m2) * s2])[:, None, :]    # (2, 1, Co)

    out_nhwc = pl.pallas_call(
        _conv_block_kernel,
        out_shape=jax.ShapeDtypeStruct((N, H, W, Co), x.dtype),
        grid_spec=pltpu.PrefetchScalarGridSpec(
            num_scalar_prefetch=0,
            grid=(N,),
            in_specs=[
                pl.BlockSpec((1, H + 2, W + 2, Cin), lambda n: (n, 0, 0, 0)),
                pl.BlockSpec((9, Cin, Cm), lambda n: (0, 0, 0)),
                pl.BlockSpec((2, 1, Cm), lambda n: (0, 0, 0)),
                pl.BlockSpec((9, Cm, Co), lambda n: (0, 0, 0)),
                pl.BlockSpec((2, 1, Co), lambda n: (0, 0, 0)),
            ],
            out_specs=pl.BlockSpec((1, H, W, Co), lambda n: (n, 0, 0, 0)),
            scratch_shapes=[pltpu.VMEM((H + 2, W + 2, Cm), jnp.float32)],
        ),
        compiler_params=pltpu.CompilerParams(
            dimension_semantics=("parallel",)),
    )(x_pad, w1t, sb1, w2t, sb2)

    return jnp.transpose(out_nhwc, (0, 3, 1, 2))


def _ref_forward(x, w1, b1, g1, beta1, m1, v1, w2, b2, g2, beta2, m2, v2, eps=1e-5):
    """Pure-JAX reference matching the PyTorch module (inference-mode BN)."""
    def conv_bn_relu(y, w, b, g, beta, m, v):
        y = jax.lax.conv_general_dilated(
            y, w, window_strides=(1, 1), padding=((1, 1), (1, 1)),
            dimension_numbers=("NCHW", "OIHW", "NCHW"))
        y = y + b[None, :, None, None]
        s = g / jnp.sqrt(v + eps)
        y = (y - m[None, :, None, None]) * s[None, :, None, None] + beta[None, :, None, None]
        return jnp.maximum(y, 0.0)

    h = conv_bn_relu(x, w1, b1, g1, beta1, m1, v1)
    return conv_bn_relu(h, w2, b2, g2, beta2, m2, v2)


if __name__ == "__main__":
    N, Cin, Cm, Co, H, W = 2, 4, 16, 16, 16, 16
    key = jax.random.PRNGKey(0)
    ks = jax.random.split(key, 13)

    x = jax.random.normal(ks[0], (N, Cin, H, W), jnp.float32)
    w1 = jax.random.normal(ks[1], (Cm, Cin, 3, 3), jnp.float32) * 0.2
    b1 = jax.random.normal(ks[2], (Cm,), jnp.float32) * 0.1
    g1 = jax.random.uniform(ks[3], (Cm,), jnp.float32, 0.5, 1.5)
    beta1 = jax.random.normal(ks[4], (Cm,), jnp.float32) * 0.1
    m1 = jax.random.normal(ks[5], (Cm,), jnp.float32) * 0.1
    v1 = jax.random.uniform(ks[6], (Cm,), jnp.float32, 0.5, 1.5)
    w2 = jax.random.normal(ks[7], (Co, Cm, 3, 3), jnp.float32) * 0.1
    b2 = jax.random.normal(ks[8], (Co,), jnp.float32) * 0.1
    g2 = jax.random.uniform(ks[9], (Co,), jnp.float32, 0.5, 1.5)
    beta2 = jax.random.normal(ks[10], (Co,), jnp.float32) * 0.1
    m2 = jax.random.normal(ks[11], (Co,), jnp.float32) * 0.1
    v2 = jax.random.uniform(ks[12], (Co,), jnp.float32, 0.5, 1.5)

    out = jax.block_until_ready(unet_conv2d_block_forward(
        x, w1, b1, g1, beta1, m1, v1, w2, b2, g2, beta2, m2, v2))
    assert out.shape == (N, Co, H, W), out.shape

    ref = _ref_forward(x, w1, b1, g1, beta1, m1, v1, w2, b2, g2, beta2, m2, v2)
    np.testing.assert_allclose(np.asarray(out), np.asarray(ref), rtol=2e-2, atol=2e-2)

    print("KERNEL_OK")
</pallas_src>

<mosaic_0001>
module attributes {stable_mosaic.version = 11 : i64} {
  func.func @_conv_block_kernel(%arg0: i32, %arg1: memref<1x18x18x4xf32, #tpu.memory_space<vmem>>, %arg2: memref<9x4x16xf32, #tpu.memory_space<vmem>>, %arg3: memref<2x1x16xf32, #tpu.memory_space<vmem>>, %arg4: memref<9x16x16xf32, #tpu.memory_space<vmem>>, %arg5: memref<2x1x16xf32, #tpu.memory_space<vmem>>, %arg6: memref<1x16x16x16xf32, #tpu.memory_space<vmem>>, %arg7: memref<18x18x16xf32, #tpu.memory_space<vmem>>) attributes {dimension_semantics = [#tpu.dimension_semantics<parallel>], iteration_bounds = array<i64: 2>, scalar_prefetch = 0 : i64, scratch_operands = 1 : i64, tpu.core_type = #tpu.core_type<tc>, window_params = [{transform_indices = @transform_0, window_bounds = array<i64: 1, 18, 18, 4>}, {pipeline_mode = #tpu.pipeline_mode<synchronous>, transform_indices = @transform_1, window_bounds = array<i64: 9, 4, 16>}, {pipeline_mode = #tpu.pipeline_mode<synchronous>, transform_indices = @transform_2, window_bounds = array<i64: 2, 1, 16>}, {pipeline_mode = #tpu.pipeline_mode<synchronous>, transform_indices = @transform_3, window_bounds = array<i64: 9, 16, 16>}, {pipeline_mode = #tpu.pipeline_mode<synchronous>, transform_indices = @transform_4, window_bounds = array<i64: 2, 1, 16>}, {transform_indices = @transform_5, window_bounds = array<i64: 1, 16, 16, 16>}]} {
    %c0 = arith.constant 0 : index
    %c0_0 = arith.constant 0 : index
    %c0_1 = arith.constant 0 : index
    %c0_2 = arith.constant 0 : index
    %0 = vector.load %arg1[%c0, %c0_0, %c0_1, %c0_2] : memref<1x18x18x4xf32, #tpu.memory_space<vmem>>, vector<1x18x18x4xf32>
    %1 = vector.shape_cast %0 : vector<1x18x18x4xf32> to vector<18x18x4xf32>
    %cst = arith.constant 0.000000e+00 : f32
    %2 = vector.broadcast %cst : f32 to vector<256x16xf32>
    %3 = vector.extract_strided_slice %1 {offsets = [0, 0, 0], sizes = [16, 16, 4], strides = [1, 1, 1]} : vector<18x18x4xf32> to vector<16x16x4xf32>
    %4 = vector.shape_cast %3 : vector<16x16x4xf32> to vector<256x4xf32>
    %c0_3 = arith.constant 0 : index
    %c0_4 = arith.constant 0 : index
    %c0_5 = arith.constant 0 : index
    %5 = vector.load %arg2[%c0_3, %c0_4, %c0_5] : memref<9x4x16xf32, #tpu.memory_space<vmem>>, vector<1x4x16xf32>
    %6 = vector.shape_cast %5 : vector<1x4x16xf32> to vector<4x16xf32>
    %cst_6 = arith.constant dense<0.000000e+00> : vector<256x16xf32>
    %7 = tpu.matmul %4, %6, %cst_6 {dimension_numbers = #tpu.dot_dimension_numbers<[1], [0], [0], [1], [0, 0, 1, 1], [], []>} : vector<256x4xf32>, vector<4x16xf32>, vector<256x16xf32> -> vector<256x16xf32>
    %8 = arith.addf %2, %7 : vector<256x16xf32>
    %9 = vector.extract_strided_slice %1 {offsets = [0, 1, 0], sizes = [16, 16, 4], strides = [1, 1, 1]} : vector<18x18x4xf32> to vector<16x16x4xf32>
    %10 = vector.shape_cast %9 : vector<16x16x4xf32> to vector<256x4xf32>
    %c1 = arith.constant 1 : index
    %c0_7 = arith.constant 0 : index
    %c0_8 = arith.constant 0 : index
    %11 = vector.load %arg2[%c1, %c0_7, %c0_8] : memref<9x4x16xf32, #tpu.memory_space<vmem>>, vector<1x4x16xf32>
    %12 = vector.shape_cast %11 : vector<1x4x16xf32> to vector<4x16xf32>
    %cst_9 = arith.constant dense<0.000000e+00> : vector<256x16xf32>
    %13 = tpu.matmul %10, %12, %cst_9 {dimension_numbers = #tpu.dot_dimension_numbers<[1], [0], [0], [1], [0, 0, 1, 1], [], []>} : vector<256x4xf32>, vector<4x16xf32>, vector<256x16xf32> -> vector<256x16xf32>
    %14 = arith.addf %8, %13 : vector<256x16xf32>
    %15 = vector.extract_strided_slice %1 {offsets = [0, 2, 0], sizes = [16, 16, 4], strides = [1, 1, 1]} : vector<18x18x4xf32> to vector<16x16x4xf32>
    %16 = vector.shape_cast %15 : vector<16x16x4xf32> to vector<256x4xf32>
    %c2 = arith.constant 2 : index
    %c0_10 = arith.constant 0 : index
    %c0_11 = arith.constant 0 : index
    %17 = vector.load %arg2[%c2, %c0_10, %c0_11] : memref<9x4x16xf32, #tpu.memory_space<vmem>>, vector<1x4x16xf32>
    %18 = vector.shape_cast %17 : vector<1x4x16xf32> to vector<4x16xf32>
    %cst_12 = arith.constant dense<0.000000e+00> : vector<256x16xf32>
    %19 = tpu.matmul %16, %18, %cst_12 {dimension_numbers = #tpu.dot_dimension_numbers<[1], [0], [0], [1], [0, 0, 1, 1], [], []>} : vector<256x4xf32>, vector<4x16xf32>, vector<256x16xf32> -> vector<256x16xf32>
    %20 = arith.addf %14, %19 : vector<256x16xf32>
    %21 = vector.extract_strided_slice %1 {offsets = [1, 0, 0], sizes = [16, 16, 4], strides = [1, 1, 1]} : vector<18x18x4xf32> to vector<16x16x4xf32>
    %22 = vector.shape_cast %21 : vector<16x16x4xf32> to vector<256x4xf32>
    %c3 = arith.constant 3 : index
    %c0_13 = arith.constant 0 : index
    %c0_14 = arith.constant 0 : index
    %23 = vector.load %arg2[%c3, %c0_13, %c0_14] : memref<9x4x16xf32, #tpu.memory_space<vmem>>, vector<1x4x16xf32>
    %24 = vector.shape_cast %23 : vector<1x4x16xf32> to vector<4x16xf32>
    %cst_15 = arith.constant dense<0.000000e+00> : vector<256x16xf32>
    %25 = tpu.matmul %22, %24, %cst_15 {dimension_numbers = #tpu.dot_dimension_numbers<[1], [0], [0], [1], [0, 0, 1, 1], [], []>} : vector<256x4xf32>, vector<4x16xf32>, vector<256x16xf32> -> vector<256x16xf32>
    %26 = arith.addf %20, %25 : vector<256x16xf32>
    %27 = vector.extract_strided_slice %1 {offsets = [1, 1, 0], sizes = [16, 16, 4], strides = [1, 1, 1]} : vector<18x18x4xf32> to vector<16x16x4xf32>
    %28 = vector.shape_cast %27 : vector<16x16x4xf32> to vector<256x4xf32>
    %c4 = arith.constant 4 : index
    %c0_16 = arith.constant 0 : index
    %c0_17 = arith.constant 0 : index
    %29 = vector.load %arg2[%c4, %c0_16, %c0_17] : memref<9x4x16xf32, #tpu.memory_space<vmem>>, vector<1x4x16xf32>
    %30 = vector.shape_cast %29 : vector<1x4x16xf32> to vector<4x16xf32>
    %cst_18 = arith.constant dense<0.000000e+00> : vector<256x16xf32>
    %31 = tpu.matmul %28, %30, %cst_18 {dimension_numbers = #tpu.dot_dimension_numbers<[1], [0], [0], [1], [0, 0, 1, 1], [], []>} : vector<256x4xf32>, vector<4x16xf32>, vector<256x16xf32> -> vector<256x16xf32>
    %32 = arith.addf %26, %31 : vector<256x16xf32>
    %33 = vector.extract_strided_slice %1 {offsets = [1, 2, 0], sizes = [16, 16, 4], strides = [1, 1, 1]} : vector<18x18x4xf32> to vector<16x16x4xf32>
    %34 = vector.shape_cast %33 : vector<16x16x4xf32> to vector<256x4xf32>
    %c5 = arith.constant 5 : index
    %c0_19 = arith.constant 0 : index
    %c0_20 = arith.constant 0 : index
    %35 = vector.load %arg2[%c5, %c0_19, %c0_20] : memref<9x4x16xf32, #tpu.memory_space<vmem>>, vector<1x4x16xf32>
    %36 = vector.shape_cast %35 : vector<1x4x16xf32> to vector<4x16xf32>
    %cst_21 = arith.constant dense<0.000000e+00> : vector<256x16xf32>
    %37 = tpu.matmul %34, %36, %cst_21 {dimension_numbers = #tpu.dot_dimension_numbers<[1], [0], [0], [1], [0, 0, 1, 1], [], []>} : vector<256x4xf32>, vector<4x16xf32>, vector<256x16xf32> -> vector<256x16xf32>
    %38 = arith.addf %32, %37 : vector<256x16xf32>
    %39 = vector.extract_strided_slice %1 {offsets = [2, 0, 0], sizes = [16, 16, 4], strides = [1, 1, 1]} : vector<18x18x4xf32> to vector<16x16x4xf32>
    %40 = vector.shape_cast %39 : vector<16x16x4xf32> to vector<256x4xf32>
    %c6 = arith.constant 6 : index
    %c0_22 = arith.constant 0 : index
    %c0_23 = arith.constant 0 : index
    %41 = vector.load %arg2[%c6, %c0_22, %c0_23] : memref<9x4x16xf32, #tpu.memory_space<vmem>>, vector<1x4x16xf32>
    %42 = vector.shape_cast %41 : vector<1x4x16xf32> to vector<4x16xf32>
    %cst_24 = arith.constant dense<0.000000e+00> : vector<256x16xf32>
    %43 = tpu.matmul %40, %42, %cst_24 {dimension_numbers = #tpu.dot_dimension_numbers<[1], [0], [0], [1], [0, 0, 1, 1], [], []>} : vector<256x4xf32>, vector<4x16xf32>, vector<256x16xf32> -> vector<256x16xf32>
    %44 = arith.addf %38, %43 : vector<256x16xf32>
    %45 = vector.extract_strided_slice %1 {offsets = [2, 1, 0], sizes = [16, 16, 4], strides = [1, 1, 1]} : vector<18x18x4xf32> to vector<16x16x4xf32>
    %46 = vector.shape_cast %45 : vector<16x16x4xf32> to vector<256x4xf32>
    %c7 = arith.constant 7 : index
    %c0_25 = arith.constant 0 : index
    %c0_26 = arith.constant 0 : index
    %47 = vector.load %arg2[%c7, %c0_25, %c0_26] : memref<9x4x16xf32, #tpu.memory_space<vmem>>, vector<1x4x16xf32>
    %48 = vector.shape_cast %47 : vector<1x4x16xf32> to vector<4x16xf32>
    %cst_27 = arith.constant dense<0.000000e+00> : vector<256x16xf32>
    %49 = tpu.matmul %46, %48, %cst_27 {dimension_numbers = #tpu.dot_dimension_numbers<[1], [0], [0], [1], [0, 0, 1, 1], [], []>} : vector<256x4xf32>, vector<4x16xf32>, vector<256x16xf32> -> vector<256x16xf32>
    %50 = arith.addf %44, %49 : vector<256x16xf32>
    %51 = vector.extract_strided_slice %1 {offsets = [2, 2, 0], sizes = [16, 16, 4], strides = [1, 1, 1]} : vector<18x18x4xf32> to vector<16x16x4xf32>
    %52 = vector.shape_cast %51 : vector<16x16x4xf32> to vector<256x4xf32>
    %c8 = arith.constant 8 : index
    %c0_28 = arith.constant 0 : index
    %c0_29 = arith.constant 0 : index
    %53 = vector.load %arg2[%c8, %c0_28, %c0_29] : memref<9x4x16xf32, #tpu.memory_space<vmem>>, vector<1x4x16xf32>
    %54 = vector.shape_cast %53 : vector<1x4x16xf32> to vector<4x16xf32>
    %cst_30 = arith.constant dense<0.000000e+00> : vector<256x16xf32>
    %55 = tpu.matmul %52, %54, %cst_30 {dimension_numbers = #tpu.dot_dimension_numbers<[1], [0], [0], [1], [0, 0, 1, 1], [], []>} : vector<256x4xf32>, vector<4x16xf32>, vector<256x16xf32> -> vector<256x16xf32>
    %56 = arith.addf %50, %55 : vector<256x16xf32>
    %c0_31 = arith.constant 0 : index
    %c0_32 = arith.constant 0 : index
    %c0_33 = arith.constant 0 : index
    %57 = vector.load %arg3[%c0_31, %c0_32, %c0_33] : memref<2x1x16xf32, #tpu.memory_space<vmem>>, vector<1x1x16xf32>
    %58 = vector.shape_cast %57 : vector<1x1x16xf32> to vector<1x16xf32>
    %59 = vector.broadcast %58 : vector<1x16xf32> to vector<256x16xf32>
    %60 = arith.mulf %56, %59 : vector<256x16xf32>
    %c1_34 = arith.constant 1 : index
    %c0_35 = arith.constant 0 : index
    %c0_36 = arith.constant 0 : index
    %61 = vector.load %arg3[%c1_34, %c0_35, %c0_36] : memref<2x1x16xf32, #tpu.memory_space<vmem>>, vector<1x1x16xf32>
    %62 = vector.shape_cast %61 : vector<1x1x16xf32> to vector<1x16xf32>
    %63 = vector.broadcast %62 : vector<1x16xf32> to vector<256x16xf32>
    %64 = arith.addf %60, %63 : vector<256x16xf32>
    %cst_37 = arith.constant 0.000000e+00 : f32
    %65 = vector.broadcast %cst_37 : f32 to vector<256x16xf32>
    %66 = arith.maximumf %64, %65 : vector<256x16xf32>
    %cst_38 = arith.constant 0.000000e+00 : f32
    %67 = vector.broadcast %cst_38 : f32 to vector<18x18x16xf32>
    %c0_39 = arith.constant 0 : index
    %c0_40 = arith.constant 0 : index
    %c0_41 = arith.constant 0 : index
    %68 = vector.load %arg7[%c0_39, %c0_40, %c0_41] : memref<18x18x16xf32, #tpu.memory_space<vmem>>, vector<18x18x16xf32>
    tpu.vector_store %arg7[%c0_39, %c0_40, %c0_41], %67 {strides = array<i32>} : memref<18x18x16xf32, #tpu.memory_space<vmem>>, vector<18x18x16xf32>,
    %69 = vector.shape_cast %66 : vector<256x16xf32> to vector<16x16x16xf32>
    %c1_42 = arith.constant 1 : index
    %c1_43 = arith.constant 1 : index
    %c0_44 = arith.constant 0 : index
    %70 = vector.load %arg7[%c1_42, %c1_43, %c0_44] : memref<18x18x16xf32, #tpu.memory_space<vmem>>, vector<16x16x16xf32>
    tpu.vector_store %arg7[%c1_42, %c1_43, %c0_44], %69 {strides = array<i32>} : memref<18x18x16xf32, #tpu.memory_space<vmem>>, vector<16x16x16xf32>,
    %c0_45 = arith.constant 0 : index
    %c0_46 = arith.constant 0 : index
    %c0_47 = arith.constant 0 : index
    %71 = vector.load %arg7[%c0_45, %c0_46, %c0_47] : memref<18x18x16xf32, #tpu.memory_space<vmem>>, vector<18x18x16xf32>
    %cst_48 = arith.constant 0.000000e+00 : f32
    %72 = vector.broadcast %cst_48 : f32 to vector<256x16xf32>
    %73 = vector.extract_strided_slice %71 {offsets = [0, 0, 0], sizes = [16, 16, 16], strides = [1, 1, 1]} : vector<18x18x16xf32> to vector<16x16x16xf32>
    %74 = vector.shape_cast %73 : vector<16x16x16xf32> to vector<256x16xf32>
    %c0_49 = arith.constant 0 : index
    %c0_50 = arith.constant 0 : index
    %c0_51 = arith.constant 0 : index
    %75 = vector.load %arg4[%c0_49, %c0_50, %c0_51] : memref<9x16x16xf32, #tpu.memory_space<vmem>>, vector<1x16x16xf32>
    %76 = vector.shape_cast %75 : vector<1x16x16xf32> to vector<16x16xf32>
    %cst_52 = arith.constant dense<0.000000e+00> : vector<256x16xf32>
    %77 = tpu.matmul %74, %76, %cst_52 {dimension_numbers = #tpu.dot_dimension_numbers<[1], [0], [0], [1], [0, 0, 1, 1], [], []>} : vector<256x16xf32>, vector<16x16xf32>, vector<256x16xf32> -> vector<256x16xf32>
    %78 = arith.addf %72, %77 : vector<256x16xf32>
    %79 = vector.extract_strided_slice %71 {offsets = [0, 1, 0], sizes = [16, 16, 16], strides = [1, 1, 1]} : vector<18x18x16xf32> to vector<16x16x16xf32>
    %80 = vector.shape_cast %79 : vector<16x16x16xf32> to vector<256x16xf32>
    %c1_53 = arith.constant 1 : index
    %c0_54 = arith.constant 0 : index
    %c0_55 = arith.constant 0 : index
    %81 = vector.load %arg4[%c1_53, %c0_54, %c0_55] : memref<9x16x16xf32, #tpu.memory_space<vmem>>, vector<1x16x16xf32>
    %82 = vector.shape_cast %81 : vector<1x16x16xf32> to vector<16x16xf32>
    %cst_56 = arith.constant dense<0.000000e+00> : vector<256x16xf32>
    %83 = tpu.matmul %80, %82, %cst_56 {dimension_numbers = #tpu.dot_dimension_numbers<[1], [0], [0], [1], [0, 0, 1, 1], [], []>} : vector<256x16xf32>, vector<16x16xf32>, vector<256x16xf32> -> vector<256x16xf32>
    %84 = arith.addf %78, %83 : vector<256x16xf32>
    %85 = vector.extract_strided_slice %71 {offsets = [0, 2, 0], sizes = [16, 16, 16], strides = [1, 1, 1]} : vector<18x18x16xf32> to vector<16x16x16xf32>
    %86 = vector.shape_cast %85 : vector<16x16x16xf32> to vector<256x16xf32>
    %c2_57 = arith.constant 2 : index
    %c0_58 = arith.constant 0 : index
    %c0_59 = arith.constant 0 : index
    %87 = vector.load %arg4[%c2_57, %c0_58, %c0_59] : memref<9x16x16xf32, #tpu.memory_space<vmem>>, vector<1x16x16xf32>
    %88 = vector.shape_cast %87 : vector<1x16x16xf32> to vector<16x16xf32>
    %cst_60 = arith.constant dense<0.000000e+00> : vector<256x16xf32>
    %89 = tpu.matmul %86, %88, %cst_60 {dimension_numbers = #tpu.dot_dimension_numbers<[1], [0], [0], [1], [0, 0, 1, 1], [], []>} : vector<256x16xf32>, vector<16x16xf32>, vector<256x16xf32> -> vector<256x16xf32>
    %90 = arith.addf %84, %89 : vector<256x16xf32>
    %91 = vector.extract_strided_slice %71 {offsets = [1, 0, 0], sizes = [16, 16, 16], strides = [1, 1, 1]} : vector<18x18x16xf32> to vector<16x16x16xf32>
    %92 = vector.shape_cast %91 : vector<16x16x16xf32> to vector<256x16xf32>
    %c3_61 = arith.constant 3 : index
    %c0_62 = arith.constant 0 : index
    %c0_63 = arith.constant 0 : index
    %93 = vector.load %arg4[%c3_61, %c0_62, %c0_63] : memref<9x16x16xf32, #tpu.memory_space<vmem>>, vector<1x16x16xf32>
    %94 = vector.shape_cast %93 : vector<1x16x16xf32> to vector<16x16xf32>
    %cst_64 = arith.constant dense<0.000000e+00> : vector<256x16xf32>
    %95 = tpu.matmul %92, %94, %cst_64 {dimension_numbers = #tpu.dot_dimension_numbers<[1], [0], [0], [1], [0, 0, 1, 1], [], []>} : vector<256x16xf32>, vector<16x16xf32>, vector<256x16xf32> -> vector<256x16xf32>
    %96 = arith.addf %90, %95 : vector<256x16xf32>
    %97 = vector.extract_strided_slice %71 {offsets = [1, 1, 0], sizes = [16, 16, 16], strides = [1, 1, 1]} : vector<18x18x16xf32> to vector<16x16x16xf32>
    %98 = vector.shape_cast %97 : vector<16x16x16xf32> to vector<256x16xf32>
    %c4_65 = arith.constant 4 : index
    %c0_66 = arith.constant 0 : index
    %c0_67 = arith.constant 0 : index
    %99 = vector.load %arg4[%c4_65, %c0_66, %c0_67] : memref<9x16x16xf32, #tpu.memory_space<vmem>>, vector<1x16x16xf32>
    %100 = vector.shape_cast %99 : vector<1x16x16xf32> to vector<16x16xf32>
    %cst_68 = arith.constant dense<0.000000e+00> : vector<256x16xf32>
    %101 = tpu.matmul %98, %100, %cst_68 {dimension_numbers = #tpu.dot_dimension_numbers<[1], [0], [0], [1], [0, 0, 1, 1], [], []>} : vector<256x16xf32>, vector<16x16xf32>, vector<256x16xf32> -> vector<256x16xf32>
    %102 = arith.addf %96, %101 : vector<256x16xf32>
    %103 = vector.extract_strided_slice %71 {offsets = [1, 2, 0], sizes = [16, 16, 16], strides = [1, 1, 1]} : vector<18x18x16xf32> to vector<16x16x16xf32>
    %104 = vector.shape_cast %103 : vector<16x16x16xf32> to vector<256x16xf32>
    %c5_69 = arith.constant 5 : index
    %c0_70 = arith.constant 0 : index
    %c0_71 = arith.constant 0 : index
    %105 = vector.load %arg4[%c5_69, %c0_70, %c0_71] : memref<9x16x16xf32, #tpu.memory_space<vmem>>, vector<1x16x16xf32>
    %106 = vector.shape_cast %105 : vector<1x16x16xf32> to vector<16x16xf32>
    %cst_72 = arith.constant dense<0.000000e+00> : vector<256x16xf32>
    %107 = tpu.matmul %104, %106, %cst_72 {dimension_numbers = #tpu.dot_dimension_numbers<[1], [0], [0], [1], [0, 0, 1, 1], [], []>} : vector<256x16xf32>, vector<16x16xf32>, vector<256x16xf32> -> vector<256x16xf32>
    %108 = arith.addf %102, %107 : vector<256x16xf32>
    %109 = vector.extract_strided_slice %71 {offsets = [2, 0, 0], sizes = [16, 16, 16], strides = [1, 1, 1]} : vector<18x18x16xf32> to vector<16x16x16xf32>
    %110 = vector.shape_cast %109 : vector<16x16x16xf32> to vector<256x16xf32>
    %c6_73 = arith.constant 6 : index
    %c0_74 = arith.constant 0 : index
    %c0_75 = arith.constant 0 : index
    %111 = vector.load %arg4[%c6_73, %c0_74, %c0_75] : memref<9x16x16xf32, #tpu.memory_space<vmem>>, vector<1x16x16xf32>
    %112 = vector.shape_cast %111 : vector<1x16x16xf32> to vector<16x16xf32>
    %cst_76 = arith.constant dense<0.000000e+00> : vector<256x16xf32>
    %113 = tpu.matmul %110, %112, %cst_76 {dimension_numbers = #tpu.dot_dimension_numbers<[1], [0], [0], [1], [0, 0, 1, 1], [], []>} : vector<256x16xf32>, vector<16x16xf32>, vector<256x16xf32> -> vector<256x16xf32>
    %114 = arith.addf %108, %113 : vector<256x16xf32>
    %115 = vector.extract_strided_slice %71 {offsets = [2, 1, 0], sizes = [16, 16, 16], strides = [1, 1, 1]} : vector<18x18x16xf32> to vector<16x16x16xf32>
    %116 = vector.shape_cast %115 : vector<16x16x16xf32> to vector<256x16xf32>
    %c7_77 = arith.constant 7 : index
    %c0_78 = arith.constant 0 : index
    %c0_79 = arith.constant 0 : index
    %117 = vector.load %arg4[%c7_77, %c0_78, %c0_79] : memref<9x16x16xf32, #tpu.memory_space<vmem>>, vector<1x16x16xf32>
    %118 = vector.shape_cast %117 : vector<1x16x16xf32> to vector<16x16xf32>
    %cst_80 = arith.constant dense<0.000000e+00> : vector<256x16xf32>
    %119 = tpu.matmul %116, %118, %cst_80 {dimension_numbers = #tpu.dot_dimension_numbers<[1], [0], [0], [1], [0, 0, 1, 1], [], []>} : vector<256x16xf32>, vector<16x16xf32>, vector<256x16xf32> -> vector<256x16xf32>
    %120 = arith.addf %114, %119 : vector<256x16xf32>
    %121 = vector.extract_strided_slice %71 {offsets = [2, 2, 0], sizes = [16, 16, 16], strides = [1, 1, 1]} : vector<18x18x16xf32> to vector<16x16x16xf32>
    %122 = vector.shape_cast %121 : vector<16x16x16xf32> to vector<256x16xf32>
    %c8_81 = arith.constant 8 : index
    %c0_82 = arith.constant 0 : index
    %c0_83 = arith.constant 0 : index
    %123 = vector.load %arg4[%c8_81, %c0_82, %c0_83] : memref<9x16x16xf32, #tpu.memory_space<vmem>>, vector<1x16x16xf32>
    %124 = vector.shape_cast %123 : vector<1x16x16xf32> to vector<16x16xf32>
    %cst_84 = arith.constant dense<0.000000e+00> : vector<256x16xf32>
    %125 = tpu.matmul %122, %124, %cst_84 {dimension_numbers = #tpu.dot_dimension_numbers<[1], [0], [0], [1], [0, 0, 1, 1], [], []>} : vector<256x16xf32>, vector<16x16xf32>, vector<256x16xf32> -> vector<256x16xf32>
    %126 = arith.addf %120, %125 : vector<256x16xf32>
    %c0_85 = arith.constant 0 : index
    %c0_86 = arith.constant 0 : index
    %c0_87 = arith.constant 0 : index
    %127 = vector.load %arg5[%c0_85, %c0_86, %c0_87] : memref<2x1x16xf32, #tpu.memory_space<vmem>>, vector<1x1x16xf32>
    %128 = vector.shape_cast %127 : vector<1x1x16xf32> to vector<1x16xf32>
    %129 = vector.broadcast %128 : vector<1x16xf32> to vector<256x16xf32>
    %130 = arith.mulf %126, %129 : vector<256x16xf32>
    %c1_88 = arith.constant 1 : index
    %c0_89 = arith.constant 0 : index
    %c0_90 = arith.constant 0 : index
    %131 = vector.load %arg5[%c1_88, %c0_89, %c0_90] : memref<2x1x16xf32, #tpu.memory_space<vmem>>, vector<1x1x16xf32>
    %132 = vector.shape_cast %131 : vector<1x1x16xf32> to vector<1x16xf32>
    %133 = vector.broadcast %132 : vector<1x16xf32> to vector<256x16xf32>
    %134 = arith.addf %130, %133 : vector<256x16xf32>
    %cst_91 = arith.constant 0.000000e+00 : f32
    %135 = vector.broadcast %cst_91 : f32 to vector<256x16xf32>
    %136 = arith.maximumf %134, %135 : vector<256x16xf32>
    %137 = vector.shape_cast %136 : vector<256x16xf32> to vector<16x16x16xf32>
    %c0_92 = arith.constant 0 : index
    %c0_93 = arith.constant 0 : index
    %c0_94 = arith.constant 0 : index
    %c0_95 = arith.constant 0 : index
    %138 = vector.load %arg6[%c0_92, %c0_93, %c0_94, %c0_95] : memref<1x16x16x16xf32, #tpu.memory_space<vmem>>, vector<1x16x16x16xf32>
    %139 = vector.shape_cast %138 : vector<1x16x16x16xf32> to vector<16x16x16xf32>
    %140 = vector.shape_cast %137 : vector<16x16x16xf32> to vector<1x16x16x16xf32>
    tpu.vector_store %arg6[%c0_92, %c0_93, %c0_94, %c0_95], %140 {strides = array<i32>} : memref<1x16x16x16xf32, #tpu.memory_space<vmem>>, vector<1x16x16x16xf32>,
    return
  }
  func.func @transform_0(%arg0: i32) -> (i32, i32, i32, i32) {
    %c0_i32 = arith.constant 0 : i32
    %c0_i32_0 = arith.constant 0 : i32
    %c0_i32_1 = arith.constant 0 : i32
    %c0_i32_2 = arith.constant 0 : i32
    return %arg0, %c0_i32, %c0_i32_0, %c0_i32_1 : i32, i32, i32, i32
  }
  func.func @transform_1(%arg0: i32) -> (i32, i32, i32) {
    %c0_i32 = arith.constant 0 : i32
    %c0_i32_0 = arith.constant 0 : i32
    %c0_i32_1 = arith.constant 0 : i32
    %c0_i32_2 = arith.constant 0 : i32
    return %c0_i32, %c0_i32_0, %c0_i32_1 : i32, i32, i32
  }
  func.func @transform_2(%arg0: i32) -> (i32, i32, i32) {
    %c0_i32 = arith.constant 0 : i32
    %c0_i32_0 = arith.constant 0 : i32
    %c0_i32_1 = arith.constant 0 : i32
    %c0_i32_2 = arith.constant 0 : i32
    return %c0_i32, %c0_i32_0, %c0_i32_1 : i32, i32, i32
  }
  func.func @transform_3(%arg0: i32) -> (i32, i32, i32) {
    %c0_i32 = arith.constant 0 : i32
    %c0_i32_0 = arith.constant 0 : i32
    %c0_i32_1 = arith.constant 0 : i32
    %c0_i32_2 = arith.constant 0 : i32
    return %c0_i32, %c0_i32_0, %c0_i32_1 : i32, i32, i32
  }
  func.func @transform_4(%arg0: i32) -> (i32, i32, i32) {
    %c0_i32 = arith.constant 0 : i32
    %c0_i32_0 = arith.constant 0 : i32
    %c0_i32_1 = arith.constant 0 : i32
    %c0_i32_2 = arith.constant 0 : i32
    return %c0_i32, %c0_i32_0, %c0_i32_1 : i32, i32, i32
  }
  func.func @transform_5(%arg0: i32) -> (i32, i32, i32, i32) {
    %c0_i32 = arith.constant 0 : i32
    %c0_i32_0 = arith.constant 0 : i32
    %c0_i32_1 = arith.constant 0 : i32
    %c0_i32_2 = arith.constant 0 : i32
    return %arg0, %c0_i32, %c0_i32_0, %c0_i32_1 : i32, i32, i32, i32
  }
}

</mosaic_0001>

<bundles_post_ra>
// kernel: tpu_custom_call.1
= control target key start
LH: loop header
LB: loop body
LE: loop exit
PB: predicated region body
PF: predicated region fallthrough
CT: control target
= control target key end

     0   :  { %10 = vsyncpa [#allocation4], 0  ;;  %s11590_s0 = inlined_call_operand.vmem [shape: f32[2,18,18,4], index: 0, kind: input, shape index: {}]   ;;  %s11591_s1 = inlined_call_operand.vmem [shape: f32[9,4,16], index: 1, kind: input, shape index: {}]   ;;  %s11592_s2 = inlined_call_operand.vmem [shape: f32[2,1,16], index: 2, kind: input, shape index: {}]   ;;  %s11593_s3 = inlined_call_operand.vmem [shape: f32[9,16,16], index: 3, kind: input, shape index: {}]   ;;  %s11594_s4 = inlined_call_operand.vmem [shape: f32[2,1,16], index: 4, kind: input, shape index: {}]   ;;  %s11595_s5 = inlined_call_operand.hbm [shape: f32[2,16,16,16], index: 5, kind: output, shape index: {}]  }
   0x1   :  { %12 = vsyncpa [#allocation4 + $0x1], 0  ;;  %s9063_s18 = smov 0   ;;  %s9065_s19 = smov 0  }
   0x2   :  { %s9067_s20 = smov 0   ;;  %s9069_s21 = smov 0  }
   0x3 LB: > { %s9084_s22 = sadd.s32 4294967295, %s9027_s21   ;;  %s6222_s23 = sadd.s32 4294967294, %s9027_s21   ;;  %s9027_s21 = sphi %s9069_s21, %s11956_s21   ;;  %s9023_s20 = sphi %s9067_s20, %s11955_s20   ;;  %s9019_s19 = sphi %s9065_s19, %s11954_s19   ;;  %s9015_s18 = sphi %s9063_s18, %s11953_s18  }
   0x4   : > { %s9088_s24 = sadd.s32 1, %s9027_s21   ;;  %s135_s25 = sadd.s32 1, %s9023_s20 }
   0x5   : > { %s132_s26 = ssub.s32 %s9027_s21, %s9088_s24  ;;  %p145_p0 = scmp.ne.s32.totalorder %s9023_s20, %s9019_s19 }
   0x6   : > { %p133_p1 = scmp.eq.s32.totalorder %s132_s26, 0  ;;  %p146_p2 = scmp.eq.s32.totalorder %s9084_s22, 1 }
   0x7   : > { %p151_p3 = scmp.ne.s32.totalorder %s9019_s19, %s9015_s18  ;;  %p152_p4 = scmp.eq.s32.totalorder %s6222_s23, 1 }
   0x8   : > { %s9099_s27 = scalar_select %p133_p1, %s9023_s20, %s135_s25  }
   0x9   : > { %p9101_p5 = por %p146_p2, %p145_p0  ;;  %p9105_p6 = por %p152_p4, %p151_p3 }
   0xa   : > { %p6225_p7 = scmp.ge.s32.totalorder %s9027_s21, 1  ;;  %p190_p8 = scmp.lt.s32.totalorder %s9027_s21, 3 }
   0xc   : > { %p191_p9 = pnand %p6225_p7, %p190_p8 }
   0xe   : > { %194 = sbr.rel (%p191_p9) target bundleno = 1579 (0x62b), region = 40 }
  0x15   : > { %v6228_v0 = vld [vmem:[%s11591_s1 + $0x4] sm:$0xf]  ;;  %vm474_vm0 = vcmask 1043456   ;;  %p218_p10 = scmp.lt.s32.totalorder %s9084_s22, 1  ;;  %v277_v1 = vld [vmem:[%s11591_s1] sm:$0xf] }
  0x16   : > { %7452 = vmatprep.subr.msk.mxu0 %vm474_vm0, %v6228_v0  ;;  %vm326_vm1 = vcmask 1046528   ;;  %vm409_vm2 = vcmask 31744   ;;  %v9177_v24 = vld [vmem:[%s11591_s1 + $0x8] sm:$0xf]  ;;  %vm995_vm3 = vcmask 1045504   ;;  %vm3135_vm4 = vcmask 130048  }
  0x17   : > { %7453 = vmatpush3.msk.msra.mxu0 %vm474_vm0, %v6228_v0  ;;  %s219_s9 = scalar_select %p218_p10, %s9084_s22, 1  ;;  %vm3138_vm5 = vcmask 123904  }
  0x18   : > { %7502 = vmatprep.subr.msk.mxu0 %vm474_vm0, %v277_v1  ;;  %s215_s26 = sand.u32 1, %s9019_s19   ;;  %s6848_s11 = sshll.u32 %s9084_s22, 12 }
  0x19   : > { %s8918_s10 = smul.u32 432, %s219_s9  ;;  %s6226_s9 = sshll.u32 %s215_s26, 8 }
  0x1a   : > { %s11539_s15 = scalar_lea.hbm %s11595_s5, %s6848_s11  ;;  %s11549_s22 = scalar_lea.sflag [#allocation4], %s215_s26 }
  0x1b   : > { %s9125_s13 = scalar_lea.vmem %s11590_s0, %s8918_s10  ;;  %s11414_s10 = scalar_lea.vmem [#allocation3], %s6226_s9 }
  0x1c   : > { %v9128_v2 = vld [vmem:[%s9125_s13] sm:$0xff]  ;;  %v9131_v3 = vld [vmem:[%s9125_s13 + $0x8] sm:$0xff]  ;;  %v9134_v4 = vld [vmem:[%s9125_s13 + $0x10] sm:$0x3]  ;;  %s6160_s12 = sshll.u32 %s11414_s10, 4  ;;  %s9030_s17 = smov [#allocation3]   ;;  %s11541_s12 = int_to_ptr.vmem [resolvable:$true] %s6160_s12 }
  0x1d   : > { %v327_v5 = vrot.slane %v9128_v2, 1  ;;  %v328_v6 = vrot.slane %v9131_v3, 1  ;;  %v330_v7 = vrot.slane %v9134_v4, 1  ;;  %v9140_v8 = vld [vmem:[%s9125_s13 + $0x18] sm:$0xff]  ;;  %v9143_v9 = vld [vmem:[%s9125_s13 + $0x20] sm:$0xff]  ;;  %v9151_v13 = vld [vmem:[%s9125_s13 + $0x30] sm:$0xff] }
  0x1e   : > { %v332_v10 = vrot.slane %v9140_v8, 1  ;;  %v333_v11 = vrot.slane %v9143_v9, 1  ;;  %v9148_v12 = vld [vmem:[%s9125_s13 + $0x28] sm:$0x3]  ;;  %v9154_v14 = vld [vmem:[%s9125_s13 + $0x38] sm:$0xff]  ;;  %v337_v18 = vrot.slane %v9151_v13, 1 }
  0x1f   : > { %v329_v15 = vsel %vm326_vm1, %v327_v5, %v328_v6  ;;  %v331_v16 = vsel %vm326_vm1, %v328_v6, %v330_v7  ;;  %v335_v17 = vrot.slane %v9148_v12, 1  ;;  %v9161_v19 = vld [vmem:[%s9125_s13 + $0x40] sm:$0x3]  ;;  %v338_v21 = vrot.slane %v9154_v14, 1  ;;  %v9169_v22 = vld [vmem:[%s9125_s13 + $0x48] sm:$0xff]  ;;  %v9172_v23 = vld [vmem:[%s9125_s13 + $0x50] sm:$0xff] }
  0x20   : > { %7454 = vmatprep.mubr.msk.f32.mxu0 %vm409_vm2, %v329_v15  ;;  %v9165_v20 = vsel %vm326_vm1, %v332_v10, %v333_v11  ;;  %v340_v26 = vrot.slane %v9161_v19, 1  ;;  %v342_v28 = vrot.slane %v9169_v22, 1  ;;  %v343_v29 = vrot.slane %v9172_v23, 1  ;;  %v9193_v30 = vld [vmem:[%s9125_s13 + $0x58] sm:$0x3]  ;;  %v9198_v31 = vld [vmem:[%s9125_s13 + $0x60] sm:$0xff] }
  0x21   : > { %7455 = vmatmul.mubr.msk.f32.vlgmr.msra.gmra.mrb[0].mxu0 %vm409_vm2, %v331_v16  ;;  %v9184_v25 = vsel %vm326_vm1, %v333_v11, %v335_v17  ;;  %v9188_v27 = vsel %vm326_vm1, %v337_v18, %v338_v21  ;;  %v9201_v32 = vld [vmem:[%s9125_s13 + $0x68] sm:$0xff]  ;;  %v345_v34 = vrot.slane %v9193_v30, 1  ;;  %v347_v36 = vrot.slane %v9198_v31, 1  ;;  %v9217_v38 = vld [vmem:[%s9125_s13 + $0x70] sm:$0x3]  ;;  %v9220_v39 = vld [vmem:[%s9125_s13 + $0x78] sm:$0xff] }
  0x22   : > { %7503 = vmatpush3.msk.msra.mxu0 %vm474_vm0, %v277_v1  ;;  %7457 = vmatprep.mubr.msk.f32.mxu0 %vm409_vm2, %v9165_v20  ;;  %v9208_v33 = vsel %vm326_vm1, %v338_v21, %v340_v26  ;;  %v9212_v35 = vsel %vm326_vm1, %v342_v28, %v343_v29  ;;  %v348_v37 = vrot.slane %v9201_v32, 1  ;;  %v9223_v40 = vld [vmem:[%s9125_s13 + $0x80] sm:$0xff]  ;;  %v350_v42 = vrot.slane %v9217_v38, 1  ;;  %v9239_v46 = vld [vmem:[%s9125_s13 + $0x88] sm:$0x3]  ;;  %v9242_v47 = vld [vmem:[%s9125_s13 + $0x90] sm:$0xff] }
  0x23   : > { %7552 = vmatprep.subr.msk.mxu0 %vm474_vm0, %v9177_v24  ;;  %11745 = vst [vmem:[#allocation6_spill] sm:$0xff] %v9212_v35  ;;  %v9230_v41 = vsel %vm326_vm1, %v343_v29, %v345_v34  ;;  %v352_v44 = vrot.slane %v9220_v39, 1  ;;  %v353_v45 = vrot.slane %v9223_v40, 1  ;;  %v9245_v48 = vld [vmem:[%s9125_s13 + $0x98] sm:$0xff]  ;;  %v355_v50 = vrot.slane %v9239_v46, 1  ;;  %v9264_v55 = vld [vmem:[%s9125_s13 + $0xa8] sm:$0xff] }
  0x24   : > { %11746 = vst [vmem:[#allocation7_spill] sm:$0xff] %v9230_v41  ;;  %v9234_v43 = vsel %vm326_vm1, %v347_v36, %v348_v37  ;;  %v9252_v49 = vsel %vm326_vm1, %v348_v37, %v350_v42  ;;  %v357_v52 = vrot.slane %v9242_v47, 1  ;;  %v358_v53 = vrot.slane %v9245_v48, 1  ;;  %v9261_v54 = vld [vmem:[%s9125_s13 + $0xa0] sm:$0x3]  ;;  %v9267_v56 = vld [vmem:[%s9125_s13 + $0xb0] sm:$0xff] }
  0x25   : > { %7458 = vmatmul.mubr.msk.f32.gmra.mrb[2].mxu0 %vm409_vm2, %v9184_v25  ;;  %11747 = vst [vmem:[#allocation8_spill] sm:$0xff] %v9234_v43  ;;  %11748 = vst [vmem:[#allocation9_spill] sm:$0xff] %v9252_v49  ;;  %v9256_v51 = vsel %vm326_vm1, %v352_v44, %v353_v45  ;;  %v9274_v57 = vsel %vm326_vm1, %v353_v45, %v355_v50  ;;  %v360_v58 = vrot.slane %v9261_v54, 1  ;;  %v362_v60 = vrot.slane %v9264_v55, 1  ;;  %v9283_v62 = vld [vmem:[%s9125_s13 + $0xb8] sm:$0x3] }
  0x26   : > { %7460 = vmatprep.mubr.msk.f32.mxu0 %vm409_vm2, %v9188_v27  ;;  %11749 = vst [vmem:[#allocation10_spill] sm:$0xff] %v9256_v51  ;;  %11750 = vst [vmem:[#allocation11_spill] sm:$0xff] %v9274_v57  ;;  %v9278_v59 = vsel %vm326_vm1, %v357_v52, %v358_v53  ;;  %v363_v61 = vrot.slane %v9267_v56, 1  ;;  %v9286_v63 = vld [vmem:[%s9125_s13 + $0xc0] sm:$0xff]  ;;  %v9289_v0 = vld [vmem:[%s9125_s13 + $0xc8] sm:$0xff]  ;;  %v365_v5 = vrot.slane %v9283_v62, 1 }
  0x27   : > { %11751 = vst [vmem:[#allocation12_spill] sm:$0xff] %v9278_v59  ;;  %v9296_v1 = vsel %vm326_vm1, %v358_v53, %v360_v58  ;;  %v367_v7 = vrot.slane %v9286_v63, 1  ;;  %v368_v10 = vrot.slane %v9289_v0, 1  ;;  %v9305_v11 = vld [vmem:[%s9125_s13 + $0xd0] sm:$0x3]  ;;  %v9308_v15 = vld [vmem:[%s9125_s13 + $0xd8] sm:$0xff] }
  0x28   : > { %11752 = vst [vmem:[#allocation13_spill] sm:$0xff] %v9296_v1  ;;  %v9300_v6 = vsel %vm326_vm1, %v362_v60, %v363_v61  ;;  %v9311_v16 = vld [vmem:[%s9125_s13 + $0xe0] sm:$0xff]  ;;  %v9318_v17 = vsel %vm326_vm1, %v363_v61, %v365_v5  ;;  %v370_v18 = vrot.slane %v9305_v11, 1  ;;  %v372_v26 = vrot.slane %v9308_v15, 1  ;;  %v9327_v29 = vld [vmem:[%s9125_s13 + $0xe8] sm:$0x3] }
  0x29   : > { %7461 = vmatmul.mubr.msk.f32.gmra.mrb[4].mxu0 %vm409_vm2, %v9208_v33  ;;  %11753 = vst [vmem:[#allocation14_spill] sm:$0xff] %v9300_v6  ;;  %11754 = vst [vmem:[#allocation15_spill] sm:$0xff] %v9318_v17  ;;  %v9322_v21 = vsel %vm326_vm1, %v367_v7, %v368_v10  ;;  %v373_v28 = vrot.slane %v9311_v16, 1  ;;  %v9330_v34 = vld [vmem:[%s9125_s13 + $0xf0] sm:$0xff]  ;;  %v9333_v36 = vld [vmem:[%s9125_s13 + $0xf8] sm:$0xff]  ;;  %v375_v42 = vrot.slane %v9327_v29, 1 }
  0x2a   : > { %7463 = vmatprep.mubr.msk.f32.mxu0 %vm409_vm2, %v9212_v35  ;;  %11755 = vst [vmem:[#allocation16_spill] sm:$0xff] %v9322_v21  ;;  %v9340_v37 = vsel %vm326_vm1, %v368_v10, %v370_v18  ;;  %v377_v45 = vrot.slane %v9330_v34, 1  ;;  %v378_v50 = vrot.slane %v9333_v36, 1  ;;  %v9349_v52 = vld [vmem:[%s9125_s13 + $0x100] sm:$0x3]  ;;  %v9352_v53 = vld [vmem:[%s9125_s13 + $0x108] sm:$0xff] }
  0x2b   : > { %11756 = vst [vmem:[#allocation17_spill] sm:$0xff] %v9340_v37  ;;  %v9344_v44 = vsel %vm326_vm1, %v372_v26, %v373_v28  ;;  %v9355_v58 = vld [vmem:[%s9125_s13 + $0x110] sm:$0xff]  ;;  %v9362_v60 = vsel %vm326_vm1, %v373_v28, %v375_v42  ;;  %v380_v61 = vrot.slane %v9349_v52, 1  ;;  %v382_v7 = vrot.slane %v9352_v53, 1  ;;  %v9371_v18 = vld [vmem:[%s9125_s13 + $0x118] sm:$0x3] }
  0x2c   : > { %11757 = vst [vmem:[#allocation18_spill] sm:$0xff] %v9344_v44  ;;  %11758 = vst [vmem:[#allocation19_spill] sm:$0xff] %v9362_v60  ;;  %v9366_v5 = vsel %vm326_vm1, %v377_v45, %v378_v50  ;;  %v383_v10 = vrot.slane %v9355_v58, 1  ;;  %v9374_v26 = vld [vmem:[%s9125_s13 + $0x120] sm:$0xff]  ;;  %v385_v42 = vrot.slane %v9371_v18, 1  ;;  %s8965_s16 = scalar_lea.vmem %s11541_s12, 4096 }
  0x2d   : > { %7464 = vmatmul.mubr.msk.f32.gmra.mrb[6].mxu0 %vm409_vm2, %v9230_v41  ;;  %11759 = vst [vmem:[#allocation20_spill] sm:$0xff] %v9366_v5  ;;  %v9384_v28 = vsel %vm326_vm1, %v378_v50, %v380_v61  ;;  %v9459_v35 = vld [vmem:[%s9125_s13 + $0x178] sm:$0x3]  ;;  %p8966_p11 = scmp.ne.s32.totalorder %s11541_s12, %s8965_s16  ;;  %s8969_s23 = sshll.u32 %s9030_s17, 4  ;;  %s8970_s23 = int_to_ptr.vmem [resolvable:$false] %s8969_s23 }
  0x2e   : > { %7466 = vmatprep.mubr.msk.f32.mxu0 %vm409_vm2, %v9234_v43  ;;  %11760 = vst [vmem:[#allocation21_spill] sm:$0xff] %v9384_v28  ;;  %v9388_v45 = vsel %vm326_vm1, %v382_v7, %v383_v10  ;;  %v9406_v50 = vsel %vm326_vm1, %v383_v10, %v385_v42  ;;  %v9440_v43 = vld [vmem:[%s9125_s13 + $0x168] sm:$0xff]  ;;  %s8971_s25 = scalar_lea.vmem %s8970_s23, 8192  ;;  %p8972_p0 = scmp.lt.s32.totalorder %s11541_s12, %s8970_s23 }
  0x2f   : > { %11761 = vst [vmem:[#allocation22_spill] sm:$0xff] %v9388_v45  ;;  %11762 = vst [vmem:[#allocation23_spill] sm:$0xff] %v9406_v50  ;;  %p8967_p12 = pnand %p8966_p11, %p9101_p5  ;;  %p8973_p1 = scmp.lt.s32.totalorder %s8971_s25, %s8965_s16 }
  0x31   : > { %7467 = vmatmul.mubr.msk.f32.gmra.mrb[8].mxu0 %vm409_vm2, %v9252_v49  ;;  %v9437_v49 = vld [vmem:[%s9125_s13 + $0x160] sm:$0x3]  ;;  %p8968_p13 = pneg %p8967_p12  ;;  %p8974_p2 = por %p8973_p1, %p8972_p0 }
  0x32   : > { %7469 = vmatprep.mubr.msk.f32.mxu0 %vm409_vm2, %v9256_v51 }
  0x33   : > { %p8975_p3 = pnand %p8974_p2, %p8968_p13 }
  0x35   : > { %7470 = vmatmul.mubr.msk.f32.gmra.mrb[10].mxu0 %vm409_vm2, %v9274_v57 }
  0x36   : > { %7472 = vmatprep.mubr.msk.f32.mxu0 %vm409_vm2, %v9278_v59  ;;  %v9415_v59 = vld [vmem:[%s9125_s13 + $0x148] sm:$0x3] }
  0x37   : > { %v395_v10 = vrot.slane %v9415_v59, 1 }
  0x39   : > { %7473 = vmatmul.mubr.msk.f32.gmra.mrb[12].mxu0 %vm409_vm2, %v9296_v1 }
  0x3a   : > { %7475 = vmatprep.mubr.msk.f32.mxu0 %vm409_vm2, %v9300_v6 }
  0x3d   : > { %7476 = vmatmul.mubr.msk.f32.gmra.mrb[14].mxu0 %vm409_vm2, %v9318_v17  ;;  %v9393_v17 = vld [vmem:[%s9125_s13 + $0x130] sm:$0x3] }
  0x3e   : > { %7478 = vmatprep.mubr.msk.f32.mxu0 %vm409_vm2, %v9322_v21  ;;  %v390_v61 = vrot.slane %v9393_v17, 1 }
  0x41   : > { %7479 = vmatmul.mubr.msk.f32.gmra.mrb[16].mxu0 %vm409_vm2, %v9340_v37  ;;  %v387_v37 = vrot.slane %v9374_v26, 1 }
  0x42   : > { %7481 = vmatprep.mubr.msk.f32.mxu0 %vm409_vm2, %v9344_v44  ;;  %v9377_v44 = vld [vmem:[%s9125_s13 + $0x128] sm:$0xff] }
  0x43   : > { %v388_v21 = vrot.slane %v9377_v44, 1 }
  0x45   : > { %7482 = vmatmul.mubr.msk.f32.gmra.mrb[18].mxu0 %vm409_vm2, %v9362_v60  ;;  %v9396_v60 = vld [vmem:[%s9125_s13 + $0x138] sm:$0xff]  ;;  %v9410_v7 = vsel %vm326_vm1, %v387_v37, %v388_v21  ;;  %v9428_v37 = vsel %vm326_vm1, %v388_v21, %v390_v61 }
  0x46   : > { %7484 = vmatprep.mubr.msk.f32.mxu0 %vm409_vm2, %v9366_v5  ;;  %v9399_v5 = vld [vmem:[%s9125_s13 + $0x140] sm:$0xff]  ;;  %11763 = vst [vmem:[#allocation24_spill] sm:$0xff] %v9410_v7  ;;  %v392_v6 = vrot.slane %v9396_v60, 1  ;;  %11764 = vst [vmem:[#allocation25_spill] sm:$0xff] %v9428_v37 }
  0x47   : > { %v393_v1 = vrot.slane %v9399_v5, 1 }
  0x49   : > { %7485 = vmatmul.mubr.msk.f32.gmra.mrb[20].mxu0 %vm409_vm2, %v9384_v28  ;;  %v9418_v28 = vld [vmem:[%s9125_s13 + $0x150] sm:$0xff]  ;;  %v9432_v42 = vsel %vm326_vm1, %v392_v6, %v393_v1  ;;  %v9450_v21 = vsel %vm326_vm1, %v393_v1, %v395_v10  ;;  %v400_v6 = vrot.slane %v9437_v49, 1  ;;  %v405_v10 = vrot.slane %v9459_v35, 1 }
  0x4a   : > { %7487 = vmatprep.mubr.msk.f32.mxu0 %vm409_vm2, %v9388_v45  ;;  %v9421_v45 = vld [vmem:[%s9125_s13 + $0x158] sm:$0xff]  ;;  %11765 = vst [vmem:[#allocation26_spill] sm:$0xff] %v9432_v42  ;;  %v397_v57 = vrot.slane %v9418_v28, 1 }
  0x4b   : > { %v398_v51 = vrot.slane %v9421_v45, 1 }
  0x4d   : > { %7488 = vmatmul.mubr.msk.f32.gmra.mrb[22].mxu0 %vm409_vm2, %v9406_v50  ;;  %v9443_v50 = vld [vmem:[%s9125_s13 + $0x170] sm:$0xff]  ;;  %v9454_v61 = vsel %vm326_vm1, %v397_v57, %v398_v51  ;;  %v9466_v1 = vsel %vm326_vm1, %v398_v51, %v400_v6  ;;  %v6329_v51 = vld [vmem:[%s11591_s1 + $0xc] sm:$0xf] }
  0x4e   : > { %7490 = vmatprep.mubr.msk.f32.mxu0 %vm409_vm2, %v9410_v7  ;;  %11766 = vst [vmem:[#allocation27_spill] sm:$0xff] %v9454_v61  ;;  %v402_v7 = vrot.slane %v9440_v43, 1  ;;  %v403_v41 = vrot.slane %v9443_v50, 1  ;;  %11767 = vst [vmem:[#allocation28_spill] sm:$0xff] %v9466_v1 }
  0x50   : > { %v9470_v57 = vsel %vm326_vm1, %v402_v7, %v403_v41  ;;  %v999_v7 = vrot.slane %v9134_v4, 2 }
  0x51   : > { %7491 = vmatmul.mubr.msk.f32.gmra.mrb[24].mxu0 %vm409_vm2, %v9428_v37  ;;  %11768 = vst [vmem:[#allocation29_spill] sm:$0xff] %v9470_v57 }
  0x52   : > { %7493 = vmatprep.mubr.msk.f32.mxu0 %vm409_vm2, %v9432_v42  ;;  %v9477_v42 = vsel %vm326_vm1, %v403_v41, %v405_v10  ;;  %v997_v41 = vrot.slane %v9131_v3, 2  ;;  %v1001_v10 = vrot.slane %v9140_v8, 2 }
  0x53   : > { %11769 = vst [vmem:[#allocation30_spill] sm:$0xff] %v9477_v42 }
  0x55   : > { %7494 = vmatmul.mubr.msk.f32.gmra.mrb[26].mxu0 %vm409_vm2, %v9450_v21 }
  0x56   : > { %7496 = vmatprep.mubr.msk.f32.mxu0 %vm409_vm2, %v9454_v61 }
  0x59   : > { %7497 = vmatmul.mubr.msk.f32.gmra.mrb[28].mxu0 %vm409_vm2, %v9466_v1  ;;  %v9568_v1 = vld [vmem:[%s11591_s1 + $0x10] sm:$0xf] }
  0x5a   : > { %7499 = vmatprep.mubr.msk.f32.mxu0 %vm409_vm2, %v9470_v57  ;;  %v1006_v57 = vrot.slane %v9151_v13, 2 }
  0x5d   : > { %7500 = vmatmul.mubr.msk.f32.gmra.mrb[30].mxu0 %vm409_vm2, %v9477_v42  ;;  %v1002_v42 = vrot.slane %v9143_v9, 2 }
  0x5e   : > { %7504 = vmatprep.mubr.msk.f32.mxu0 %vm409_vm2, %v9128_v2 }
  0x5f   : > { %v9561_v4 = vsel %vm995_vm3, %v1001_v10, %v1002_v42  ;;  %v1012_v10 = vrot.slane %v9172_v23, 2 }
  0x61   : > { %7505 = vmatmul.mubr.msk.f32.vlgmr.msra.gmra.mrb[0].mxu0 %vm409_vm2, %v9131_v3  ;;  %v1004_v3 = vrot.slane %v9148_v12, 2 }
  0x62   : > { %7553 = vmatpush3.msk.msra.mxu0 %vm474_vm0, %v9177_v24  ;;  %7507 = vmatprep.mubr.msk.f32.mxu0 %vm409_vm2, %v9140_v8  ;;  %v996_v24 = vrot.slane %v9128_v2, 2  ;;  %v1000_v2 = vsel %vm995_vm3, %v997_v41, %v999_v7 }
  0x63   : > { %7602 = vmatprep.subr.msk.mxu0 %vm474_vm0, %v6329_v51  ;;  %v9575_v12 = vsel %vm995_vm3, %v1002_v42, %v1004_v3 }
  0x64   : > { %v998_v6 = vsel %vm995_vm3, %v996_v24, %v997_v41  ;;  %v1007_v24 = vrot.slane %v9154_v14, 2  ;;  %v1009_v41 = vrot.slane %v9161_v19, 2  ;;  %v1014_v19 = vrot.slane %v9193_v30, 2 }
  0x65   : > { %7508 = vmatmul.mubr.msk.f32.gmra.mrb[2].mxu0 %vm409_vm2, %v9143_v9 }
  0x66   : > { %7510 = vmatprep.mubr.msk.f32.mxu0 %vm409_vm2, %v9151_v13  ;;  %v9579_v7 = vsel %vm995_vm3, %v1006_v57, %v1007_v24  ;;  %v9590_v42 = vsel %vm995_vm3, %v1007_v24, %v1009_v41  ;;  %v9603_v3 = vsel %vm995_vm3, %v1012_v10, %v1014_v19  ;;  %v1019_v24 = vrot.slane %v9217_v38, 2 }
  0x67   : > { %v1021_v41 = vrot.slane %v9220_v39, 2  ;;  %v1026_v19 = vrot.slane %v9242_v47, 2 }
  0x69   : > { %7511 = vmatmul.mubr.msk.f32.gmra.mrb[4].mxu0 %vm409_vm2, %v9154_v14 }
  0x6a   : > { %7513 = vmatprep.mubr.msk.f32.mxu0 %vm409_vm2, %v9169_v22 }
  0x6d   : > { %7514 = vmatmul.mubr.msk.f32.gmra.mrb[6].mxu0 %vm409_vm2, %v9172_v23 }
  0x6e   : > { %7516 = vmatprep.mubr.msk.f32.mxu0 %vm409_vm2, %v9198_v31 }
  0x71   : > { %7517 = vmatmul.mubr.msk.f32.gmra.mrb[8].mxu0 %vm409_vm2, %v9201_v32 }
  0x72   : > { %7519 = vmatprep.mubr.msk.f32.mxu0 %vm409_vm2, %v9220_v39 }
  0x75   : > { %7520 = vmatmul.mubr.msk.f32.gmra.mrb[10].mxu0 %vm409_vm2, %v9223_v40 }
  0x76   : > { %7522 = vmatprep.mubr.msk.f32.mxu0 %vm409_vm2, %v9242_v47 }
  0x79   : > { %7523 = vmatmul.mubr.msk.f32.gmra.mrb[12].mxu0 %vm409_vm2, %v9245_v48 }
  0x7a   : > { %7525 = vmatprep.mubr.msk.f32.mxu0 %vm409_vm2, %v9264_v55 }
  0x7d   : > { %7526 = vmatmul.mubr.msk.f32.gmra.mrb[14].mxu0 %vm409_vm2, %v9267_v56 }
  0x7e   : > { %7528 = vmatprep.mubr.msk.f32.mxu0 %vm409_vm2, %v9286_v63 }
  0x81   : > { %7529 = vmatmul.mubr.msk.f32.gmra.mrb[16].mxu0 %vm409_vm2, %v9289_v0 }
  0x82   : > { %7531 = vmatprep.mubr.msk.f32.mxu0 %vm409_vm2, %v9308_v15 }
  0x85   : > { %7532 = vmatmul.mubr.msk.f32.gmra.mrb[18].mxu0 %vm409_vm2, %v9311_v16 }
  0x86   : > { %7534 = vmatprep.mubr.msk.f32.mxu0 %vm409_vm2, %v9330_v34 }
  0x89   : > { %7535 = vmatmul.mubr.msk.f32.gmra.mrb[20].mxu0 %vm409_vm2, %v9333_v36 }
  0x8a   : > { %7537 = vmatprep.mubr.msk.f32.mxu0 %vm409_vm2, %v9352_v53 }
  0x8d   : > { %7538 = vmatmul.mubr.msk.f32.gmra.mrb[22].mxu0 %vm409_vm2, %v9355_v58 }
  0x8e   : > { %7540 = vmatprep.mubr.msk.f32.mxu0 %vm409_vm2, %v9374_v26 }
  0x91   : > { %7541 = vmatmul.mubr.msk.f32.gmra.mrb[24].mxu0 %vm409_vm2, %v9377_v44 }
  0x92   : > { %7543 = vmatprep.mubr.msk.f32.mxu0 %vm409_vm2, %v9396_v60 }
  0x95   : > { %7544 = vmatmul.mubr.msk.f32.gmra.mrb[26].mxu0 %vm409_vm2, %v9399_v5 }
  0x96   : > { %7546 = vmatprep.mubr.msk.f32.mxu0 %vm409_vm2, %v9418_v28 }
  0x99   : > { %7547 = vmatmul.mubr.msk.f32.gmra.mrb[28].mxu0 %vm409_vm2, %v9421_v45 }
  0x9a   : > { %7549 = vmatprep.mubr.msk.f32.mxu0 %vm409_vm2, %v9440_v43 }
  0x9d   : > { %7550 = vmatmul.mubr.msk.f32.gmra.mrb[30].mxu0 %vm409_vm2, %v9443_v50 }
  0x9e   : > { %7554 = vmatprep.mubr.msk.f32.mxu0 %vm409_vm2, %v998_v6  ;;  %v1011_v6 = vrot.slane %v9169_v22, 2 }
  0xa0   : > { %v9594_v57 = vsel %vm995_vm3, %v1011_v6, %v1012_v10  ;;  %v1022_v6 = vrot.slane %v9223_v40, 2  ;;  %v1024_v10 = vrot.slane %v9239_v46, 2 }
  0xa1   : > { %7555 = vmatmul.mubr.msk.f32.vlgmr.msra.gmra.mrb[0].mxu0 %vm409_vm2, %v1000_v2  ;;  %11770 = vst [vmem:[#allocation31_spill] sm:$0xff] %v9594_v57  ;;  %v1017_v2 = vrot.slane %v9201_v32, 2 }
  0xa2   : > { %7603 = vmatpush3.msk.msra.mxu0 %vm474_vm0, %v6329_v51  ;;  %7557 = vmatprep.mubr.msk.f32.mxu0 %vm409_vm2, %v9561_v4  ;;  %v1016_v51 = vrot.slane %v9198_v31, 2  ;;  %v9620_v38 = vsel %vm995_vm3, %v1021_v41, %v1022_v6  ;;  %v1032_v41 = vrot.slane %v9267_v56, 2 }
  0xa3   : > { %7652 = vmatprep.subr.msk.mxu0 %vm474_vm0, %v9568_v1  ;;  %11772 = vst [vmem:[#allocation33_spill] sm:$0xff] %v9620_v38 }
  0xa4   : > { %v9607_v30 = vsel %vm995_vm3, %v1016_v51, %v1017_v2  ;;  %v1027_v51 = vrot.slane %v9245_v48, 2 }
  0xa5   : > { %7558 = vmatmul.mubr.msk.f32.gmra.mrb[2].mxu0 %vm409_vm2, %v9575_v12  ;;  %11771 = vst [vmem:[#allocation32_spill] sm:$0xff] %v9607_v30 }
  0xa6   : > { %7560 = vmatprep.mubr.msk.f32.mxu0 %vm409_vm2, %v9579_v7  ;;  %v9633_v46 = vsel %vm995_vm3, %v1026_v19, %v1027_v51  ;;  %v1037_v19 = vrot.slane %v9289_v0, 2 }
  0xa7   : > { %11773 = vst [vmem:[#allocation34_spill] sm:$0xff] %v9633_v46 }
  0xa9   : > { %7561 = vmatmul.mubr.msk.f32.gmra.mrb[4].mxu0 %vm409_vm2, %v9590_v42 }
  0xaa   : > { %7563 = vmatprep.mubr.msk.f32.mxu0 %vm409_vm2, %v9594_v57  ;;  %v9616_v57 = vsel %vm995_vm3, %v1017_v2, %v1019_v24  ;;  %v1029_v2 = vrot.slane %v9261_v54, 2  ;;  %v1031_v24 = vrot.slane %v9264_v55, 2 }
  0xac   : > { %v9646_v54 = vsel %vm995_vm3, %v1031_v24, %v1032_v41  ;;  %v1042_v24 = vrot.slane %v9311_v16, 2 }
  0xad   : > { %7564 = vmatmul.mubr.msk.f32.gmra.mrb[6].mxu0 %vm409_vm2, %v9603_v3  ;;  %11774 = vst [vmem:[#allocation35_spill] sm:$0xff] %v9646_v54 }
  0xae   : > { %7566 = vmatprep.mubr.msk.f32.mxu0 %vm409_vm2, %v9607_v30  ;;  %v9629_v30 = vsel %vm995_vm3, %v1022_v6, %v1024_v10  ;;  %v1034_v6 = vrot.slane %v9283_v62, 2  ;;  %v1036_v10 = vrot.slane %v9286_v63, 2 }
  0xb0   : > { %v9659_v62 = vsel %vm995_vm3, %v1036_v10, %v1037_v19  ;;  %v1047_v10 = vrot.slane %v9333_v36, 2 }
  0xb1   : > { %7567 = vmatmul.mubr.msk.f32.gmra.mrb[8].mxu0 %vm409_vm2, %v9616_v57  ;;  %11775 = vst [vmem:[#allocation36_spill] sm:$0xff] %v9659_v62 }
  0xb2   : > { %7569 = vmatprep.mubr.msk.f32.mxu0 %vm409_vm2, %v9620_v38  ;;  %v9642_v38 = vsel %vm995_vm3, %v1027_v51, %v1029_v2  ;;  %v1039_v51 = vrot.slane %v9305_v11, 2  ;;  %v1041_v2 = vrot.slane %v9308_v15, 2 }
  0xb4   : > { %v9672_v11 = vsel %vm995_vm3, %v1041_v2, %v1042_v24  ;;  %v1052_v2 = vrot.slane %v9355_v58, 2 }
  0xb5   : > { %7570 = vmatmul.mubr.msk.f32.gmra.mrb[10].mxu0 %vm409_vm2, %v9629_v30  ;;  %11776 = vst [vmem:[#allocation37_spill] sm:$0xff] %v9672_v11 }
  0xb6   : > { %7572 = vmatprep.mubr.msk.f32.mxu0 %vm409_vm2, %v9633_v46  ;;  %v9655_v46 = vsel %vm995_vm3, %v1032_v41, %v1034_v6  ;;  %v1044_v41 = vrot.slane %v9327_v29, 2  ;;  %v1046_v6 = vrot.slane %v9330_v34, 2 }
  0xb8   : > { %v9685_v29 = vsel %vm995_vm3, %v1046_v6, %v1047_v10  ;;  %v1057_v6 = vrot.slane %v9377_v44, 2 }
  0xb9   : > { %7573 = vmatmul.mubr.msk.f32.gmra.mrb[12].mxu0 %vm409_vm2, %v9642_v38  ;;  %11777 = vst [vmem:[#allocation38_spill] sm:$0xff] %v9685_v29 }
  0xba   : > { %7575 = vmatprep.mubr.msk.f32.mxu0 %vm409_vm2, %v9646_v54  ;;  %v9668_v54 = vsel %vm995_vm3, %v1037_v19, %v1039_v51  ;;  %v1049_v19 = vrot.slane %v9349_v52, 2  ;;  %v1051_v51 = vrot.slane %v9352_v53, 2 }
  0xbc   : > { %v9698_v52 = vsel %vm995_vm3, %v1051_v51, %v1052_v2  ;;  %v1062_v51 = vrot.slane %v9399_v5, 2 }
  0xbd   : > { %7576 = vmatmul.mubr.msk.f32.gmra.mrb[14].mxu0 %vm409_vm2, %v9655_v46  ;;  %11779 = vst [vmem:[#allocation40_spill] sm:$0xff] %v9698_v52 }
  0xbe   : > { %7578 = vmatprep.mubr.msk.f32.mxu0 %vm409_vm2, %v9659_v62  ;;  %v9681_v62 = vsel %vm995_vm3, %v1042_v24, %v1044_v41  ;;  %v1054_v24 = vrot.slane %v9371_v18, 2  ;;  %v1056_v41 = vrot.slane %v9374_v26, 2 }
  0xc0   : > { %v9711_v18 = vsel %vm995_vm3, %v1056_v41, %v1057_v6  ;;  %v1067_v41 = vrot.slane %v9421_v45, 2 }
  0xc1   : > { %7579 = vmatmul.mubr.msk.f32.gmra.mrb[16].mxu0 %vm409_vm2, %v9668_v54  ;;  %11780 = vst [vmem:[#allocation41_spill] sm:$0xff] %v9711_v18 }
  0xc2   : > { %7581 = vmatprep.mubr.msk.f32.mxu0 %vm409_vm2, %v9672_v11  ;;  %v9694_v11 = vsel %vm995_vm3, %v1047_v10, %v1049_v19  ;;  %v1059_v10 = vrot.slane %v9393_v17, 2  ;;  %v1061_v19 = vrot.slane %v9396_v60, 2 }
  0xc3   : > { %11778 = vst [vmem:[#allocation39_spill] sm:$0xff] %v9694_v11 }
  0xc4   : > { %v9724_v17 = vsel %vm995_vm3, %v1061_v19, %v1062_v51  ;;  %v1072_v19 = vrot.slane %v9443_v50, 2 }
  0xc5   : > { %7582 = vmatmul.mubr.msk.f32.gmra.mrb[18].mxu0 %vm409_vm2, %v9681_v62  ;;  %11782 = vst [vmem:[#allocation43_spill] sm:$0xff] %v9724_v17 }
  0xc6   : > { %7584 = vmatprep.mubr.msk.f32.mxu0 %vm409_vm2, %v9685_v29  ;;  %v9707_v29 = vsel %vm995_vm3, %v1052_v2, %v1054_v24  ;;  %v1064_v2 = vrot.slane %v9415_v59, 2  ;;  %v1066_v24 = vrot.slane %v9418_v28, 2 }
  0xc8   : > { %v9737_v59 = vsel %vm995_vm3, %v1066_v24, %v1067_v41  ;;  %v11784_v24 = vld [vmem:[#allocation6_spill] sm:$0xff] }
  0xc9   : > { %7585 = vmatmul.mubr.msk.f32.gmra.mrb[20].mxu0 %vm409_vm2, %v9694_v11  ;;  %11783 = vst [vmem:[#allocation44_spill] sm:$0xff] %v9737_v59 }
  0xca   : > { %7587 = vmatprep.mubr.msk.f32.mxu0 %vm409_vm2, %v9698_v52  ;;  %v9720_v52 = vsel %vm995_vm3, %v1057_v6, %v1059_v10  ;;  %v1069_v6 = vrot.slane %v9437_v49, 2  ;;  %v1071_v10 = vrot.slane %v9440_v43, 2 }
  0xcb   : > { %11781 = vst [vmem:[#allocation42_spill] sm:$0xff] %v9720_v52 }
  0xcc   : > { %v9750_v49 = vsel %vm995_vm3, %v1071_v10, %v1072_v19  ;;  %v11789_v10 = vld [vmem:[#allocation11_spill] sm:$0xff] }
  0xcd   : > { %7588 = vmatmul.mubr.msk.f32.gmra.mrb[22].mxu0 %vm409_vm2, %v9707_v29 }
  0xce   : > { %7590 = vmatprep.mubr.msk.f32.mxu0 %vm409_vm2, %v9711_v18  ;;  %v9733_v18 = vsel %vm995_vm3, %v1062_v51, %v1064_v2  ;;  %v1074_v51 = vrot.slane %v9459_v35, 2  ;;  %v6397_v35 = vld [vmem:[%s11591_s1 + $0x14] sm:$0xf] }
  0xd0   : > { %v9757_v2 = vsel %vm995_vm3, %v1072_v19, %v1074_v51  ;;  %v11790_v19 = vld [vmem:[#allocation12_spill] sm:$0xff]  ;;  %v11791_v51 = vld [vmem:[#allocation13_spill] sm:$0xff] }
  0xd1   : > { %7591 = vmatmul.mubr.msk.f32.gmra.mrb[24].mxu0 %vm409_vm2, %v9720_v52 }
  0xd2   : > { %7593 = vmatprep.mubr.msk.f32.mxu0 %vm409_vm2, %v9724_v17  ;;  %v9746_v17 = vsel %vm995_vm3, %v1067_v41, %v1069_v6  ;;  %v11786_v41 = vld [vmem:[#allocation8_spill] sm:$0xff]  ;;  %v11788_v6 = vld [vmem:[#allocation10_spill] sm:$0xff] }
  0xd5   : > { %7594 = vmatmul.mubr.msk.f32.gmra.mrb[26].mxu0 %vm409_vm2, %v9733_v18 }
  0xd6   : > { %7596 = vmatprep.mubr.msk.f32.mxu0 %vm409_vm2, %v9737_v59 }
  0xd9   : > { %7597 = vmatmul.mubr.msk.f32.gmra.mrb[28].mxu0 %vm409_vm2, %v9746_v17 }
  0xda   : > { %7599 = vmatprep.mubr.msk.f32.mxu0 %vm409_vm2, %v9750_v49 }
  0xdd   : > { %7600 = vmatmul.mubr.msk.f32.gmra.mrb[30].mxu0 %vm409_vm2, %v9757_v2 }
  0xde   : > { %7604 = vmatprep.mubr.msk.f32.mxu0 %vm409_vm2, %v9140_v8  ;;  %v9826_v8 = vld [vmem:[%s9125_s13 + $0x180] sm:$0xff] }
  0xe1   : > { %7605 = vmatmul.mubr.msk.f32.vlgmr.msra.gmra.mrb[0].mxu0 %vm409_vm2, %v9143_v9  ;;  %v9833_v9 = vld [vmem:[%s9125_s13 + $0x188] sm:$0xff] }
  0xe2   : > { %7653 = vmatpush3.msk.msra.mxu0 %vm474_vm0, %v9568_v1  ;;  %7607 = vmatprep.mubr.msk.f32.mxu0 %vm409_vm2, %v9151_v13  ;;  %v6431_v1 = vld [vmem:[%s11591_s1 + $0x18] sm:$0xf] }
  0xe3   : > { %7702 = vmatprep.subr.msk.mxu0 %vm474_vm0, %v6397_v35 }
  0xe5   : > { %7608 = vmatmul.mubr.msk.f32.gmra.mrb[2].mxu0 %vm409_vm2, %v9154_v14 }
  0xe6   : > { %7610 = vmatprep.mubr.msk.f32.mxu0 %vm409_vm2, %v9169_v22 }
  0xe9   : > { %7611 = vmatmul.mubr.msk.f32.gmra.mrb[4].mxu0 %vm409_vm2, %v9172_v23 }
  0xea   : > { %7613 = vmatprep.mubr.msk.f32.mxu0 %vm409_vm2, %v9198_v31 }
  0xed   : > { %7614 = vmatmul.mubr.msk.f32.gmra.mrb[6].mxu0 %vm409_vm2, %v9201_v32 }
  0xee   : > { %7616 = vmatprep.mubr.msk.f32.mxu0 %vm409_vm2, %v9220_v39 }
  0xf1   : > { %7617 = vmatmul.mubr.msk.f32.gmra.mrb[8].mxu0 %vm409_vm2, %v9223_v40 }
  0xf2   : > { %7619 = vmatprep.mubr.msk.f32.mxu0 %vm409_vm2, %v9242_v47 }
  0xf5   : > { %7620 = vmatmul.mubr.msk.f32.gmra.mrb[10].mxu0 %vm409_vm2, %v9245_v48 }
  0xf6   : > { %7622 = vmatprep.mubr.msk.f32.mxu0 %vm409_vm2, %v9264_v55 }
  0xf9   : > { %7623 = vmatmul.mubr.msk.f32.gmra.mrb[12].mxu0 %vm409_vm2, %v9267_v56 }
  0xfa   : > { %7625 = vmatprep.mubr.msk.f32.mxu0 %vm409_vm2, %v9286_v63 }
  0xfd   : > { %7626 = vmatmul.mubr.msk.f32.gmra.mrb[14].mxu0 %vm409_vm2, %v9289_v0 }
  0xfe   : > { %7628 = vmatprep.mubr.msk.f32.mxu0 %vm409_vm2, %v9308_v15 }
 0x101   : > { %7629 = vmatmul.mubr.msk.f32.gmra.mrb[16].mxu0 %vm409_vm2, %v9311_v16 }
 0x102   : > { %7631 = vmatprep.mubr.msk.f32.mxu0 %vm409_vm2, %v9330_v34 }
 0x105   : > { %7632 = vmatmul.mubr.msk.f32.gmra.mrb[18].mxu0 %vm409_vm2, %v9333_v36 }
 0x106   : > { %7634 = vmatprep.mubr.msk.f32.mxu0 %vm409_vm2, %v9352_v53 }
 0x109   : > { %7635 = vmatmul.mubr.msk.f32.gmra.mrb[20].mxu0 %vm409_vm2, %v9355_v58 }
 0x10a   : > { %7637 = vmatprep.mubr.msk.f32.mxu0 %vm409_vm2, %v9374_v26 }
 0x10d   : > { %7638 = vmatmul.mubr.msk.f32.gmra.mrb[22].mxu0 %vm409_vm2, %v9377_v44 }
 0x10e   : > { %7640 = vmatprep.mubr.msk.f32.mxu0 %vm409_vm2, %v9396_v60 }
 0x111   : > { %7641 = vmatmul.mubr.msk.f32.gmra.mrb[24].mxu0 %vm409_vm2, %v9399_v5 }
 0x112   : > { %7643 = vmatprep.mubr.msk.f32.mxu0 %vm409_vm2, %v9418_v28 }
 0x115   : > { %7644 = vmatmul.mubr.msk.f32.gmra.mrb[26].mxu0 %vm409_vm2, %v9421_v45 }
 0x116   : > { %7646 = vmatprep.mubr.msk.f32.mxu0 %vm409_vm2, %v9440_v43 }
 0x119   : > { %7647 = vmatmul.mubr.msk.f32.gmra.mrb[28].mxu0 %vm409_vm2, %v9443_v50 }
 0x11a   : > { %7649 = vmatprep.mubr.msk.f32.mxu0 %vm409_vm2, %v9826_v8 }
 0x11d   : > { %7650 = vmatmul.mubr.msk.f32.gmra.mrb[30].mxu0 %vm409_vm2, %v9833_v9 }
 0x11e   : > { %7654 = vmatprep.mubr.msk.f32.mxu0 %vm409_vm2, %v9165_v20  ;;  %v11785_v20 = vld [vmem:[#allocation7_spill] sm:$0xff] }
 0x121   : > { %7655 = vmatmul.mubr.msk.f32.vlgmr.msra.gmra.mrb[0].mxu0 %vm409_vm2, %v9184_v25  ;;  %v11787_v25 = vld [vmem:[#allocation9_spill] sm:$0xff] }
 0x122   : > { %7703 = vmatpush3.msk.msra.mxu0 %vm474_vm0, %v6397_v35  ;;  %7657 = vmatprep.mubr.msk.f32.mxu0 %vm409_vm2, %v9188_v27  ;;  %v11792_v35 = vld [vmem:[#allocation14_spill] sm:$0xff] }
 0x123   : > { %7752 = vmatprep.subr.msk.mxu0 %vm474_vm0, %v6431_v1 }
 0x125   : > { %7658 = vmatmul.mubr.msk.f32.gmra.mrb[2].mxu0 %vm409_vm2, %v9208_v33 }
 0x126   : > { %7660 = vmatprep.mubr.msk.f32.mxu0 %vm409_vm2, %v11784_v24 }
 0x129   : > { %7661 = vmatmul.mubr.msk.f32.gmra.mrb[4].mxu0 %vm409_vm2, %v11785_v20  ;;  %v11793_v20 = vld [vmem:[#allocation15_spill] sm:$0xff] }
 0x12a   : > { %7663 = vmatprep.mubr.msk.f32.mxu0 %vm409_vm2, %v11786_v41  ;;  %v11794_v41 = vld [vmem:[#allocation16_spill] sm:$0xff] }
 0x12d   : > { %7664 = vmatmul.mubr.msk.f32.gmra.mrb[6].mxu0 %vm409_vm2, %v11787_v25  ;;  %v11801_v25 = vld [vmem:[#allocation23_spill] sm:$0xff] }
 0x12e   : > { %7666 = vmatprep.mubr.msk.f32.mxu0 %vm409_vm2, %v11788_v6  ;;  %v11795_v6 = vld [vmem:[#allocation17_spill] sm:$0xff] }
 0x131   : > { %7667 = vmatmul.mubr.msk.f32.gmra.mrb[8].mxu0 %vm409_vm2, %v11789_v10  ;;  %v11796_v10 = vld [vmem:[#allocation18_spill] sm:$0xff] }
 0x132   : > { %7669 = vmatprep.mubr.msk.f32.mxu0 %vm409_vm2, %v11790_v19  ;;  %v11797_v19 = vld [vmem:[#allocation19_spill] sm:$0xff] }
 0x135   : > { %7670 = vmatmul.mubr.msk.f32.gmra.mrb[10].mxu0 %vm409_vm2, %v11791_v51  ;;  %v11798_v51 = vld [vmem:[#allocation20_spill] sm:$0xff] }
 0x136   : > { %7672 = vmatprep.mubr.msk.f32.mxu0 %vm409_vm2, %v11792_v35  ;;  %v11799_v35 = vld [vmem:[#allocation21_spill] sm:$0xff] }
 0x139   : > { %7673 = vmatmul.mubr.msk.f32.gmra.mrb[12].mxu0 %vm409_vm2, %v11793_v20  ;;  %v11800_v20 = vld [vmem:[#allocation22_spill] sm:$0xff] }
 0x13a   : > { %7675 = vmatprep.mubr.msk.f32.mxu0 %vm409_vm2, %v11794_v41  ;;  %v11802_v41 = vld [vmem:[#allocation24_spill] sm:$0xff] }
 0x13d   : > { %7676 = vmatmul.mubr.msk.f32.gmra.mrb[14].mxu0 %vm409_vm2, %v11795_v6 }
 0x13e   : > { %7678 = vmatprep.mubr.msk.f32.mxu0 %vm409_vm2, %v11796_v10  ;;  %v11803_v10 = vld [vmem:[#allocation26_spill] sm:$0xff] }
 0x141   : > { %7679 = vmatmul.mubr.msk.f32.gmra.mrb[16].mxu0 %vm409_vm2, %v11797_v19  ;;  %v11806_v19 = vld [vmem:[#allocation30_spill] sm:$0xff] }
 0x142   : > { %7681 = vmatprep.mubr.msk.f32.mxu0 %vm409_vm2, %v11798_v51  ;;  %v11804_v51 = vld [vmem:[#allocation28_spill] sm:$0xff] }
 0x145   : > { %7682 = vmatmul.mubr.msk.f32.gmra.mrb[18].mxu0 %vm409_vm2, %v11799_v35  ;;  %v1672_v35 = vrot.slane %v9833_v9, 1 }
 0x146   : > { %7684 = vmatprep.mubr.msk.f32.mxu0 %vm409_vm2, %v11800_v20  ;;  %v1671_v20 = vrot.slane %v9826_v8, 1 }
 0x149   : > { %7685 = vmatmul.mubr.msk.f32.gmra.mrb[20].mxu0 %vm409_vm2, %v11801_v25  ;;  %v273_v25 = vld [vmem:[%s9125_s13 + $0x190] sm:$0x3] }
 0x14a   : > { %7687 = vmatprep.mubr.msk.f32.mxu0 %vm409_vm2, %v11802_v41  ;;  %v11805_v41 = vld [vmem:[#allocation29_spill] sm:$0xff] }
 0x14d   : > { %7688 = vmatmul.mubr.msk.f32.gmra.mrb[22].mxu0 %vm409_vm2, %v9428_v37  ;;  %v1674_v37 = vrot.slane %v273_v25, 1 }
 0x14e   : > { %7690 = vmatprep.mubr.msk.f32.mxu0 %vm409_vm2, %v11803_v10  ;;  %v9904_v10 = vsel %vm326_vm1, %v1671_v20, %v1672_v35  ;;  %v6465_v20 = vld [vmem:[%s11591_s1 + $0x1c] sm:$0xf] }
 0x151   : > { %7691 = vmatmul.mubr.msk.f32.gmra.mrb[24].mxu0 %vm409_vm2, %v9450_v21 }
 0x152   : > { %7693 = vmatprep.mubr.msk.f32.mxu0 %vm409_vm2, %v9454_v61  ;;  %v9911_v61 = vsel %vm326_vm1, %v1672_v35, %v1674_v37  ;;  %v11807_v37 = vld [vmem:[#allocation31_spill] sm:$0xff] }
 0x153   : > { %v11811_v35 = vld [vmem:[#allocation35_spill] sm:$0xff] }
 0x155   : > { %7694 = vmatmul.mubr.msk.f32.gmra.mrb[26].mxu0 %vm409_vm2, %v11804_v51 }
 0x156   : > { %7696 = vmatprep.mubr.msk.f32.mxu0 %vm409_vm2, %v11805_v41 }
 0x159   : > { %7697 = vmatmul.mubr.msk.f32.gmra.mrb[28].mxu0 %vm409_vm2, %v11806_v19 }
 0x15a   : > { %7699 = vmatprep.mubr.msk.f32.mxu0 %vm409_vm2, %v9904_v10 }
 0x15d   : > { %7700 = vmatmul.mubr.msk.f32.gmra.mrb[30].mxu0 %vm409_vm2, %v9911_v61 }
 0x15e   : > { %7704 = vmatprep.mubr.msk.f32.mxu0 %vm409_vm2, %v9561_v4  ;;  %v11808_v4 = vld [vmem:[#allocation32_spill] sm:$0xff] }
 0x161   : > { %7705 = vmatmul.mubr.msk.f32.vlgmr.msra.gmra.mrb[0].mxu0 %vm409_vm2, %v9575_v12  ;;  %v11809_v12 = vld [vmem:[#allocation33_spill] sm:$0xff] }
 0x162   : > { %7753 = vmatpush3.msk.msra.mxu0 %vm474_vm0, %v6431_v1  ;;  %7707 = vmatprep.mubr.msk.f32.mxu0 %vm409_vm2, %v9579_v7  ;;  %v11810_v1 = vld [vmem:[#allocation34_spill] sm:$0xff] }
 0x163   : > { %7802 = vmatprep.subr.msk.mxu0 %vm474_vm0, %v6465_v20 }
 0x165   : > { %7708 = vmatmul.mubr.msk.f32.gmra.mrb[2].mxu0 %vm409_vm2, %v9590_v42 }
 0x166   : > { %7710 = vmatprep.mubr.msk.f32.mxu0 %vm409_vm2, %v11807_v37 }
 0x169   : > { %7711 = vmatmul.mubr.msk.f32.gmra.mrb[4].mxu0 %vm409_vm2, %v9603_v3 }
 0x16a   : > { %7713 = vmatprep.mubr.msk.f32.mxu0 %vm409_vm2, %v11808_v4  ;;  %v11812_v4 = vld [vmem:[#allocation36_spill] sm:$0xff] }
 0x16d   : > { %7714 = vmatmul.mubr.msk.f32.gmra.mrb[6].mxu0 %vm409_vm2, %v9616_v57 }
 0x16e   : > { %7716 = vmatprep.mubr.msk.f32.mxu0 %vm409_vm2, %v11809_v12  ;;  %v11813_v12 = vld [vmem:[#allocation37_spill] sm:$0xff] }
 0x171   : > { %7717 = vmatmul.mubr.msk.f32.gmra.mrb[8].mxu0 %vm409_vm2, %v9629_v30 }
 0x172   : > { %7719 = vmatprep.mubr.msk.f32.mxu0 %vm409_vm2, %v11810_v1  ;;  %v11814_v1 = vld [vmem:[#allocation38_spill] sm:$0xff] }
 0x175   : > { %7720 = vmatmul.mubr.msk.f32.gmra.mrb[10].mxu0 %vm409_vm2, %v9642_v38 }
 0x176   : > { %7722 = vmatprep.mubr.msk.f32.mxu0 %vm409_vm2, %v11811_v35  ;;  %v11815_v35 = vld [vmem:[#allocation40_spill] sm:$0xff] }
 0x179   : > { %7723 = vmatmul.mubr.msk.f32.gmra.mrb[12].mxu0 %vm409_vm2, %v9655_v46 }
 0x17a   : > { %7725 = vmatprep.mubr.msk.f32.mxu0 %vm409_vm2, %v11812_v4  ;;  %v11816_v4 = vld [vmem:[#allocation41_spill] sm:$0xff] }
 0x17d   : > { %7726 = vmatmul.mubr.msk.f32.gmra.mrb[14].mxu0 %vm409_vm2, %v9668_v54 }
 0x17e   : > { %7728 = vmatprep.mubr.msk.f32.mxu0 %vm409_vm2, %v11813_v12  ;;  %v11817_v12 = vld [vmem:[#allocation43_spill] sm:$0xff] }
 0x181   : > { %7729 = vmatmul.mubr.msk.f32.gmra.mrb[16].mxu0 %vm409_vm2, %v9681_v62 }
 0x182   : > { %7731 = vmatprep.mubr.msk.f32.mxu0 %vm409_vm2, %v11814_v1 }
 0x185   : > { %7732 = vmatmul.mubr.msk.f32.gmra.mrb[18].mxu0 %vm409_vm2, %v9694_v11  ;;  %v1943_v11 = vrot.slane %v9833_v9, 2 }
 0x186   : > { %7734 = vmatprep.mubr.msk.f32.mxu0 %vm409_vm2, %v11815_v35  ;;  %v1942_v35 = vrot.slane %v9826_v8, 2 }
 0x189   : > { %7735 = vmatmul.mubr.msk.f32.gmra.mrb[20].mxu0 %vm409_vm2, %v9707_v29 }
 0x18a   : > { %7737 = vmatprep.mubr.msk.f32.mxu0 %vm409_vm2, %v11816_v4  ;;  %v9981_v4 = vsel %vm995_vm3, %v1942_v35, %v1943_v11  ;;  %v10292_v35 = vld [vmem:[%s11592_s2] ss:$0 sm:$0xff] }
 0x18d   : > { %7738 = vmatmul.mubr.msk.f32.gmra.mrb[22].mxu0 %vm409_vm2, %v9720_v52  ;;  %v1945_v52 = vrot.slane %v273_v25, 2  ;;  %v6499_v25 = vld [vmem:[%s11591_s1 + $0x20] sm:$0xf] }
 0x18e   : > { %7740 = vmatprep.mubr.msk.f32.mxu0 %vm409_vm2, %v11817_v12 }
 0x191   : > { %7741 = vmatmul.mubr.msk.f32.gmra.mrb[24].mxu0 %vm409_vm2, %v9733_v18 }
 0x192   : > { %7743 = vmatprep.mubr.msk.f32.mxu0 %vm409_vm2, %v9737_v59  ;;  %v9988_v59 = vsel %vm995_vm3, %v1943_v11, %v1945_v52 }
 0x195   : > { %7744 = vmatmul.mubr.msk.f32.gmra.mrb[26].mxu0 %vm409_vm2, %v9746_v17 }
 0x196   : > { %7746 = vmatprep.mubr.msk.f32.mxu0 %vm409_vm2, %v9750_v49 }
 0x199   : > { %7747 = vmatmul.mubr.msk.f32.gmra.mrb[28].mxu0 %vm409_vm2, %v9757_v2 }
 0x19a   : > { %7749 = vmatprep.mubr.msk.f32.mxu0 %vm409_vm2, %v9981_v4 }
 0x19d   : > { %7750 = vmatmul.mubr.msk.f32.gmra.mrb[30].mxu0 %vm409_vm2, %v9988_v59 }
 0x19e   : > { %7754 = vmatprep.mubr.msk.f32.mxu0 %vm409_vm2, %v9151_v13  ;;  %v10056_v13 = vld [vmem:[%s9125_s13 + $0x198] sm:$0xff] }
 0x1a1   : > { %7755 = vmatmul.mubr.msk.f32.vlgmr.msra.gmra.mrb[0].mxu0 %vm409_vm2, %v9154_v14  ;;  %v10063_v14 = vld [vmem:[%s9125_s13 + $0x1a0] sm:$0xff] }
 0x1a2   : > { %7803 = vmatpush3.msk.msra.mxu0 %vm474_vm0, %v6465_v20  ;;  %7757 = vmatprep.mubr.msk.f32.mxu0 %vm409_vm2, %v9169_v22  ;;  %v11818_v22 = vld [vmem:[#allocation7_spill] sm:$0xff]  ;;  %v3279_v20 = vld [vmem:[%s11593_s3 + $0x8] sm:$0xff] }
 0x1a3   : > { %7852 = vmatprep.subr.msk.mxu0 %vm474_vm0, %v6499_v25 }
 0x1a5   : > { %7758 = vmatmul.mubr.msk.f32.gmra.mrb[2].mxu0 %vm409_vm2, %v9172_v23  ;;  %v11819_v23 = vld [vmem:[#allocation8_spill] sm:$0xff] }
 0x1a6   : > { %7760 = vmatprep.mubr.msk.f32.mxu0 %vm409_vm2, %v9198_v31  ;;  %v11820_v31 = vld [vmem:[#allocation9_spill] sm:$0xff] }
 0x1a9   : > { %7761 = vmatmul.mubr.msk.f32.gmra.mrb[4].mxu0 %vm409_vm2, %v9201_v32  ;;  %v11821_v32 = vld [vmem:[#allocation10_spill] sm:$0xff] }
 0x1aa   : > { %7763 = vmatprep.mubr.msk.f32.mxu0 %vm409_vm2, %v9220_v39  ;;  %v11824_v39 = vld [vmem:[#allocation13_spill] sm:$0xff] }
 0x1ad   : > { %7764 = vmatmul.mubr.msk.f32.gmra.mrb[6].mxu0 %vm409_vm2, %v9223_v40  ;;  %v11825_v40 = vld [vmem:[#allocation14_spill] sm:$0xff] }
 0x1ae   : > { %7766 = vmatprep.mubr.msk.f32.mxu0 %vm409_vm2, %v9242_v47  ;;  %v11827_v47 = vld [vmem:[#allocation16_spill] sm:$0xff] }
 0x1b1   : > { %7767 = vmatmul.mubr.msk.f32.gmra.mrb[8].mxu0 %vm409_vm2, %v9245_v48  ;;  %v11828_v48 = vld [vmem:[#allocation18_spill] sm:$0xff] }
 0x1b2   : > { %7769 = vmatprep.mubr.msk.f32.mxu0 %vm409_vm2, %v9264_v55  ;;  %v11829_v55 = vld [vmem:[#allocation19_spill] sm:$0xff] }
 0x1b5   : > { %7770 = vmatmul.mubr.msk.f32.gmra.mrb[10].mxu0 %vm409_vm2, %v9267_v56  ;;  %v11830_v56 = vld [vmem:[#allocation20_spill] sm:$0xff] }
 0x1b6   : > { %7772 = vmatprep.mubr.msk.f32.mxu0 %vm409_vm2, %v9286_v63  ;;  %v11831_v63 = vld [vmem:[#allocation21_spill] sm:$0xff] }
 0x1b9   : > { %7773 = vmatmul.mubr.msk.f32.gmra.mrb[12].mxu0 %vm409_vm2, %v9289_v0  ;;  %v11832_v0 = vld [vmem:[#allocation22_spill] sm:$0xff] }
 0x1ba   : > { %7775 = vmatprep.mubr.msk.f32.mxu0 %vm409_vm2, %v9308_v15  ;;  %v11833_v15 = vld [vmem:[#allocation23_spill] sm:$0xff] }
 0x1bd   : > { %7776 = vmatmul.mubr.msk.f32.gmra.mrb[14].mxu0 %vm409_vm2, %v9311_v16  ;;  %v11834_v16 = vld [vmem:[#allocation24_spill] sm:$0xff] }
 0x1be   : > { %7778 = vmatprep.mubr.msk.f32.mxu0 %vm409_vm2, %v9330_v34  ;;  %v11835_v34 = vld [vmem:[#allocation25_spill] sm:$0xff] }
 0x1c1   : > { %7779 = vmatmul.mubr.msk.f32.gmra.mrb[16].mxu0 %vm409_vm2, %v9333_v36  ;;  %v11836_v36 = vld [vmem:[#allocation26_spill] sm:$0xff] }
 0x1c2   : > { %7781 = vmatprep.mubr.msk.f32.mxu0 %vm409_vm2, %v9352_v53  ;;  %v2482_v53 = vrot.slane %v10056_v13, 1 }
 0x1c5   : > { %7782 = vmatmul.mubr.msk.f32.gmra.mrb[18].mxu0 %vm409_vm2, %v9355_v58  ;;  %v2483_v58 = vrot.slane %v10063_v14, 1 }
 0x1c6   : > { %7784 = vmatprep.mubr.msk.f32.mxu0 %vm409_vm2, %v9374_v26 }
 0x1c7   : > { %v2484_v26 = vsel %vm326_vm1, %v2482_v53, %v2483_v58 }
 0x1c9   : > { %7785 = vmatmul.mubr.msk.f32.gmra.mrb[20].mxu0 %vm409_vm2, %v9377_v44  ;;  %v11837_v44 = vld [vmem:[#allocation27_spill] sm:$0xff] }
 0x1ca   : > { %7787 = vmatprep.mubr.msk.f32.mxu0 %vm409_vm2, %v9396_v60  ;;  %v276_v60 = vld [vmem:[%s9125_s13 + $0x1a8] sm:$0x3] }
 0x1cb   : > { %v2756_v11 = vrot.slane %v276_v60, 2 }
 0x1cd   : > { %7788 = vmatmul.mubr.msk.f32.gmra.mrb[22].mxu0 %vm409_vm2, %v9399_v5  ;;  %v2485_v5 = vrot.slane %v276_v60, 1 }
 0x1ce   : > { %7790 = vmatprep.mubr.msk.f32.mxu0 %vm409_vm2, %v9418_v28 }
 0x1cf   : > { %v2486_v28 = vsel %vm326_vm1, %v2483_v58, %v2485_v5 }
 0x1d1   : > { %7791 = vmatmul.mubr.msk.f32.gmra.mrb[24].mxu0 %vm409_vm2, %v9421_v45  ;;  %v11838_v45 = vld [vmem:[#allocation32_spill] sm:$0xff] }
 0x1d2   : > { %7793 = vmatprep.mubr.msk.f32.mxu0 %vm409_vm2, %v9440_v43  ;;  %v11826_v43 = vld [vmem:[#allocation15_spill] sm:$0xff] }
 0x1d5   : > { %7794 = vmatmul.mubr.msk.f32.gmra.mrb[26].mxu0 %vm409_vm2, %v9443_v50  ;;  %v11839_v50 = vld [vmem:[#allocation33_spill] sm:$0xff] }
 0x1d6   : > { %7796 = vmatprep.mubr.msk.f32.mxu0 %vm409_vm2, %v9826_v8 }
 0x1d9   : > { %7797 = vmatmul.mubr.msk.f32.gmra.mrb[28].mxu0 %vm409_vm2, %v9833_v9 }
 0x1da   : > { %7799 = vmatprep.mubr.msk.f32.mxu0 %vm409_vm2, %v10056_v13 }
 0x1dd   : > { %7800 = vmatmul.mubr.msk.f32.gmra.mrb[30].mxu0 %vm409_vm2, %v10063_v14 }
 0x1de   : > { %7804 = vmatprep.mubr.msk.f32.mxu0 %vm409_vm2, %v9188_v27  ;;  %v11822_v27 = vld [vmem:[#allocation11_spill] sm:$0xff] }
 0x1e1   : > { %7805 = vmatmul.mubr.msk.f32.vlgmr.msra.gmra.mrb[0].mxu0 %vm409_vm2, %v9208_v33  ;;  %v11823_v33 = vld [vmem:[#allocation12_spill] sm:$0xff] }
 0x1e2   : > { %7853 = vmatpush3.msk.msra.mxu0 %vm474_vm0, %v6499_v25  ;;  %7807 = vmatprep.mubr.msk.f32.mxu0 %vm409_vm2, %v11784_v24 }
 0x1e5   : > { %7808 = vmatmul.mubr.msk.f32.gmra.mrb[2].mxu0 %vm409_vm2, %v11818_v22 }
 0x1e6   : > { %7810 = vmatprep.mubr.msk.f32.mxu0 %vm409_vm2, %v11819_v23 }
 0x1e9   : > { %7811 = vmatmul.mubr.msk.f32.gmra.mrb[4].mxu0 %vm409_vm2, %v11820_v31 }
 0x1ea   : > { %7813 = vmatprep.mubr.msk.f32.mxu0 %vm409_vm2, %v11821_v32 }
 0x1ed   : > { %7814 = vmatmul.mubr.msk.f32.gmra.mrb[6].mxu0 %vm409_vm2, %v11822_v27 }
 0x1ee   : > { %7816 = vmatprep.mubr.msk.f32.mxu0 %vm409_vm2, %v11823_v33 }
 0x1f1   : > { %7817 = vmatmul.mubr.msk.f32.gmra.mrb[8].mxu0 %vm409_vm2, %v11824_v39 }
 0x1f2   : > { %7819 = vmatprep.mubr.msk.f32.mxu0 %vm409_vm2, %v11825_v40 }
 0x1f5   : > { %7820 = vmatmul.mubr.msk.f32.gmra.mrb[10].mxu0 %vm409_vm2, %v11826_v43 }
 0x1f6   : > { %7822 = vmatprep.mubr.msk.f32.mxu0 %vm409_vm2, %v11827_v47 }
 0x1f9   : > { %7823 = vmatmul.mubr.msk.f32.gmra.mrb[12].mxu0 %vm409_vm2, %v11795_v6 }
 0x1fa   : > { %7825 = vmatprep.mubr.msk.f32.mxu0 %vm409_vm2, %v11828_v48 }
 0x1fd   : > { %7826 = vmatmul.mubr.msk.f32.gmra.mrb[14].mxu0 %vm409_vm2, %v11829_v55 }
 0x1fe   : > { %7828 = vmatprep.mubr.msk.f32.mxu0 %vm409_vm2, %v11830_v56 }
 0x201   : > { %7829 = vmatmul.mubr.msk.f32.gmra.mrb[16].mxu0 %vm409_vm2, %v11831_v63 }
 0x202   : > { %7831 = vmatprep.mubr.msk.f32.mxu0 %vm409_vm2, %v11832_v0 }
 0x205   : > { %7832 = vmatmul.mubr.msk.f32.gmra.mrb[18].mxu0 %vm409_vm2, %v11833_v15 }
 0x206   : > { %7834 = vmatprep.mubr.msk.f32.mxu0 %vm409_vm2, %v11834_v16 }
 0x209   : > { %7835 = vmatmul.mubr.msk.f32.gmra.mrb[20].mxu0 %vm409_vm2, %v11835_v34 }
 0x20a   : > { %7837 = vmatprep.mubr.msk.f32.mxu0 %vm409_vm2, %v11836_v36 }
 0x20d   : > { %7838 = vmatmul.mubr.msk.f32.gmra.mrb[22].mxu0 %vm409_vm2, %v9450_v21  ;;  %v11840_v21 = vld [vmem:[#allocation34_spill] sm:$0xff] }
 0x20e   : > { %7840 = vmatprep.mubr.msk.f32.mxu0 %vm409_vm2, %v11837_v44 }
 0x211   : > { %7841 = vmatmul.mubr.msk.f32.gmra.mrb[24].mxu0 %vm409_vm2, %v11804_v51  ;;  %v3278_v51 = vld [vmem:[%s11593_s3] sm:$0xff] }
 0x212   : > { %7843 = vmatprep.mubr.msk.f32.mxu0 %vm409_vm2, %v11805_v41 }
 0x215   : > { %7844 = vmatmul.mubr.msk.f32.gmra.mrb[26].mxu0 %vm409_vm2, %v11806_v19 }
 0x216   : > { %7846 = vmatprep.mubr.msk.f32.mxu0 %vm409_vm2, %v9904_v10 }
 0x219   : > { %7847 = vmatmul.mubr.msk.f32.gmra.mrb[28].mxu0 %vm409_vm2, %v9911_v61  ;;  %v11841_v61 = vld [vmem:[#allocation35_spill] sm:$0xff] }
 0x21a   : > { %7849 = vmatprep.mubr.msk.f32.mxu0 %vm409_vm2, %v2484_v26 }
 0x21d   : > { %7850 = vmatmul.mubr.msk.f32.gmra.mrb[30].mxu0 %vm409_vm2, %v2486_v28 }
 0x21e   : > { %7854 = vmatprep.mubr.msk.f32.mxu0 %vm409_vm2, %v9579_v7  ;;  %v11842_v7 = vld [vmem:[#allocation36_spill] sm:$0xff] }
 0x221   : > { %7855 = vmatmul.mubr.msk.f32.vlgmr.msra.gmra.mrb[0].mxu0 %vm409_vm2, %v9590_v42  ;;  %v11843_v42 = vld [vmem:[#allocation37_spill] sm:$0xff] }
 0x222   : > { %7857 = vmatprep.mubr.msk.f32.mxu0 %vm409_vm2, %v11807_v37  ;;  %v8374_v37 = vpack.c.bf16 %v3279_v20, %v3278_v51 }
 0x225   : > { %7858 = vmatmul.mubr.msk.f32.gmra.mrb[2].mxu0 %vm409_vm2, %v9603_v3  ;;  %v11845_v3 = vld [vmem:[#allocation40_spill] sm:$0xff] }
 0x226   : > { %7860 = vmatprep.mubr.msk.f32.mxu0 %vm409_vm2, %v11838_v45 }
 0x229   : > { %7861 = vmatmul.mubr.msk.f32.gmra.mrb[4].mxu0 %vm409_vm2, %v9616_v57  ;;  %v11844_v57 = vld [vmem:[#allocation39_spill] sm:$0xff] }
 0x22a   : > { %7863 = vmatprep.mubr.msk.f32.mxu0 %vm409_vm2, %v11839_v50 }
 0x22d   : > { %7864 = vmatmul.mubr.msk.f32.gmra.mrb[6].mxu0 %vm409_vm2, %v9629_v30  ;;  %v11846_v30 = vld [vmem:[#allocation41_spill] sm:$0xff] }
 0x22e   : > { %7866 = vmatprep.mubr.msk.f32.mxu0 %vm409_vm2, %v11840_v21 }
 0x231   : > { %7867 = vmatmul.mubr.msk.f32.gmra.mrb[8].mxu0 %vm409_vm2, %v9642_v38  ;;  %v11847_v38 = vld [vmem:[#allocation42_spill] sm:$0xff] }
 0x232   : > { %7869 = vmatprep.mubr.msk.f32.mxu0 %vm409_vm2, %v11841_v61 }
 0x235   : > { %7870 = vmatmul.mubr.msk.f32.gmra.mrb[10].mxu0 %vm409_vm2, %v9655_v46  ;;  %v11848_v46 = vld [vmem:[#allocation44_spill] sm:$0xff] }
 0x236   : > { %7872 = vmatprep.mubr.msk.f32.mxu0 %vm409_vm2, %v11842_v7 }
 0x239   : > { %7873 = vmatmul.mubr.msk.f32.gmra.mrb[12].mxu0 %vm409_vm2, %v9668_v54  ;;  %v2753_v54 = vrot.slane %v10056_v13, 2  ;;  %v10297_v13 = vld [vmem:[%s11592_s2 + $0x1] ss:$0 sm:$0xff] }
 0x23a   : > { %7875 = vmatprep.mubr.msk.f32.mxu0 %vm409_vm2, %v11843_v42 }
 0x23d   : > { %7876 = vmatmul.mubr.msk.f32.gmra.mrb[14].mxu0 %vm409_vm2, %v9681_v62  ;;  %v2754_v62 = vrot.slane %v10063_v14, 2 }
 0x23e   : > { %7878 = vmatprep.mubr.msk.f32.mxu0 %vm409_vm2, %v11814_v1 }
 0x23f   : > { %v2757_v52 = vsel %vm995_vm3, %v2754_v62, %v2756_v11 }
 0x241   : > { %7879 = vmatmul.mubr.msk.f32.gmra.mrb[16].mxu0 %vm409_vm2, %v11844_v57 }
 0x242   : > { %7881 = vmatprep.mubr.msk.f32.mxu0 %vm409_vm2, %v11845_v3 }
 0x245   : > { %7882 = vmatmul.mubr.msk.f32.gmra.mrb[18].mxu0 %vm409_vm2, %v9707_v29  ;;  %v2755_v29 = vsel %vm995_vm3, %v2753_v54, %v2754_v62 }
 0x246   : > { %7884 = vmatprep.mubr.msk.f32.mxu0 %vm409_vm2, %v11846_v30 }
 0x249   : > { %7885 = vmatmul.mubr.msk.f32.gmra.mrb[20].mxu0 %vm409_vm2, %v11847_v38 }
 0x24a   : > { %7887 = vmatprep.mubr.msk.f32.mxu0 %vm409_vm2, %v11817_v12  ;;  %v6603_v12 = vld [vmem:[%s11593_s3 + $0x28] sm:$0xff] }
 0x24d   : > { %7888 = vmatmul.mubr.msk.f32.gmra.mrb[22].mxu0 %vm409_vm2, %v9733_v18  ;;  %v9029_v18 = vmov 0.0  }
 0x24e   : > { %7890 = vmatprep.mubr.msk.f32.mxu0 %vm409_vm2, %v11848_v46  ;;  %3141 = vst.msk [vmem:[#allocation2 + $0x20] sm:$0xff] %vm3135_vm4, %v9029_v18  ;;  %3136 = vst.msk [vmem:[#allocation2] sm:$0xff] %vm3135_vm4, %v9029_v18 }
 0x24f   : > { %3137 = vst.msk [vmem:[#allocation2 + $0x8] sm:$0xff] %vm3135_vm4, %v9029_v18  ;;  %3140 = vst.msk [vmem:[#allocation2 + $0x18] sm:$0xff] %vm3135_vm4, %v9029_v18 }
 0x250   : > { %3143 = vst.msk [vmem:[#allocation2 + $0x30] sm:$0xff] %vm3135_vm4, %v9029_v18  ;;  %3144 = vst.msk [vmem:[#allocation2 + $0x38] sm:$0xff] %vm3135_vm4, %v9029_v18 }
 0x251   : > { %7891 = vmatmul.mubr.msk.f32.gmra.mrb[24].mxu0 %vm409_vm2, %v9746_v17  ;;  %3146 = vst.msk [vmem:[#allocation2 + $0x48] sm:$0xff] %vm3135_vm4, %v9029_v18  ;;  %3147 = vst.msk [vmem:[#allocation2 + $0x50] sm:$0xff] %vm3135_vm4, %v9029_v18  ;;  %v6536_v17 = vld [vmem:[%s11593_s3 + $0x10] sm:$0xff] }
 0x252   : > { %7893 = vmatprep.mubr.msk.f32.mxu0 %vm409_vm2, %v9750_v49  ;;  %3149 = vst.msk [vmem:[#allocation2 + $0x60] sm:$0xff] %vm3135_vm4, %v9029_v18  ;;  %3150 = vst.msk [vmem:[#allocation2 + $0x68] sm:$0xff] %vm3135_vm4, %v9029_v18 }
 0x253   : > { %3152 = vst.msk [vmem:[#allocation2 + $0x78] sm:$0xff] %vm3135_vm4, %v9029_v18  ;;  %3153 = vst.msk [vmem:[#allocation2 + $0x80] sm:$0xff] %vm3135_vm4, %v9029_v18 }
 0x254   : > { %3155 = vst.msk [vmem:[#allocation2 + $0x90] sm:$0xff] %vm3135_vm4, %v9029_v18  ;;  %3156 = vst.msk [vmem:[#allocation2 + $0x98] sm:$0xff] %vm3135_vm4, %v9029_v18 }
 0x255   : > { %7894 = vmatmul.mubr.msk.f32.gmra.mrb[26].mxu0 %vm409_vm2, %v9757_v2  ;;  %3158 = vst.msk [vmem:[#allocation2 + $0xa8] sm:$0xff] %vm3135_vm4, %v9029_v18  ;;  %3159 = vst.msk [vmem:[#allocation2 + $0xb0] sm:$0xff] %vm3135_vm4, %v9029_v18  ;;  %v10261_v2 = vld [vmem:[#allocation2] sm:$0xff] }
 0x256   : > { %7896 = vmatprep.mubr.msk.f32.mxu0 %vm409_vm2, %v9981_v4  ;;  %3161 = vst.msk [vmem:[#allocation2 + $0xc0] sm:$0xff] %vm3135_vm4, %v9029_v18  ;;  %3162 = vst.msk [vmem:[#allocation2 + $0xc8] sm:$0xff] %vm3135_vm4, %v9029_v18  ;;  %v10263_v8 = vld [vmem:[#allocation2 + $0x8] sm:$0xff]  ;;  %v3328_v9 = vrot.slane %v10261_v2, 1  ;;  %v6602_v4 = vld [vmem:[%s11593_s3 + $0x20] sm:$0xff] }
 0x257   : > { %3164 = vst.msk [vmem:[#allocation2 + $0xd8] sm:$0xff] %vm3135_vm4, %v9029_v18  ;;  %3165 = vst.msk [vmem:[#allocation2 + $0xe0] sm:$0xff] %vm3135_vm4, %v9029_v18  ;;  %v3329_v24 = vrot.slane %v10263_v8, 1  ;;  %v10286_v1 = vpack.c.bf16 %v6603_v12, %v6602_v4 }
 0x258   : > { %3167 = vst.msk [vmem:[#allocation2 + $0xf0] sm:$0xff] %vm3135_vm4, %v9029_v18  ;;  %3168 = vst.msk [vmem:[#allocation2 + $0xf8] sm:$0xff] %vm3135_vm4, %v9029_v18 }
 0x259   : > { %7897 = vmatmul.mubr.msk.f32.gmra.mrb[28].mxu0 %vm409_vm2, %v9988_v59  ;;  %3170 = vst.msk [vmem:[#allocation2 + $0x108] sm:$0xff] %vm3135_vm4, %v9029_v18  ;;  %3171 = vst.msk [vmem:[#allocation2 + $0x110] sm:$0xff] %vm3135_vm4, %v9029_v18  ;;  %v6537_v59 = vld [vmem:[%s11593_s3 + $0x18] sm:$0xff]  ;;  %v3330_v10 = vsel %vm326_vm1, %v3328_v9, %v3329_v24 }
 0x25a   : > { %7899 = vmatprep.mubr.msk.f32.mxu0 %vm409_vm2, %v2755_v29  ;;  %3173 = vst.msk [vmem:[#allocation2 + $0x120] sm:$0xff] %vm3135_vm4, %v9029_v18  ;;  %3174 = vst.msk [vmem:[#allocation2 + $0x128] sm:$0xff] %vm3135_vm4, %v9029_v18  ;;  %v8370_v49 = vpack.c.bf16 %v6537_v59, %v6536_v17  ;;  %7906 = vmatprep.mubr.msk.f32.mxu1 %vm3135_vm4, %v3330_v10 }
 0x25b   : > { %3176 = vst.msk [vmem:[#allocation2 + $0x138] sm:$0xff] %vm3135_vm4, %v9029_v18  ;;  %3177 = vst.msk [vmem:[#allocation2 + $0x140] sm:$0xff] %vm3135_vm4, %v9029_v18 }
 0x25c   : > { %3179 = vst.msk [vmem:[#allocation2 + $0x150] sm:$0xff] %vm3135_vm4, %v9029_v18  ;;  %3180 = vst.msk [vmem:[#allocation2 + $0x158] sm:$0xff] %vm3135_vm4, %v9029_v18  ;;  %8371 = vmatprep.subr.bf16.mxu1 %v8370_v49 }
 0x25d   : > { %7900 = vmatmul.mubr.msk.f32.gmra.mrb[30].mxu0 %vm409_vm2, %v2757_v52  ;;  %3182 = vst.msk [vmem:[#allocation2 + $0x168] sm:$0xff] %vm3135_vm4, %v9029_v18  ;;  %3183 = vst.msk [vmem:[#allocation2 + $0x170] sm:$0xff] %vm3135_vm4, %v9029_v18  ;;  %8373 = vmatpush3.bf16.msra.mxu1 %v8370_v49 }
 0x25e   : > { %3185 = vst.msk [vmem:[#allocation2 + $0x180] sm:$0xff] %vm3135_vm4, %v9029_v18  ;;  %3186 = vst.msk [vmem:[#allocation2 + $0x188] sm:$0xff] %vm3135_vm4, %v9029_v18  ;;  %8375 = vmatprep.subr.bf16.mxu1 %v8374_v37 }
 0x25f   : > { %3188 = vst.msk [vmem:[#allocation2 + $0x198] sm:$0xff] %vm3135_vm4, %v9029_v18  ;;  %3189 = vst.msk [vmem:[#allocation2 + $0x1a0] sm:$0xff] %vm3135_vm4, %v9029_v18 }
 0x260   : > { %3142 = vst.msk [vmem:[#allocation2 + $0x28] sm:$0x3] %vm3138_vm5, %v9029_v18  ;;  %3139 = vst.msk [vmem:[#allocation2 + $0x10] sm:$0x3] %vm3138_vm5, %v9029_v18 }
 0x261   : > { %3145 = vst.msk [vmem:[#allocation2 + $0x40] sm:$0x3] %vm3138_vm5, %v9029_v18  ;;  %3148 = vst.msk [vmem:[#allocation2 + $0x58] sm:$0x3] %vm3138_vm5, %v9029_v18 }
 0x262   : > { %3151 = vst.msk [vmem:[#allocation2 + $0x70] sm:$0x3] %vm3138_vm5, %v9029_v18  ;;  %3154 = vst.msk [vmem:[#allocation2 + $0x88] sm:$0x3] %vm3138_vm5, %v9029_v18 }
 0x263   : > { %3157 = vst.msk [vmem:[#allocation2 + $0xa0] sm:$0x3] %vm3138_vm5, %v9029_v18  ;;  %3160 = vst.msk [vmem:[#allocation2 + $0xb8] sm:$0x3] %vm3138_vm5, %v9029_v18 }
 0x264   : > { %3163 = vst.msk [vmem:[#allocation2 + $0xd0] sm:$0x3] %vm3138_vm5, %v9029_v18  ;;  %3166 = vst.msk [vmem:[#allocation2 + $0xe8] sm:$0x3] %vm3138_vm5, %v9029_v18 }
 0x265   : > { %3169 = vst.msk [vmem:[#allocation2 + $0x100] sm:$0x3] %vm3138_vm5, %v9029_v18  ;;  %3172 = vst.msk [vmem:[#allocation2 + $0x118] sm:$0x3] %vm3138_vm5, %v9029_v18 }
 0x266   : > { %3175 = vst.msk [vmem:[#allocation2 + $0x130] sm:$0x3] %vm3138_vm5, %v9029_v18  ;;  %3178 = vst.msk [vmem:[#allocation2 + $0x148] sm:$0x3] %vm3138_vm5, %v9029_v18 }
 0x267   : > { %3181 = vst.msk [vmem:[#allocation2 + $0x160] sm:$0x3] %vm3138_vm5, %v9029_v18  ;;  %3184 = vst.msk [vmem:[#allocation2 + $0x178] sm:$0x3] %vm3138_vm5, %v9029_v18  ;;  %v10267_v41 = vld [vmem:[#allocation2 + $0x10] sm:$0x3] }
 0x268   : > { %3187 = vst.msk [vmem:[#allocation2 + $0x190] sm:$0x3] %vm3138_vm5, %v9029_v18  ;;  %3190 = vst.msk [vmem:[#allocation2 + $0x1a8] sm:$0x3] %vm3138_vm5, %v9029_v18  ;;  %v3331_v6 = vrot.slane %v10267_v41, 1 }
 0x26a   : > { %v3332_v19 = vsel %vm326_vm1, %v3329_v24, %v3331_v6 }
 0x26b   : > { %7907 = vmatmul.mubr.msk.f32.vlgmr.msra.gmra.mrb[0].mxu1 %vm3135_vm4, %v3332_v19 }
 0x26c   : > { %8377 = vmatpush3.bf16.msra.mxu1 %v8374_v37 }
 0x26d   : > { %8379 = vmatprep.subr.bf16.mxu1 %v10286_v1 }
 0x2f4   : > { %v7856_v25 = vpop.f32.mrb[0].mxu0 }
 0x2f5   : > { %v3032_v14 = vmul.f32 %v7856_v25, %v10292_v35  ;;  %v2833_v22 = vpop.f32.mrb[1].mxu0 }
 0x2f6   : > { %v3031_v23 = vmul.f32 %v10292_v35, %v2833_v22 }
 0x2f7   : > { %v3072_v31 = vadd.f32 %v10297_v13, %v3032_v14 }
 0x2f8   : > { %v3071_v32 = vadd.f32 %v10297_v13, %v3031_v23  ;;  %v7859_v27 = vpop.f32.mrb[2].mxu0 }
 0x2f9   : > { %v3104_v33 = vmax.f32 %v3072_v31, 0.0  ;;  %v3034_v39 = vmul.f32 %v7859_v27, %v10292_v35  ;;  %v2843_v40 = vpop.f32.mrb[3].mxu0 }
 0x2fa   : > { %v3103_v43 = vmax.f32 %v3071_v32, 0.0  ;;  %v3033_v47 = vmul.f32 %v10292_v35, %v2843_v40 }
 0x2fb   : > { %3193 = vst.msk [vmem:[#allocation2 + $0x21] sm:$0xff] %vm3135_vm4, %v3104_v33  ;;  %v3074_v48 = vadd.f32 %v10297_v13, %v3034_v39 }
 0x2fc   : > { %3192 = vst.msk [vmem:[#allocation2 + $0x19] sm:$0xff] %vm3135_vm4, %v3103_v43  ;;  %v3073_v55 = vadd.f32 %v10297_v13, %v3033_v47  ;;  %v7862_v56 = vpop.f32.mrb[4].mxu0 }
 0x2fd   : > { %v3106_v63 = vmax.f32 %v3074_v48, 0.0  ;;  %v3036_v0 = vmul.f32 %v7862_v56, %v10292_v35  ;;  %v2853_v15 = vpop.f32.mrb[5].mxu0 }
 0x2fe   : > { %v3105_v16 = vmax.f32 %v3073_v55, 0.0  ;;  %v3035_v34 = vmul.f32 %v10292_v35, %v2853_v15 }
 0x2ff   : > { %3195 = vst.msk [vmem:[#allocation2 + $0x39] sm:$0xff] %vm3135_vm4, %v3106_v63  ;;  %v3076_v36 = vadd.f32 %v10297_v13, %v3036_v0 }
 0x300   : > { %3194 = vst.msk [vmem:[#allocation2 + $0x31] sm:$0xff] %vm3135_vm4, %v3105_v16  ;;  %v3075_v44 = vadd.f32 %v10297_v13, %v3035_v34  ;;  %v7865_v53 = vpop.f32.mrb[6].mxu0 }
 0x301   : > { %v3108_v58 = vmax.f32 %v3076_v36, 0.0  ;;  %v3038_v60 = vmul.f32 %v7865_v53, %v10292_v35  ;;  %v2863_v5 = vpop.f32.mrb[7].mxu0 }
 0x302   : > { %v3107_v26 = vmax.f32 %v3075_v44, 0.0  ;;  %v3037_v28 = vmul.f32 %v10292_v35, %v2863_v5  ;;  %v10317_v45 = vld [vmem:[#allocation2 + $0x28] sm:$0x3] }
 0x303   : > { %3197 = vst.msk [vmem:[#allocation2 + $0x51] sm:$0xff] %vm3135_vm4, %v3108_v58  ;;  %v3078_v50 = vadd.f32 %v10297_v13, %v3038_v60  ;;  %v10321_v21 = vld [vmem:[#allocation2 + $0x18] sm:$0xff]  ;;  %v10323_v61 = vld [vmem:[#allocation2 + $0x20] sm:$0xff]  ;;  %v3336_v7 = vrot.slane %v10317_v45, 1 }
 0x304   : > { %3196 = vst.msk [vmem:[#allocation2 + $0x49] sm:$0xff] %vm3135_vm4, %v3107_v26  ;;  %v3077_v42 = vadd.f32 %v10297_v13, %v3037_v28  ;;  %v7868_v57 = vpop.f32.mrb[8].mxu0  ;;  %v3333_v3 = vrot.slane %v10321_v21, 1  ;;  %v3334_v30 = vrot.slane %v10323_v61, 1 }
 0x305   : > { %v3110_v38 = vmax.f32 %v3078_v50, 0.0  ;;  %v3040_v46 = vmul.f32 %v7868_v57, %v10292_v35  ;;  %v2873_v54 = vpop.f32.mrb[9].mxu0 }
 0x306   : > { %v3109_v62 = vmax.f32 %v3077_v42, 0.0  ;;  %v3039_v11 = vmul.f32 %v10292_v35, %v2873_v54  ;;  %v10333_v29 = vsel %vm326_vm1, %v3333_v3, %v3334_v30  ;;  %v10336_v52 = vsel %vm326_vm1, %v3334_v30, %v3336_v7  ;;  %v10338_v18 = vld [vmem:[#allocation2 + $0x40] sm:$0x3] }
 0x307   : > { %3199 = vst.msk [vmem:[#allocation2 + $0x69] sm:$0xff] %vm3135_vm4, %v3110_v38  ;;  %v3080_v17 = vadd.f32 %v10297_v13, %v3040_v46  ;;  %7909 = vmatprep.mubr.msk.f32.mxu1 %vm3135_vm4, %v10333_v29  ;;  %v10344_v59 = vld [vmem:[#allocation2 + $0x30] sm:$0xff]  ;;  %v10346_v49 = vld [vmem:[#allocation2 + $0x38] sm:$0xff]  ;;  %v3341_v9 = vrot.slane %v10338_v18, 1 }
 0x308   : > { %3198 = vst.msk [vmem:[#allocation2 + $0x61] sm:$0xff] %vm3135_vm4, %v3109_v62  ;;  %v3079_v24 = vadd.f32 %v10297_v13, %v3039_v11  ;;  %v7871_v6 = vpop.f32.mrb[10].mxu0  ;;  %7910 = vmatmul.mubr.msk.f32.gmra.mrb[2].mxu1 %vm3135_vm4, %v10336_v52  ;;  %v3338_v10 = vrot.slane %v10344_v59, 1  ;;  %v3339_v19 = vrot.slane %v10346_v49, 1 }
 0x309   : > { %v3112_v51 = vmax.f32 %v3080_v17, 0.0  ;;  %v3042_v20 = vmul.f32 %v7871_v6, %v10292_v35  ;;  %v2883_v37 = vpop.f32.mrb[11].mxu0 }
 0x30a   : > { %v3111_v4 = vmax.f32 %v3079_v24, 0.0  ;;  %v3041_v12 = vmul.f32 %v10292_v35, %v2883_v37  ;;  %v10358_v25 = vsel %vm326_vm1, %v3338_v10, %v3339_v19  ;;  %v10361_v14 = vsel %vm326_vm1, %v3339_v19, %v3341_v9  ;;  %v10363_v22 = vld [vmem:[#allocation2 + $0x58] sm:$0x3] }
 0x30b   : > { %3201 = vst.msk [vmem:[#allocation2 + $0x81] sm:$0xff] %vm3135_vm4, %v3112_v51  ;;  %v3082_v23 = vadd.f32 %v10297_v13, %v3042_v20  ;;  %7912 = vmatprep.mubr.msk.f32.mxu1 %vm3135_vm4, %v10358_v25  ;;  %v10369_v31 = vld [vmem:[#allocation2 + $0x48] sm:$0xff]  ;;  %v10371_v32 = vld [vmem:[#allocation2 + $0x50] sm:$0xff]  ;;  %v3346_v27 = vrot.slane %v10363_v22, 1 }
 0x30c   : > { %3200 = vst.msk [vmem:[#allocation2 + $0x79] sm:$0xff] %vm3135_vm4, %v3111_v4  ;;  %v3081_v33 = vadd.f32 %v10297_v13, %v3041_v12  ;;  %v7874_v39 = vpop.f32.mrb[12].mxu0  ;;  %7913 = vmatmul.mubr.msk.f32.gmra.mrb[4].mxu1 %vm3135_vm4, %v10361_v14  ;;  %v3343_v40 = vrot.slane %v10369_v31, 1  ;;  %v3344_v43 = vrot.slane %v10371_v32, 1 }
 0x30d   : > { %v3114_v47 = vmax.f32 %v3082_v23, 0.0  ;;  %v3044_v48 = vmul.f32 %v7874_v39, %v10292_v35  ;;  %v2893_v55 = vpop.f32.mrb[13].mxu0 }
 0x30e   : > { %v3113_v56 = vmax.f32 %v3081_v33, 0.0  ;;  %v3043_v63 = vmul.f32 %v10292_v35, %v2893_v55  ;;  %v10383_v0 = vsel %vm326_vm1, %v3343_v40, %v3344_v43  ;;  %v10386_v15 = vsel %vm326_vm1, %v3344_v43, %v3346_v27  ;;  %v10388_v16 = vld [vmem:[#allocation2 + $0x70] sm:$0x3] }
 0x30f   : > { %11849 = vst [vmem:[#allocation6_spill] sm:$0xff] %v10386_v15  ;;  %3203 = vst.msk [vmem:[#allocation2 + $0x99] sm:$0xff] %vm3135_vm4, %v3114_v47  ;;  %v3084_v34 = vadd.f32 %v10297_v13, %v3044_v48  ;;  %7915 = vmatprep.mubr.msk.f32.mxu1 %vm3135_vm4, %v10383_v0  ;;  %v10394_v36 = vld [vmem:[#allocation2 + $0x60] sm:$0xff]  ;;  %v10396_v44 = vld [vmem:[#allocation2 + $0x68] sm:$0xff]  ;;  %v3351_v53 = vrot.slane %v10388_v16, 1 }
 0x310   : > { %3202 = vst.msk [vmem:[#allocation2 + $0x91] sm:$0xff] %vm3135_vm4, %v3113_v56  ;;  %v3083_v58 = vadd.f32 %v10297_v13, %v3043_v63  ;;  %v7877_v60 = vpop.f32.mrb[14].mxu0  ;;  %7916 = vmatmul.mubr.msk.f32.gmra.mrb[6].mxu1 %vm3135_vm4, %v10386_v15  ;;  %v3348_v5 = vrot.slane %v10394_v36, 1  ;;  %v3349_v26 = vrot.slane %v10396_v44, 1  ;;  %v4000_v15 = vrot.slane %v10346_v49, 2 }
 0x311   : > { %v3116_v28 = vmax.f32 %v3084_v34, 0.0  ;;  %v3046_v50 = vmul.f32 %v7877_v60, %v10292_v35  ;;  %v2903_v7 = vpop.f32.mrb[15].mxu0 }
 0x312   : > { %v3115_v42 = vmax.f32 %v3083_v58, 0.0  ;;  %v3045_v57 = vmul.f32 %v10292_v35, %v2903_v7  ;;  %v10408_v3 = vsel %vm326_vm1, %v3348_v5, %v3349_v26  ;;  %v10411_v30 = vsel %vm326_vm1, %v3349_v26, %v3351_v53  ;;  %v10413_v38 = vld [vmem:[#allocation2 + $0x88] sm:$0x3] }
 0x313   : > { %11850 = vst [vmem:[#allocation17_spill] sm:$0xff] %v10408_v3  ;;  %11851 = vst [vmem:[#allocation28_spill] sm:$0xff] %v10411_v30  ;;  %v3086_v46 = vadd.f32 %v10297_v13, %v3046_v50  ;;  %7918 = vmatprep.mubr.msk.f32.mxu1 %vm3135_vm4, %v10408_v3  ;;  %v10419_v54 = vld [vmem:[#allocation2 + $0x78] sm:$0xff]  ;;  %v10421_v62 = vld [vmem:[#allocation2 + $0x80] sm:$0xff]  ;;  %v3356_v11 = vrot.slane %v10413_v38, 1  ;;  %v3999_v3 = vrot.slane %v10344_v59, 2 }
 0x314   : > { %3205 = vst.msk [vmem:[#allocation2 + $0xb1] sm:$0xff] %vm3135_vm4, %v3116_v28  ;;  %3204 = vst.msk [vmem:[#allocation2 + $0xa9] sm:$0xff] %vm3135_vm4, %v3115_v42  ;;  %v3085_v17 = vadd.f32 %v10297_v13, %v3045_v57  ;;  %v7880_v9 = vpop.f32.mrb[16].mxu0  ;;  %7919 = vmatmul.mubr.msk.f32.gmra.mrb[8].mxu1 %vm3135_vm4, %v10411_v30  ;;  %v3353_v24 = vrot.slane %v10419_v54, 1  ;;  %v3354_v6 = vrot.slane %v10421_v62, 1 }
 0x315   : > { %v3118_v10 = vmax.f32 %v3086_v46, 0.0  ;;  %v3048_v19 = vmul.f32 %v7880_v9, %v10292_v35  ;;  %v2913_v51 = vpop.f32.mrb[17].mxu0 }
 0x316   : > { %v3117_v20 = vmax.f32 %v3085_v17, 0.0  ;;  %v3047_v37 = vmul.f32 %v10292_v35, %v2913_v51  ;;  %v10433_v4 = vsel %vm326_vm1, %v3353_v24, %v3354_v6  ;;  %v10436_v12 = vsel %vm326_vm1, %v3354_v6, %v3356_v11  ;;  %v10438_v23 = vld [vmem:[#allocation2 + $0xa0] sm:$0x3] }
 0x317   : > { %11852 = vst [vmem:[#allocation29_spill] sm:$0xff] %v10433_v4  ;;  %11853 = vst [vmem:[#allocation30_spill] sm:$0xff] %v10436_v12  ;;  %v3088_v27 = vadd.f32 %v10297_v13, %v3048_v19  ;;  %7921 = vmatprep.mubr.msk.f32.mxu1 %vm3135_vm4, %v10433_v4  ;;  %v10444_v33 = vld [vmem:[#allocation2 + $0x90] sm:$0xff]  ;;  %v10446_v39 = vld [vmem:[#allocation2 + $0x98] sm:$0xff]  ;;  %v3361_v40 = vrot.slane %v10438_v23, 1 }
 0x318   : > { %3207 = vst.msk [vmem:[#allocation2 + $0xc9] sm:$0xff] %vm3135_vm4, %v3118_v10  ;;  %3206 = vst.msk [vmem:[#allocation2 + $0xc1] sm:$0xff] %vm3135_vm4, %v3117_v20  ;;  %v3087_v43 = vadd.f32 %v10297_v13, %v3047_v37  ;;  %v7883_v47 = vpop.f32.mrb[18].mxu0  ;;  %7922 = vmatmul.mubr.msk.f32.gmra.mrb[10].mxu1 %vm3135_vm4, %v10436_v12  ;;  %v3358_v48 = vrot.slane %v10444_v33, 1  ;;  %v3359_v55 = vrot.slane %v10446_v39, 1 }
 0x319   : > { %v3120_v56 = vmax.f32 %v3088_v27, 0.0  ;;  %v3050_v63 = vmul.f32 %v7883_v47, %v10292_v35  ;;  %v2923_v34 = vpop.f32.mrb[19].mxu0 }
 0x31a   : > { %v3119_v53 = vmax.f32 %v3087_v43, 0.0  ;;  %v3049_v58 = vmul.f32 %v10292_v35, %v2923_v34  ;;  %v10458_v60 = vsel %vm326_vm1, %v3358_v48, %v3359_v55  ;;  %v10461_v5 = vsel %vm326_vm1, %v3359_v55, %v3361_v40 }
 0x31b   : > { %11854 = vst [vmem:[#allocation31_spill] sm:$0xff] %v10458_v60  ;;  %11855 = vst [vmem:[#allocation38_spill] sm:$0xff] %v10461_v5  ;;  %v10463_v26 = vld [vmem:[#allocation2 + $0xb8] sm:$0x3]  ;;  %v3090_v28 = vadd.f32 %v10297_v13, %v3050_v63  ;;  %7924 = vmatprep.mubr.msk.f32.mxu1 %vm3135_vm4, %v10458_v60  ;;  %v10469_v50 = vld [vmem:[#allocation2 + $0xa8] sm:$0xff] }
 0x31c   : > { %3209 = vst.msk [vmem:[#allocation2 + $0xe1] sm:$0xff] %vm3135_vm4, %v3120_v56  ;;  %v10471_v7 = vld [vmem:[#allocation2 + $0xb0] sm:$0xff]  ;;  %v3366_v42 = vrot.slane %v10463_v26, 1  ;;  %3208 = vst.msk [vmem:[#allocation2 + $0xd9] sm:$0xff] %vm3135_vm4, %v3119_v53  ;;  %v3089_v57 = vadd.f32 %v10297_v13, %v3049_v58  ;;  %v7886_v46 = vpop.f32.mrb[20].mxu0  ;;  %7925 = vmatmul.mubr.msk.f32.gmra.mrb[12].mxu1 %vm3135_vm4, %v10461_v5  ;;  %v3363_v11 = vrot.slane %v10469_v50, 1 }
 0x31d   : > { %v3364_v17 = vrot.slane %v10471_v7, 1  ;;  %v3122_v9 = vmax.f32 %v3090_v28, 0.0  ;;  %v3052_v24 = vmul.f32 %v7886_v46, %v10292_v35  ;;  %v2933_v6 = vpop.f32.mrb[21].mxu0 }
 0x31e   : > { %v3121_v10 = vmax.f32 %v3089_v57, 0.0  ;;  %v3051_v19 = vmul.f32 %v10292_v35, %v2933_v6 }
 0x31f   : > { %v10483_v51 = vsel %vm326_vm1, %v3363_v11, %v3364_v17  ;;  %v10486_v20 = vsel %vm326_vm1, %v3364_v17, %v3366_v42  ;;  %v10488_v37 = vld [vmem:[#allocation2 + $0xd0] sm:$0x3]  ;;  %3211 = vst.msk [vmem:[#allocation2 + $0xf9] sm:$0xff] %vm3135_vm4, %v3122_v9  ;;  %v3092_v27 = vadd.f32 %v10297_v13, %v3052_v24  ;;  %v10494_v40 = vld [vmem:[#allocation2 + $0xc0] sm:$0xff]  ;;  %v10496_v43 = vld [vmem:[#allocation2 + $0xc8] sm:$0xff] }
 0x320   : > { %11856 = vst [vmem:[#allocation43_spill] sm:$0xff] %v10483_v51  ;;  %11857 = vst [vmem:[#allocation7_spill] sm:$0xff] %v10486_v20  ;;  %7927 = vmatprep.mubr.msk.f32.mxu1 %vm3135_vm4, %v10483_v51  ;;  %v3371_v47 = vrot.slane %v10488_v37, 1  ;;  %v3091_v48 = vadd.f32 %v10297_v13, %v3051_v19  ;;  %v7889_v55 = vpop.f32.mrb[22].mxu0  ;;  %v3368_v56 = vrot.slane %v10494_v40, 1  ;;  %v3369_v63 = vrot.slane %v10496_v43, 1 }
 0x321   : > { %3210 = vst.msk [vmem:[#allocation2 + $0xf1] sm:$0xff] %vm3135_vm4, %v3121_v10  ;;  %7928 = vmatmul.mubr.msk.f32.gmra.mrb[14].mxu1 %vm3135_vm4, %v10486_v20  ;;  %v3124_v34 = vmax.f32 %v3092_v27, 0.0  ;;  %v3054_v53 = vmul.f32 %v7889_v55, %v10292_v35  ;;  %v2943_v58 = vpop.f32.mrb[23].mxu0 }
 0x322   : > { %v3123_v28 = vmax.f32 %v3091_v48, 0.0  ;;  %v3053_v42 = vmul.f32 %v10292_v35, %v2943_v58  ;;  %v10508_v57 = vsel %vm326_vm1, %v3368_v56, %v3369_v63  ;;  %v10511_v46 = vsel %vm326_vm1, %v3369_v63, %v3371_v47 }
 0x323   : > { %11858 = vst [vmem:[#allocation8_spill] sm:$0xff] %v10508_v57  ;;  %11859 = vst [vmem:[#allocation9_spill] sm:$0xff] %v10511_v46  ;;  %v10513_v11 = vld [vmem:[#allocation2 + $0xe8] sm:$0x3]  ;;  %v3094_v17 = vadd.f32 %v10297_v13, %v3054_v53  ;;  %7930 = vmatprep.mubr.msk.f32.mxu1 %vm3135_vm4, %v10508_v57  ;;  %v10519_v9 = vld [vmem:[#allocation2 + $0xd8] sm:$0xff] }
 0x324   : > { %3213 = vst.msk [vmem:[#allocation2 + $0x111] sm:$0xff] %vm3135_vm4, %v3124_v34  ;;  %v10521_v24 = vld [vmem:[#allocation2 + $0xe0] sm:$0xff]  ;;  %v3376_v6 = vrot.slane %v10513_v11, 1  ;;  %3212 = vst.msk [vmem:[#allocation2 + $0x109] sm:$0xff] %vm3135_vm4, %v3123_v28  ;;  %v3093_v10 = vadd.f32 %v10297_v13, %v3053_v42  ;;  %v7892_v19 = vpop.f32.mrb[24].mxu0  ;;  %v3373_v27 = vrot.slane %v10519_v9, 1 }
 0x325   : > { %7931 = vmatmul.mubr.msk.f32.gmra.mrb[16].mxu1 %vm3135_vm4, %v10511_v46  ;;  %v3374_v47 = vrot.slane %v10521_v24, 1  ;;  %v3126_v48 = vmax.f32 %v3094_v17, 0.0  ;;  %v3056_v55 = vmul.f32 %v7892_v19, %v10292_v35  ;;  %v2953_v56 = vpop.f32.mrb[25].mxu0 }
 0x326   : > { %v3125_v63 = vmax.f32 %v3093_v10, 0.0  ;;  %v3055_v34 = vmul.f32 %v10292_v35, %v2953_v56  ;;  %v10538_v28 = vld [vmem:[#allocation2 + $0x100] sm:$0x3] }
 0x327   : > { %v10533_v53 = vsel %vm326_vm1, %v3373_v27, %v3374_v47  ;;  %v10536_v58 = vsel %vm326_vm1, %v3374_v47, %v3376_v6  ;;  %3215 = vst.msk [vmem:[#allocation2 + $0x129] sm:$0xff] %vm3135_vm4, %v3126_v48  ;;  %v3096_v42 = vadd.f32 %v10297_v13, %v3056_v55  ;;  %v3381_v19 = vrot.slane %v10538_v28, 1 }
 0x328   : > { %11860 = vst [vmem:[#allocation10_spill] sm:$0xff] %v10533_v53  ;;  %11861 = vst [vmem:[#allocation11_spill] sm:$0xff] %v10536_v58  ;;  %7933 = vmatprep.mubr.msk.f32.mxu1 %vm3135_vm4, %v10533_v53  ;;  %v10544_v17 = vld [vmem:[#allocation2 + $0xf0] sm:$0xff]  ;;  %v10546_v10 = vld [vmem:[#allocation2 + $0xf8] sm:$0xff]  ;;  %v3095_v6 = vadd.f32 %v10297_v13, %v3055_v34  ;;  %v7895_v27 = vpop.f32.mrb[26].mxu0 }
 0x329   : > { %3214 = vst.msk [vmem:[#allocation2 + $0x121] sm:$0xff] %vm3135_vm4, %v3125_v63  ;;  %7934 = vmatmul.mubr.msk.f32.gmra.mrb[18].mxu1 %vm3135_vm4, %v10536_v58  ;;  %v3378_v47 = vrot.slane %v10544_v17, 1  ;;  %v3379_v48 = vrot.slane %v10546_v10, 1  ;;  %v3128_v55 = vmax.f32 %v3096_v42, 0.0  ;;  %v3058_v56 = vmul.f32 %v7895_v27, %v10292_v35  ;;  %v2963_v53 = vpop.f32.mrb[27].mxu0 }
 0x32a   : > { %v3127_v46 = vmax.f32 %v3095_v6, 0.0  ;;  %v3057_v57 = vmul.f32 %v10292_v35, %v2963_v53 }
 0x32b   : > { %v10558_v20 = vsel %vm326_vm1, %v3378_v47, %v3379_v48  ;;  %v10561_v63 = vsel %vm326_vm1, %v3379_v48, %v3381_v19  ;;  %v10563_v34 = vld [vmem:[#allocation2 + $0x118] sm:$0x3]  ;;  %3217 = vst.msk [vmem:[#allocation2 + $0x141] sm:$0xff] %vm3135_vm4, %v3128_v55  ;;  %v3098_v58 = vadd.f32 %v10297_v13, %v3058_v56  ;;  %v10569_v42 = vld [vmem:[#allocation2 + $0x108] sm:$0xff]  ;;  %v10571_v6 = vld [vmem:[#allocation2 + $0x110] sm:$0xff] }
 0x32c   : > { %11862 = vst [vmem:[#allocation12_spill] sm:$0xff] %v10558_v20  ;;  %11863 = vst [vmem:[#allocation13_spill] sm:$0xff] %v10561_v63  ;;  %7936 = vmatprep.mubr.msk.f32.mxu1 %vm3135_vm4, %v10558_v20  ;;  %v3386_v53 = vrot.slane %v10563_v34, 1  ;;  %v3097_v19 = vadd.f32 %v10297_v13, %v3057_v57  ;;  %v7898_v27 = vpop.f32.mrb[28].mxu0  ;;  %v3383_v47 = vrot.slane %v10569_v42, 1  ;;  %v3384_v48 = vrot.slane %v10571_v6, 1 }
 0x32d   : > { %3216 = vst.msk [vmem:[#allocation2 + $0x139] sm:$0xff] %vm3135_vm4, %v3127_v46  ;;  %7937 = vmatmul.mubr.msk.f32.gmra.mrb[20].mxu1 %vm3135_vm4, %v10561_v63  ;;  %v3130_v55 = vmax.f32 %v3098_v58, 0.0  ;;  %v3060_v56 = vmul.f32 %v7898_v27, %v10292_v35  ;;  %v2973_v20 = vpop.f32.mrb[29].mxu0 }
 0x32e   : > { %v3129_v51 = vmax.f32 %v3097_v19, 0.0  ;;  %v3059_v5 = vmul.f32 %v10292_v35, %v2973_v20  ;;  %v10583_v60 = vsel %vm326_vm1, %v3383_v47, %v3384_v48  ;;  %v10586_v57 = vsel %vm326_vm1, %v3384_v48, %v3386_v53  ;;  %v10588_v46 = vld [vmem:[#allocation2 + $0x130] sm:$0x3] }
 0x32f   : > { %11864 = vst [vmem:[#allocation14_spill] sm:$0xff] %v10583_v60  ;;  %11865 = vst [vmem:[#allocation15_spill] sm:$0xff] %v10586_v57  ;;  %v3100_v63 = vadd.f32 %v10297_v13, %v3060_v56  ;;  %7939 = vmatprep.mubr.msk.f32.mxu1 %vm3135_vm4, %v10583_v60  ;;  %v3391_v20 = vrot.slane %v10588_v46, 1 }
 0x330   : > { %3219 = vst.msk [vmem:[#allocation2 + $0x159] sm:$0xff] %vm3135_vm4, %v3130_v55  ;;  %v10594_v58 = vld [vmem:[#allocation2 + $0x120] sm:$0xff]  ;;  %v10596_v19 = vld [vmem:[#allocation2 + $0x128] sm:$0xff]  ;;  %3218 = vst.msk [vmem:[#allocation2 + $0x151] sm:$0xff] %vm3135_vm4, %v3129_v51  ;;  %v3099_v53 = vadd.f32 %v10297_v13, %v3059_v5  ;;  %v7901_v27 = vpop.f32.mrb[30].mxu0 }
 0x331   : > { %7940 = vmatmul.mubr.msk.f32.gmra.mrb[22].mxu1 %vm3135_vm4, %v10586_v57  ;;  %v3388_v47 = vrot.slane %v10594_v58, 1  ;;  %v3389_v48 = vrot.slane %v10596_v19, 1  ;;  %v3132_v55 = vmax.f32 %v3100_v63, 0.0  ;;  %v3062_v56 = vmul.f32 %v7901_v27, %v10292_v35  ;;  %v2983_v60 = vpop.f32.mrb[31].mxu0 }
 0x332   : > { %v3131_v12 = vmax.f32 %v3099_v53, 0.0  ;;  %v3061_v4 = vmul.f32 %v10292_v35, %v2983_v60  ;;  %v10613_v51 = vld [vmem:[#allocation2 + $0x148] sm:$0x3] }
 0x333   : > { %v10608_v30 = vsel %vm326_vm1, %v3388_v47, %v3389_v48  ;;  %v10611_v5 = vsel %vm326_vm1, %v3389_v48, %v3391_v20  ;;  %3221 = vst.msk [vmem:[#allocation2 + $0x171] sm:$0xff] %vm3135_vm4, %v3132_v55  ;;  %v3102_v57 = vadd.f32 %v10297_v13, %v3062_v56  ;;  %v3396_v35 = vrot.slane %v10613_v51, 1 }
 0x334   : > { %11866 = vst [vmem:[#allocation16_spill] sm:$0xff] %v10608_v30  ;;  %11867 = vst [vmem:[#allocation18_spill] sm:$0xff] %v10611_v5  ;;  %7942 = vmatprep.mubr.msk.f32.mxu1 %vm3135_vm4, %v10608_v30  ;;  %v10619_v63 = vld [vmem:[#allocation2 + $0x138] sm:$0xff]  ;;  %v10621_v53 = vld [vmem:[#allocation2 + $0x140] sm:$0xff]  ;;  %v3101_v60 = vadd.f32 %v10297_v13, %v3061_v4 }
 0x335   : > { %3220 = vst.msk [vmem:[#allocation2 + $0x169] sm:$0xff] %vm3135_vm4, %v3131_v12  ;;  %7943 = vmatmul.mubr.msk.f32.gmra.mrb[24].mxu1 %vm3135_vm4, %v10611_v5  ;;  %v3393_v20 = vrot.slane %v10619_v63, 1  ;;  %v3394_v27 = vrot.slane %v10621_v53, 1  ;;  %v3134_v47 = vmax.f32 %v3102_v57, 0.0 }
 0x336   : > { %v3133_v48 = vmax.f32 %v3101_v60, 0.0 }
 0x337   : > { %v10631_v55 = vsel %vm326_vm1, %v3393_v20, %v3394_v27  ;;  %v10634_v56 = vsel %vm326_vm1, %v3394_v27, %v3396_v35  ;;  %v10636_v30 = vld [vmem:[#allocation2 + $0x160] sm:$0x3]  ;;  %3223 = vst.msk [vmem:[#allocation2 + $0x189] sm:$0xff] %vm3135_vm4, %v3134_v47  ;;  %v10641_v13 = vld [vmem:[#allocation2 + $0x150] sm:$0xff]  ;;  %v10643_v4 = vld [vmem:[#allocation2 + $0x158] sm:$0xff] }
 0x338   : > { %11868 = vst [vmem:[#allocation19_spill] sm:$0xff] %v10631_v55  ;;  %11869 = vst [vmem:[#allocation20_spill] sm:$0xff] %v10634_v56  ;;  %7945 = vmatprep.mubr.msk.f32.mxu1 %vm3135_vm4, %v10631_v55  ;;  %v3401_v12 = vrot.slane %v10636_v30, 1  ;;  %v3398_v57 = vrot.slane %v10641_v13, 1  ;;  %v3399_v35 = vrot.slane %v10643_v4, 1 }
 0x339   : > { %3222 = vst.msk [vmem:[#allocation2 + $0x181] sm:$0xff] %vm3135_vm4, %v3133_v48  ;;  %7946 = vmatmul.mubr.msk.f32.gmra.mrb[26].mxu1 %vm3135_vm4, %v10634_v56 }
 0x33a   : > { %v10652_v60 = vsel %vm326_vm1, %v3398_v57, %v3399_v35  ;;  %v10655_v20 = vsel %vm326_vm1, %v3399_v35, %v3401_v12  ;;  %v10657_v27 = vld [vmem:[#allocation2 + $0x178] sm:$0x3] }
 0x33b   : > { %11870 = vst [vmem:[#allocation21_spill] sm:$0xff] %v10652_v60  ;;  %11871 = vst [vmem:[#allocation22_spill] sm:$0xff] %v10655_v20  ;;  %7948 = vmatprep.mubr.msk.f32.mxu1 %vm3135_vm4, %v10652_v60  ;;  %v3406_v56 = vrot.slane %v10657_v27, 1  ;;  %v6636_v60 = vld [vmem:[%s11593_s3 + $0x30] sm:$0xff] }
 0x33c   : > { %v10661_v47 = vld [vmem:[#allocation2 + $0x168] sm:$0xff]  ;;  %v10663_v48 = vld [vmem:[#allocation2 + $0x170] sm:$0xff] }
 0x33d   : > { %7949 = vmatmul.mubr.msk.f32.gmra.mrb[28].mxu1 %vm3135_vm4, %v10655_v20  ;;  %v3403_v57 = vrot.slane %v10661_v47, 1  ;;  %v3404_v55 = vrot.slane %v10663_v48, 1  ;;  %v6637_v20 = vld [vmem:[%s11593_s3 + $0x38] sm:$0xff] }
 0x33f   : > { %v10671_v12 = vsel %vm326_vm1, %v3403_v57, %v3404_v55  ;;  %v10674_v35 = vsel %vm326_vm1, %v3404_v55, %v3406_v56  ;;  %v8382_v57 = vpack.c.bf16 %v6637_v20, %v6636_v60  ;;  %v3990_v55 = vrot.slane %v10263_v8, 2  ;;  %v6670_v20 = vld [vmem:[%s11593_s3 + $0x40] sm:$0xff] }
 0x340   : > { %11872 = vst [vmem:[#allocation23_spill] sm:$0xff] %v10671_v12  ;;  %11873 = vst [vmem:[#allocation24_spill] sm:$0xff] %v10674_v35  ;;  %7951 = vmatprep.mubr.msk.f32.mxu1 %vm3135_vm4, %v10671_v12  ;;  %v3992_v56 = vrot.slane %v10267_v41, 2  ;;  %v3995_v41 = vrot.slane %v10323_v61, 2  ;;  %v3997_v12 = vrot.slane %v10317_v45, 2  ;;  %v4002_v45 = vrot.slane %v10338_v18, 2 }
 0x341   : > { %7952 = vmatmul.mubr.msk.f32.gmra.mrb[30].mxu1 %vm3135_vm4, %v10674_v35 }
 0x342   : > { %7958 = vmatprep.mubr.msk.f32.mxu1 %vm3135_vm4, %v10261_v2  ;;  %v3993_v35 = vsel %vm995_vm3, %v3990_v55, %v3992_v56  ;;  %v4004_v56 = vrot.slane %v10369_v31, 2 }
 0x345   : > { %7959 = vmatmul.mubr.msk.f32.vlgmr.msra.gmra.mrb[0].mxu1 %vm3135_vm4, %v10263_v8  ;;  %v3994_v8 = vrot.slane %v10321_v21, 2 }
 0x346   : > { %8381 = vmatpush3.bf16.msra.mxu1 %v10286_v1  ;;  %7961 = vmatprep.mubr.msk.f32.mxu1 %vm3135_vm4, %v10321_v21  ;;  %v3989_v1 = vrot.slane %v10261_v2, 2  ;;  %v6671_v2 = vld [vmem:[%s11593_s3 + $0x48] sm:$0xff] }
 0x347   : > { %8383 = vmatprep.subr.bf16.mxu1 %v8382_v57  ;;  %v10770_v5 = vsel %vm995_vm3, %v3994_v8, %v3995_v41  ;;  %v4014_v8 = vrot.slane %v10419_v54, 2 }
 0x348   : > { %v3991_v60 = vsel %vm995_vm3, %v3989_v1, %v3990_v55  ;;  %v10765_v1 = vpack.c.bf16 %v6671_v2, %v6670_v20  ;;  %v10778_v55 = vsel %vm995_vm3, %v3995_v41, %v3997_v12  ;;  %v4007_v12 = vrot.slane %v10363_v22, 2 }
 0x349   : > { %7962 = vmatmul.mubr.msk.f32.gmra.mrb[2].mxu1 %vm3135_vm4, %v10323_v61  ;;  %v4010_v20 = vrot.slane %v10396_v44, 2  ;;  %v4015_v41 = vrot.slane %v10421_v62, 2 }
 0x34a   : > { %7964 = vmatprep.mubr.msk.f32.mxu1 %vm3135_vm4, %v10344_v59 }
 0x34d   : > { %7965 = vmatmul.mubr.msk.f32.gmra.mrb[4].mxu1 %vm3135_vm4, %v10346_v49 }
 0x34e   : > { %7967 = vmatprep.mubr.msk.f32.mxu1 %vm3135_vm4, %v10369_v31 }
 0x351   : > { %7968 = vmatmul.mubr.msk.f32.gmra.mrb[6].mxu1 %vm3135_vm4, %v10371_v32 }
 0x352   : > { %7970 = vmatprep.mubr.msk.f32.mxu1 %vm3135_vm4, %v10394_v36 }
 0x355   : > { %7971 = vmatmul.mubr.msk.f32.gmra.mrb[8].mxu1 %vm3135_vm4, %v10396_v44 }
 0x356   : > { %7973 = vmatprep.mubr.msk.f32.mxu1 %vm3135_vm4, %v10419_v54 }
 0x359   : > { %7974 = vmatmul.mubr.msk.f32.gmra.mrb[10].mxu1 %vm3135_vm4, %v10421_v62 }
 0x35a   : > { %7976 = vmatprep.mubr.msk.f32.mxu1 %vm3135_vm4, %v10444_v33 }
 0x35d   : > { %7977 = vmatmul.mubr.msk.f32.gmra.mrb[12].mxu1 %vm3135_vm4, %v10446_v39 }
 0x35e   : > { %7979 = vmatprep.mubr.msk.f32.mxu1 %vm3135_vm4, %v10469_v50 }
 0x361   : > { %7980 = vmatmul.mubr.msk.f32.gmra.mrb[14].mxu1 %vm3135_vm4, %v10471_v7 }
 0x362   : > { %7982 = vmatprep.mubr.msk.f32.mxu1 %vm3135_vm4, %v10494_v40 }
 0x365   : > { %7983 = vmatmul.mubr.msk.f32.gmra.mrb[16].mxu1 %vm3135_vm4, %v10496_v43 }
 0x366   : > { %7985 = vmatprep.mubr.msk.f32.mxu1 %vm3135_vm4, %v10519_v9 }
 0x369   : > { %7986 = vmatmul.mubr.msk.f32.gmra.mrb[18].mxu1 %vm3135_vm4, %v10521_v24 }
 0x36a   : > { %7988 = vmatprep.mubr.msk.f32.mxu1 %vm3135_vm4, %v10544_v17 }
 0x36d   : > { %7989 = vmatmul.mubr.msk.f32.gmra.mrb[20].mxu1 %vm3135_vm4, %v10546_v10 }
 0x36e   : > { %7991 = vmatprep.mubr.msk.f32.mxu1 %vm3135_vm4, %v10569_v42 }
 0x371   : > { %7992 = vmatmul.mubr.msk.f32.gmra.mrb[22].mxu1 %vm3135_vm4, %v10571_v6 }
 0x372   : > { %7994 = vmatprep.mubr.msk.f32.mxu1 %vm3135_vm4, %v10594_v58 }
 0x375   : > { %7995 = vmatmul.mubr.msk.f32.gmra.mrb[24].mxu1 %vm3135_vm4, %v10596_v19 }
 0x376   : > { %7997 = vmatprep.mubr.msk.f32.mxu1 %vm3135_vm4, %v10619_v63 }
 0x379   : > { %7998 = vmatmul.mubr.msk.f32.gmra.mrb[26].mxu1 %vm3135_vm4, %v10621_v53 }
 0x37a   : > { %8000 = vmatprep.mubr.msk.f32.mxu1 %vm3135_vm4, %v10641_v13 }
 0x37d   : > { %8001 = vmatmul.mubr.msk.f32.gmra.mrb[28].mxu1 %vm3135_vm4, %v10643_v4 }
 0x37e   : > { %8003 = vmatprep.mubr.msk.f32.mxu1 %vm3135_vm4, %v10661_v47 }
 0x381   : > { %8004 = vmatmul.mubr.msk.f32.gmra.mrb[30].mxu1 %vm3135_vm4, %v10663_v48 }
 0x382   : > { %8010 = vmatprep.mubr.msk.f32.mxu1 %vm3135_vm4, %v3991_v60  ;;  %v10791_v60 = vsel %vm995_vm3, %v4000_v15, %v4002_v45 }
 0x385   : > { %8011 = vmatmul.mubr.msk.f32.vlgmr.msra.gmra.mrb[0].mxu1 %vm3135_vm4, %v3993_v35  ;;  %v10784_v35 = vsel %vm995_vm3, %v3999_v3, %v4000_v15  ;;  %v4009_v3 = vrot.slane %v10394_v36, 2  ;;  %v4012_v15 = vrot.slane %v10388_v16, 2  ;;  %v10823_v16 = vsel %vm995_vm3, %v4014_v8, %v4015_v41 }
 0x386   : > { %8385 = vmatpush3.bf16.msra.mxu1 %v8382_v57  ;;  %8013 = vmatprep.mubr.msk.f32.mxu1 %vm3135_vm4, %v10770_v5  ;;  %v4005_v57 = vrot.slane %v10371_v32, 2  ;;  %11874 = vst [vmem:[#allocation25_spill] sm:$0xff] %v10823_v16  ;;  %v4025_v8 = vrot.slane %v10471_v7, 2 }
 0x387   : > { %8387 = vmatprep.subr.bf16.mxu1 %v10765_v1  ;;  %v10810_v22 = vsel %vm995_vm3, %v4009_v3, %v4010_v20  ;;  %v10817_v45 = vsel %vm995_vm3, %v4010_v20, %v4012_v15  ;;  %v4022_v20 = vrot.slane %v10438_v23, 2  ;;  %v4024_v15 = vrot.slane %v10469_v50, 2 }
 0x388   : > { %v10797_v18 = vsel %vm995_vm3, %v4004_v56, %v4005_v57  ;;  %v10804_v2 = vsel %vm995_vm3, %v4005_v57, %v4007_v12  ;;  %v4017_v56 = vrot.slane %v10413_v38, 2  ;;  %v4019_v57 = vrot.slane %v10444_v33, 2 }
 0x389   : > { %8014 = vmatmul.mubr.msk.f32.gmra.mrb[2].mxu1 %vm3135_vm4, %v10778_v55  ;;  %v4020_v12 = vrot.slane %v10446_v39, 2  ;;  %v10849_v23 = vsel %vm995_vm3, %v4024_v15, %v4025_v8  ;;  %v4035_v15 = vrot.slane %v10521_v24, 2 }
 0x38a   : > { %8016 = vmatprep.mubr.msk.f32.mxu1 %vm3135_vm4, %v10784_v35  ;;  %v10830_v3 = vsel %vm995_vm3, %v4015_v41, %v4017_v56  ;;  %v4027_v41 = vrot.slane %v10463_v26, 2  ;;  %11876 = vst [vmem:[#allocation27_spill] sm:$0xff] %v10849_v23  ;;  %v4029_v56 = vrot.slane %v10494_v40, 2 }
 0x38b   : > { %v10836_v38 = vsel %vm995_vm3, %v4019_v57, %v4020_v12  ;;  %v4030_v57 = vrot.slane %v10496_v43, 2 }
 0x38c   : > { %11875 = vst [vmem:[#allocation26_spill] sm:$0xff] %v10836_v38 }
 0x38d   : > { %8017 = vmatmul.mubr.msk.f32.gmra.mrb[4].mxu1 %vm3135_vm4, %v10791_v60  ;;  %v10862_v26 = vsel %vm995_vm3, %v4029_v56, %v4030_v57  ;;  %v4040_v56 = vrot.slane %v10546_v10, 2 }
 0x38e   : > { %8019 = vmatprep.mubr.msk.f32.mxu1 %vm3135_vm4, %v10797_v18  ;;  %11877 = vst [vmem:[#allocation32_spill] sm:$0xff] %v10862_v26 }
 0x391   : > { %8020 = vmatmul.mubr.msk.f32.gmra.mrb[6].mxu1 %vm3135_vm4, %v10804_v2 }
 0x392   : > { %8022 = vmatprep.mubr.msk.f32.mxu1 %vm3135_vm4, %v10810_v22 }
 0x395   : > { %8023 = vmatmul.mubr.msk.f32.gmra.mrb[8].mxu1 %vm3135_vm4, %v10817_v45 }
 0x396   : > { %8025 = vmatprep.mubr.msk.f32.mxu1 %vm3135_vm4, %v10823_v16  ;;  %v10843_v16 = vsel %vm995_vm3, %v4020_v12, %v4022_v20  ;;  %v4032_v12 = vrot.slane %v10488_v37, 2  ;;  %v4034_v20 = vrot.slane %v10519_v9, 2 }
 0x398   : > { %v10875_v37 = vsel %vm995_vm3, %v4034_v20, %v4035_v15  ;;  %v4045_v20 = vrot.slane %v10571_v6, 2 }
 0x399   : > { %8026 = vmatmul.mubr.msk.f32.gmra.mrb[10].mxu1 %vm3135_vm4, %v10830_v3  ;;  %11878 = vst [vmem:[#allocation33_spill] sm:$0xff] %v10875_v37 }
 0x39a   : > { %8028 = vmatprep.mubr.msk.f32.mxu1 %vm3135_vm4, %v10836_v38  ;;  %v10856_v38 = vsel %vm995_vm3, %v4025_v8, %v4027_v41  ;;  %v4037_v8 = vrot.slane %v10513_v11, 2  ;;  %v4039_v41 = vrot.slane %v10544_v17, 2 }
 0x39c   : > { %v10888_v11 = vsel %vm995_vm3, %v4039_v41, %v4040_v56  ;;  %v4050_v41 = vrot.slane %v10596_v19, 2 }
 0x39d   : > { %8029 = vmatmul.mubr.msk.f32.gmra.mrb[12].mxu1 %vm3135_vm4, %v10843_v16  ;;  %11879 = vst [vmem:[#allocation34_spill] sm:$0xff] %v10888_v11 }
 0x39e   : > { %8031 = vmatprep.mubr.msk.f32.mxu1 %vm3135_vm4, %v10849_v23  ;;  %v10869_v23 = vsel %vm995_vm3, %v4030_v57, %v4032_v12  ;;  %v4042_v57 = vrot.slane %v10538_v28, 2  ;;  %v4044_v12 = vrot.slane %v10569_v42, 2 }
 0x3a0   : > { %v10901_v28 = vsel %vm995_vm3, %v4044_v12, %v4045_v20  ;;  %v4055_v12 = vrot.slane %v10621_v53, 2 }
 0x3a1   : > { %8032 = vmatmul.mubr.msk.f32.gmra.mrb[14].mxu1 %vm3135_vm4, %v10856_v38  ;;  %11881 = vst [vmem:[#allocation36_spill] sm:$0xff] %v10901_v28 }
 0x3a2   : > { %8034 = vmatprep.mubr.msk.f32.mxu1 %vm3135_vm4, %v10862_v26  ;;  %v10882_v26 = vsel %vm995_vm3, %v4035_v15, %v4037_v8  ;;  %v4047_v15 = vrot.slane %v10563_v34, 2  ;;  %v4049_v8 = vrot.slane %v10594_v58, 2 }
 0x3a4   : > { %v10914_v34 = vsel %vm995_vm3, %v4049_v8, %v4050_v41  ;;  %v4060_v8 = vrot.slane %v10643_v4, 2 }
 0x3a5   : > { %8035 = vmatmul.mubr.msk.f32.gmra.mrb[16].mxu1 %vm3135_vm4, %v10869_v23  ;;  %11882 = vst [vmem:[#allocation37_spill] sm:$0xff] %v10914_v34 }
 0x3a6   : > { %8037 = vmatprep.mubr.msk.f32.mxu1 %vm3135_vm4, %v10875_v37  ;;  %v10895_v37 = vsel %vm995_vm3, %v4040_v56, %v4042_v57  ;;  %v4052_v56 = vrot.slane %v10588_v46, 2  ;;  %v4054_v57 = vrot.slane %v10619_v63, 2 }
 0x3a7   : > { %11880 = vst [vmem:[#allocation35_spill] sm:$0xff] %v10895_v37 }
 0x3a8   : > { %v10927_v46 = vsel %vm995_vm3, %v4054_v57, %v4055_v12  ;;  %v4065_v57 = vrot.slane %v10663_v48, 2 }
 0x3a9   : > { %8038 = vmatmul.mubr.msk.f32.gmra.mrb[18].mxu1 %vm3135_vm4, %v10882_v26  ;;  %11884 = vst [vmem:[#allocation40_spill] sm:$0xff] %v10927_v46 }
 0x3aa   : > { %8040 = vmatprep.mubr.msk.f32.mxu1 %vm3135_vm4, %v10888_v11  ;;  %v10908_v11 = vsel %vm995_vm3, %v4045_v20, %v4047_v15  ;;  %v4057_v20 = vrot.slane %v10613_v51, 2  ;;  %v4059_v15 = vrot.slane %v10641_v13, 2 }
 0x3ac   : > { %v10940_v51 = vsel %vm995_vm3, %v4059_v15, %v4060_v8  ;;  %v6704_v15 = vld [vmem:[%s11593_s3 + $0x50] sm:$0xff] }
 0x3ad   : > { %8041 = vmatmul.mubr.msk.f32.gmra.mrb[20].mxu1 %vm3135_vm4, %v10895_v37  ;;  %11885 = vst [vmem:[#allocation41_spill] sm:$0xff] %v10940_v51 }
 0x3ae   : > { %8043 = vmatprep.mubr.msk.f32.mxu1 %vm3135_vm4, %v10901_v28  ;;  %v10921_v28 = vsel %vm995_vm3, %v4050_v41, %v4052_v56  ;;  %v4062_v41 = vrot.slane %v10636_v30, 2  ;;  %v4064_v56 = vrot.slane %v10661_v47, 2 }
 0x3af   : > { %11883 = vst [vmem:[#allocation39_spill] sm:$0xff] %v10921_v28 }
 0x3b0   : > { %v10953_v30 = vsel %vm995_vm3, %v4064_v56, %v4065_v57  ;;  %v11894_v56 = vld [vmem:[#allocation31_spill] sm:$0xff] }
 0x3b1   : > { %8044 = vmatmul.mubr.msk.f32.gmra.mrb[22].mxu1 %vm3135_vm4, %v10908_v11  ;;  %11887 = vst [vmem:[#allocation44_spill] sm:$0xff] %v10953_v30 }
 0x3b2   : > { %8046 = vmatprep.mubr.msk.f32.mxu1 %vm3135_vm4, %v10914_v34  ;;  %v10934_v34 = vsel %vm995_vm3, %v4055_v12, %v4057_v20  ;;  %v4067_v12 = vrot.slane %v10657_v27, 2  ;;  %v6705_v27 = vld [vmem:[%s11593_s3 + $0x58] sm:$0xff] }
 0x3b4   : > { %v10958_v20 = vsel %vm995_vm3, %v4065_v57, %v4067_v12  ;;  %v11895_v57 = vld [vmem:[#allocation38_spill] sm:$0xff]  ;;  %v11896_v12 = vld [vmem:[#allocation43_spill] sm:$0xff] }
 0x3b5   : > { %8047 = vmatmul.mubr.msk.f32.gmra.mrb[24].mxu1 %vm3135_vm4, %v10921_v28  ;;  %11888 = vst [vmem:[#allocation45_spill] sm:$0xff] %v10958_v20 }
 0x3b6   : > { %8049 = vmatprep.mubr.msk.f32.mxu1 %vm3135_vm4, %v10927_v46  ;;  %v10947_v46 = vsel %vm995_vm3, %v4060_v8, %v4062_v41  ;;  %v8390_v8 = vpack.c.bf16 %v6705_v27, %v6704_v15  ;;  %v11893_v41 = vld [vmem:[#allocation30_spill] sm:$0xff]  ;;  %v11897_v15 = vld [vmem:[#allocation7_spill] sm:$0xff]  ;;  %v11898_v27 = vld [vmem:[#allocation8_spill] sm:$0xff] }
 0x3b7   : > { %11886 = vst [vmem:[#allocation42_spill] sm:$0xff] %v10947_v46 }
 0x3b9   : > { %8050 = vmatmul.mubr.msk.f32.gmra.mrb[26].mxu1 %vm3135_vm4, %v10934_v34 }
 0x3ba   : > { %8052 = vmatprep.mubr.msk.f32.mxu1 %vm3135_vm4, %v10940_v51 }
 0x3bd   : > { %8053 = vmatmul.mubr.msk.f32.gmra.mrb[28].mxu1 %vm3135_vm4, %v10947_v46 }
 0x3be   : > { %8055 = vmatprep.mubr.msk.f32.mxu1 %vm3135_vm4, %v10953_v30 }
 0x3c1   : > { %8056 = vmatmul.mubr.msk.f32.gmra.mrb[30].mxu1 %vm3135_vm4, %v10958_v20 }
 0x3c2   : > { %8062 = vmatprep.mubr.msk.f32.mxu1 %vm3135_vm4, %v10321_v21  ;;  %v11029_v21 = vld [vmem:[#allocation2 + $0x180] sm:$0xff] }
 0x3c5   : > { %8063 = vmatmul.mubr.msk.f32.vlgmr.msra.gmra.mrb[0].mxu1 %vm3135_vm4, %v10323_v61  ;;  %v11033_v61 = vld [vmem:[#allocation2 + $0x188] sm:$0xff] }
 0x3c6   : > { %8389 = vmatpush3.bf16.msra.mxu1 %v10765_v1  ;;  %8065 = vmatprep.mubr.msk.f32.mxu1 %vm3135_vm4, %v10344_v59  ;;  %v6738_v59 = vld [vmem:[%s11593_s3 + $0x60] sm:$0xff]  ;;  %v11890_v1 = vld [vmem:[#allocation17_spill] sm:$0xff] }
 0x3c7   : > { %8391 = vmatprep.subr.bf16.mxu1 %v8390_v8 }
 0x3c9   : > { %8066 = vmatmul.mubr.msk.f32.gmra.mrb[2].mxu1 %vm3135_vm4, %v10346_v49  ;;  %v6739_v49 = vld [vmem:[%s11593_s3 + $0x68] sm:$0xff] }
 0x3ca   : > { %8068 = vmatprep.mubr.msk.f32.mxu1 %vm3135_vm4, %v10369_v31  ;;  %v8394_v31 = vpack.c.bf16 %v6739_v49, %v6738_v59  ;;  %v11900_v59 = vld [vmem:[#allocation10_spill] sm:$0xff]  ;;  %v11901_v49 = vld [vmem:[#allocation11_spill] sm:$0xff] }
 0x3cd   : > { %8069 = vmatmul.mubr.msk.f32.gmra.mrb[4].mxu1 %vm3135_vm4, %v10371_v32  ;;  %v11889_v32 = vld [vmem:[#allocation6_spill] sm:$0xff] }
 0x3ce   : > { %8071 = vmatprep.mubr.msk.f32.mxu1 %vm3135_vm4, %v10394_v36 }
 0x3d1   : > { %8072 = vmatmul.mubr.msk.f32.gmra.mrb[6].mxu1 %vm3135_vm4, %v10396_v44 }
 0x3d2   : > { %8074 = vmatprep.mubr.msk.f32.mxu1 %vm3135_vm4, %v10419_v54 }
 0x3d5   : > { %8075 = vmatmul.mubr.msk.f32.gmra.mrb[8].mxu1 %vm3135_vm4, %v10421_v62 }
 0x3d6   : > { %8077 = vmatprep.mubr.msk.f32.mxu1 %vm3135_vm4, %v10444_v33 }
 0x3d9   : > { %8078 = vmatmul.mubr.msk.f32.gmra.mrb[10].mxu1 %vm3135_vm4, %v10446_v39 }
 0x3da   : > { %8080 = vmatprep.mubr.msk.f32.mxu1 %vm3135_vm4, %v10469_v50 }
 0x3dd   : > { %8081 = vmatmul.mubr.msk.f32.gmra.mrb[12].mxu1 %vm3135_vm4, %v10471_v7 }
 0x3de   : > { %8083 = vmatprep.mubr.msk.f32.mxu1 %vm3135_vm4, %v10494_v40 }
 0x3e1   : > { %8084 = vmatmul.mubr.msk.f32.gmra.mrb[14].mxu1 %vm3135_vm4, %v10496_v43 }
 0x3e2   : > { %8086 = vmatprep.mubr.msk.f32.mxu1 %vm3135_vm4, %v10519_v9 }
 0x3e5   : > { %8087 = vmatmul.mubr.msk.f32.gmra.mrb[16].mxu1 %vm3135_vm4, %v10521_v24 }
 0x3e6   : > { %8089 = vmatprep.mubr.msk.f32.mxu1 %vm3135_vm4, %v10544_v17 }
 0x3e9   : > { %8090 = vmatmul.mubr.msk.f32.gmra.mrb[18].mxu1 %vm3135_vm4, %v10546_v10 }
 0x3ea   : > { %8092 = vmatprep.mubr.msk.f32.mxu1 %vm3135_vm4, %v10569_v42 }
 0x3ed   : > { %8093 = vmatmul.mubr.msk.f32.gmra.mrb[20].mxu1 %vm3135_vm4, %v10571_v6 }
 0x3ee   : > { %8095 = vmatprep.mubr.msk.f32.mxu1 %vm3135_vm4, %v10594_v58 }
 0x3f1   : > { %8096 = vmatmul.mubr.msk.f32.gmra.mrb[22].mxu1 %vm3135_vm4, %v10596_v19 }
 0x3f2   : > { %8098 = vmatprep.mubr.msk.f32.mxu1 %vm3135_vm4, %v10619_v63 }
 0x3f5   : > { %8099 = vmatmul.mubr.msk.f32.gmra.mrb[24].mxu1 %vm3135_vm4, %v10621_v53 }
 0x3f6   : > { %8101 = vmatprep.mubr.msk.f32.mxu1 %vm3135_vm4, %v10641_v13 }
 0x3f9   : > { %8102 = vmatmul.mubr.msk.f32.gmra.mrb[26].mxu1 %vm3135_vm4, %v10643_v4 }
 0x3fa   : > { %8104 = vmatprep.mubr.msk.f32.mxu1 %vm3135_vm4, %v10661_v47 }
 0x3fd   : > { %8105 = vmatmul.mubr.msk.f32.gmra.mrb[28].mxu1 %vm3135_vm4, %v10663_v48 }
 0x3fe   : > { %8107 = vmatprep.mubr.msk.f32.mxu1 %vm3135_vm4, %v11029_v21 }
 0x401   : > { %8108 = vmatmul.mubr.msk.f32.gmra.mrb[30].mxu1 %vm3135_vm4, %v11033_v61 }
 0x402   : > { %8114 = vmatprep.mubr.msk.f32.mxu1 %vm3135_vm4, %v10333_v29  ;;  %v11891_v29 = vld [vmem:[#allocation28_spill] sm:$0xff] }
 0x405   : > { %8115 = vmatmul.mubr.msk.f32.vlgmr.msra.gmra.mrb[0].mxu1 %vm3135_vm4, %v10336_v52  ;;  %v11892_v52 = vld [vmem:[#allocation29_spill] sm:$0xff] }
 0x406   : > { %8393 = vmatpush3.bf16.msra.mxu1 %v8390_v8  ;;  %8117 = vmatprep.mubr.msk.f32.mxu1 %vm3135_vm4, %v10358_v25  ;;  %v11899_v8 = vld [vmem:[#allocation9_spill] sm:$0xff] }
 0x407   : > { %8395 = vmatprep.subr.bf16.mxu1 %v8394_v31 }
 0x409   : > { %8118 = vmatmul.mubr.msk.f32.gmra.mrb[2].mxu1 %vm3135_vm4, %v10361_v14 }
 0x40a   : > { %8120 = vmatprep.mubr.msk.f32.mxu1 %vm3135_vm4, %v10383_v0 }
 0x40d   : > { %8121 = vmatmul.mubr.msk.f32.gmra.mrb[4].mxu1 %vm3135_vm4, %v11889_v32 }
 0x40e   : > { %8123 = vmatprep.mubr.msk.f32.mxu1 %vm3135_vm4, %v11890_v1 }
 0x411   : > { %8124 = vmatmul.mubr.msk.f32.gmra.mrb[6].mxu1 %vm3135_vm4, %v11891_v29 }
 0x412   : > { %8126 = vmatprep.mubr.msk.f32.mxu1 %vm3135_vm4, %v11892_v52  ;;  %v11913_v52 = vld [vmem:[#allocation24_spill] sm:$0xff] }
 0x415   : > { %8127 = vmatmul.mubr.msk.f32.gmra.mrb[8].mxu1 %vm3135_vm4, %v11893_v41  ;;  %v11912_v41 = vld [vmem:[#allocation23_spill] sm:$0xff] }
 0x416   : > { %8129 = vmatprep.mubr.msk.f32.mxu1 %vm3135_vm4, %v11894_v56  ;;  %v11902_v56 = vld [vmem:[#allocation12_spill] sm:$0xff] }
 0x419   : > { %8130 = vmatmul.mubr.msk.f32.gmra.mrb[10].mxu1 %vm3135_vm4, %v11895_v57  ;;  %v11903_v57 = vld [vmem:[#allocation13_spill] sm:$0xff] }
 0x41a   : > { %8132 = vmatprep.mubr.msk.f32.mxu1 %vm3135_vm4, %v11896_v12  ;;  %v11904_v12 = vld [vmem:[#allocation14_spill] sm:$0xff] }
 0x41d   : > { %8133 = vmatmul.mubr.msk.f32.gmra.mrb[12].mxu1 %vm3135_vm4, %v11897_v15  ;;  %v11905_v15 = vld [vmem:[#allocation15_spill] sm:$0xff] }
 0x41e   : > { %8135 = vmatprep.mubr.msk.f32.mxu1 %vm3135_vm4, %v11898_v27  ;;  %v11906_v27 = vld [vmem:[#allocation16_spill] sm:$0xff] }
 0x421   : > { %8136 = vmatmul.mubr.msk.f32.gmra.mrb[14].mxu1 %vm3135_vm4, %v11899_v8  ;;  %v11907_v8 = vld [vmem:[#allocation18_spill] sm:$0xff] }
 0x422   : > { %8138 = vmatprep.mubr.msk.f32.mxu1 %vm3135_vm4, %v11900_v59  ;;  %v11908_v59 = vld [vmem:[#allocation19_spill] sm:$0xff] }
 0x425   : > { %8139 = vmatmul.mubr.msk.f32.gmra.mrb[16].mxu1 %vm3135_vm4, %v11901_v49  ;;  %v11909_v49 = vld [vmem:[#allocation20_spill] sm:$0xff] }
 0x426   : > { %8141 = vmatprep.mubr.msk.f32.mxu1 %vm3135_vm4, %v11902_v56  ;;  %v11910_v56 = vld [vmem:[#allocation21_spill] sm:$0xff] }
 0x429   : > { %8142 = vmatmul.mubr.msk.f32.gmra.mrb[18].mxu1 %vm3135_vm4, %v11903_v57  ;;  %v4661_v57 = vrot.slane %v11033_v61, 1 }
 0x42a   : > { %8144 = vmatprep.mubr.msk.f32.mxu1 %vm3135_vm4, %v11904_v12  ;;  %v4660_v12 = vrot.slane %v11029_v21, 1 }
 0x42d   : > { %8145 = vmatmul.mubr.msk.f32.gmra.mrb[20].mxu1 %vm3135_vm4, %v11905_v15  ;;  %v11911_v15 = vld [vmem:[#allocation22_spill] sm:$0xff] }
 0x42e   : > { %8147 = vmatprep.mubr.msk.f32.mxu1 %vm3135_vm4, %v11906_v27  ;;  %v3274_v27 = vld [vmem:[#allocation2 + $0x190] sm:$0x3] }
 0x431   : > { %8148 = vmatmul.mubr.msk.f32.gmra.mrb[22].mxu1 %vm3135_vm4, %v11907_v8  ;;  %v4663_v8 = vrot.slane %v3274_v27, 1 }
 0x432   : > { %8150 = vmatprep.mubr.msk.f32.mxu1 %vm3135_vm4, %v11908_v59 }
 0x435   : > { %8151 = vmatmul.mubr.msk.f32.gmra.mrb[24].mxu1 %vm3135_vm4, %v11909_v49  ;;  %v11106_v49 = vsel %vm326_vm1, %v4660_v12, %v4661_v57 }
 0x436   : > { %8153 = vmatprep.mubr.msk.f32.mxu1 %vm3135_vm4, %v11910_v56  ;;  %v11111_v56 = vsel %vm326_vm1, %v4661_v57, %v4663_v8  ;;  %v11918_v57 = vld [vmem:[#allocation33_spill] sm:$0xff]  ;;  %v11920_v8 = vld [vmem:[#allocation36_spill] sm:$0xff] }
 0x439   : > { %8154 = vmatmul.mubr.msk.f32.gmra.mrb[26].mxu1 %vm3135_vm4, %v11911_v15  ;;  %v6772_v15 = vld [vmem:[%s11593_s3 + $0x70] sm:$0xff] }
 0x43a   : > { %8156 = vmatprep.mubr.msk.f32.mxu1 %vm3135_vm4, %v11912_v41  ;;  %v6773_v41 = vld [vmem:[%s11593_s3 + $0x78] sm:$0xff] }
 0x43b   : > { %v8398_v12 = vpack.c.bf16 %v6773_v41, %v6772_v15  ;;  %v11917_v41 = vld [vmem:[#allocation32_spill] sm:$0xff]  ;;  %v11919_v15 = vld [vmem:[#allocation34_spill] sm:$0xff] }
 0x43d   : > { %8157 = vmatmul.mubr.msk.f32.gmra.mrb[28].mxu1 %vm3135_vm4, %v11913_v52 }
 0x43e   : > { %8159 = vmatprep.mubr.msk.f32.mxu1 %vm3135_vm4, %v11106_v49 }
 0x441   : > { %8160 = vmatmul.mubr.msk.f32.gmra.mrb[30].mxu1 %vm3135_vm4, %v11111_v56 }
 0x442   : > { %8166 = vmatprep.mubr.msk.f32.mxu1 %vm3135_vm4, %v10770_v5  ;;  %v11914_v5 = vld [vmem:[#allocation25_spill] sm:$0xff] }
 0x445   : > { %8167 = vmatmul.mubr.msk.f32.vlgmr.msra.gmra.mrb[0].mxu1 %vm3135_vm4, %v10778_v55  ;;  %v11915_v55 = vld [vmem:[#allocation26_spill] sm:$0xff] }
 0x446   : > { %8397 = vmatpush3.bf16.msra.mxu1 %v8394_v31  ;;  %8169 = vmatprep.mubr.msk.f32.mxu1 %vm3135_vm4, %v10784_v35  ;;  %v11916_v31 = vld [vmem:[#allocation27_spill] sm:$0xff] }
 0x447   : > { %8399 = vmatprep.subr.bf16.mxu1 %v8398_v12 }
 0x449   : > { %8170 = vmatmul.mubr.msk.f32.gmra.mrb[2].mxu1 %vm3135_vm4, %v10791_v60 }
 0x44a   : > { %8172 = vmatprep.mubr.msk.f32.mxu1 %vm3135_vm4, %v10797_v18 }
 0x44d   : > { %8173 = vmatmul.mubr.msk.f32.gmra.mrb[4].mxu1 %vm3135_vm4, %v10804_v2 }
 0x44e   : > { %8175 = vmatprep.mubr.msk.f32.mxu1 %vm3135_vm4, %v10810_v22 }
 0x451   : > { %8176 = vmatmul.mubr.msk.f32.gmra.mrb[6].mxu1 %vm3135_vm4, %v10817_v45 }
 0x452   : > { %8178 = vmatprep.mubr.msk.f32.mxu1 %vm3135_vm4, %v11914_v5 }
 0x455   : > { %8179 = vmatmul.mubr.msk.f32.gmra.mrb[8].mxu1 %vm3135_vm4, %v10830_v3 }
 0x456   : > { %8181 = vmatprep.mubr.msk.f32.mxu1 %vm3135_vm4, %v11915_v55 }
 0x459   : > { %8182 = vmatmul.mubr.msk.f32.gmra.mrb[10].mxu1 %vm3135_vm4, %v10843_v16 }
 0x45a   : > { %8184 = vmatprep.mubr.msk.f32.mxu1 %vm3135_vm4, %v11916_v31 }
 0x45d   : > { %8185 = vmatmul.mubr.msk.f32.gmra.mrb[12].mxu1 %vm3135_vm4, %v10856_v38 }
 0x45e   : > { %8187 = vmatprep.mubr.msk.f32.mxu1 %vm3135_vm4, %v11917_v41  ;;  %v11921_v41 = vld [vmem:[#allocation37_spill] sm:$0xff] }
 0x461   : > { %8188 = vmatmul.mubr.msk.f32.gmra.mrb[14].mxu1 %vm3135_vm4, %v10869_v23 }
 0x462   : > { %8190 = vmatprep.mubr.msk.f32.mxu1 %vm3135_vm4, %v11918_v57  ;;  %v11922_v57 = vld [vmem:[#allocation40_spill] sm:$0xff] }
 0x465   : > { %8191 = vmatmul.mubr.msk.f32.gmra.mrb[16].mxu1 %vm3135_vm4, %v10882_v26 }
 0x466   : > { %8193 = vmatprep.mubr.msk.f32.mxu1 %vm3135_vm4, %v11919_v15 }
 0x469   : > { %8194 = vmatmul.mubr.msk.f32.gmra.mrb[18].mxu1 %vm3135_vm4, %v10895_v37  ;;  %v4930_v37 = vrot.slane %v11033_v61, 2 }
 0x46a   : > { %8196 = vmatprep.mubr.msk.f32.mxu1 %vm3135_vm4, %v11920_v8  ;;  %v4929_v8 = vrot.slane %v11029_v21, 2 }
 0x46d   : > { %8197 = vmatmul.mubr.msk.f32.gmra.mrb[20].mxu1 %vm3135_vm4, %v10908_v11 }
 0x46e   : > { %8199 = vmatprep.mubr.msk.f32.mxu1 %vm3135_vm4, %v11921_v41 }
 0x471   : > { %8200 = vmatmul.mubr.msk.f32.gmra.mrb[22].mxu1 %vm3135_vm4, %v10921_v28  ;;  %v4932_v28 = vrot.slane %v3274_v27, 2  ;;  %v6807_v27 = vld [vmem:[%s11593_s3 + $0x88] sm:$0xff] }
 0x472   : > { %8202 = vmatprep.mubr.msk.f32.mxu1 %vm3135_vm4, %v11922_v57  ;;  %v11184_v57 = vsel %vm995_vm3, %v4929_v8, %v4930_v37 }
 0x475   : > { %8203 = vmatmul.mubr.msk.f32.gmra.mrb[24].mxu1 %vm3135_vm4, %v10934_v34 }
 0x476   : > { %8205 = vmatprep.mubr.msk.f32.mxu1 %vm3135_vm4, %v10940_v51  ;;  %v11189_v51 = vsel %vm995_vm3, %v4930_v37, %v4932_v28  ;;  %v8963_v37 = vld [vmem:[#allocation2 + $0x48] sm:$0xff]  ;;  %v8964_v28 = vld [vmem:[#allocation2 + $0x50] sm:$0xff] }
 0x479   : > { %8206 = vmatmul.mubr.msk.f32.gmra.mrb[26].mxu1 %vm3135_vm4, %v10947_v46  ;;  %v6806_v46 = vld [vmem:[%s11593_s3 + $0x80] sm:$0xff] }
 0x47a   : > { %8208 = vmatprep.mubr.msk.f32.mxu1 %vm3135_vm4, %v10953_v30  ;;  %v8402_v8 = vpack.c.bf16 %v6807_v27, %v6806_v46  ;;  %v8962_v30 = vld [vmem:[#allocation2 + $0x38] sm:$0xff] }
 0x47d   : > { %8209 = vmatmul.mubr.msk.f32.gmra.mrb[28].mxu1 %vm3135_vm4, %v10958_v20  ;;  %v8961_v20 = vld [vmem:[#allocation2 + $0x30] sm:$0xff] }
 0x47e   : > { %8211 = vmatprep.mubr.msk.f32.mxu1 %vm3135_vm4, %v11184_v57 }
 0x481   : > { %8212 = vmatmul.mubr.msk.f32.gmra.mrb[30].mxu1 %vm3135_vm4, %v11189_v51 }
 0x482   : > { %8218 = vmatprep.mubr.msk.f32.mxu1 %vm3135_vm4, %v8961_v20 }
 0x485   : > { %8219 = vmatmul.mubr.msk.f32.vlgmr.msra.gmra.mrb[0].mxu1 %vm3135_vm4, %v8962_v30 }
 0x486   : > { %8401 = vmatpush3.bf16.msra.mxu1 %v8398_v12  ;;  %8221 = vmatprep.mubr.msk.f32.mxu1 %vm3135_vm4, %v8963_v37 }
 0x487   : > { %8403 = vmatprep.subr.bf16.mxu1 %v8402_v8 }
 0x489   : > { %8222 = vmatmul.mubr.msk.f32.gmra.mrb[2].mxu1 %vm3135_vm4, %v8964_v28 }
 0x48a   : > { %8224 = vmatprep.mubr.msk.f32.mxu1 %vm3135_vm4, %v10394_v36  ;;  %v11253_v36 = vld [vmem:[#allocation2 + $0x198] sm:$0xff] }
 0x48d   : > { %8225 = vmatmul.mubr.msk.f32.gmra.mrb[4].mxu1 %vm3135_vm4, %v10396_v44  ;;  %v11259_v44 = vld [vmem:[#allocation2 + $0x1a0] sm:$0xff] }
 0x48e   : > { %8227 = vmatprep.mubr.msk.f32.mxu1 %vm3135_vm4, %v10419_v54  ;;  %v11923_v54 = vld [vmem:[#allocation29_spill] sm:$0xff] }
 0x491   : > { %8228 = vmatmul.mubr.msk.f32.gmra.mrb[6].mxu1 %vm3135_vm4, %v10421_v62  ;;  %v11926_v62 = vld [vmem:[#allocation38_spill] sm:$0xff] }
 0x492   : > { %8230 = vmatprep.mubr.msk.f32.mxu1 %vm3135_vm4, %v10444_v33  ;;  %v11928_v33 = vld [vmem:[#allocation7_spill] sm:$0xff] }
 0x495   : > { %8231 = vmatmul.mubr.msk.f32.gmra.mrb[8].mxu1 %vm3135_vm4, %v10446_v39  ;;  %v11929_v39 = vld [vmem:[#allocation8_spill] sm:$0xff] }
 0x496   : > { %8233 = vmatprep.mubr.msk.f32.mxu1 %vm3135_vm4, %v10469_v50  ;;  %v11930_v50 = vld [vmem:[#allocation9_spill] sm:$0xff] }
 0x499   : > { %8234 = vmatmul.mubr.msk.f32.gmra.mrb[10].mxu1 %vm3135_vm4, %v10471_v7  ;;  %v11931_v7 = vld [vmem:[#allocation10_spill] sm:$0xff] }
 0x49a   : > { %8236 = vmatprep.mubr.msk.f32.mxu1 %vm3135_vm4, %v10494_v40  ;;  %v11932_v40 = vld [vmem:[#allocation11_spill] sm:$0xff] }
 0x49d   : > { %8237 = vmatmul.mubr.msk.f32.gmra.mrb[12].mxu1 %vm3135_vm4, %v10496_v43  ;;  %v11933_v43 = vld [vmem:[#allocation12_spill] sm:$0xff] }
 0x49e   : > { %8239 = vmatprep.mubr.msk.f32.mxu1 %vm3135_vm4, %v10519_v9  ;;  %v11934_v9 = vld [vmem:[#allocation13_spill] sm:$0xff] }
 0x4a1   : > { %8240 = vmatmul.mubr.msk.f32.gmra.mrb[14].mxu1 %vm3135_vm4, %v10521_v24  ;;  %v11935_v24 = vld [vmem:[#allocation14_spill] sm:$0xff] }
 0x4a2   : > { %8242 = vmatprep.mubr.msk.f32.mxu1 %vm3135_vm4, %v10544_v17  ;;  %v11936_v17 = vld [vmem:[#allocation15_spill] sm:$0xff] }
 0x4a5   : > { %8243 = vmatmul.mubr.msk.f32.gmra.mrb[16].mxu1 %vm3135_vm4, %v10546_v10  ;;  %v11937_v10 = vld [vmem:[#allocation16_spill] sm:$0xff] }
 0x4a6   : > { %8245 = vmatprep.mubr.msk.f32.mxu1 %vm3135_vm4, %v10569_v42  ;;  %v11938_v42 = vld [vmem:[#allocation18_spill] sm:$0xff] }
 0x4a9   : > { %8246 = vmatmul.mubr.msk.f32.gmra.mrb[18].mxu1 %vm3135_vm4, %v10571_v6  ;;  %v11939_v6 = vld [vmem:[#allocation20_spill] sm:$0xff] }
 0x4aa   : > { %8248 = vmatprep.mubr.msk.f32.mxu1 %vm3135_vm4, %v10594_v58  ;;  %v11940_v58 = vld [vmem:[#allocation21_spill] sm:$0xff] }
 0x4ad   : > { %8249 = vmatmul.mubr.msk.f32.gmra.mrb[20].mxu1 %vm3135_vm4, %v10596_v19  ;;  %v11941_v19 = vld [vmem:[#allocation22_spill] sm:$0xff] }
 0x4ae   : > { %8251 = vmatprep.mubr.msk.f32.mxu1 %vm3135_vm4, %v10619_v63  ;;  %v11942_v63 = vld [vmem:[#allocation23_spill] sm:$0xff] }
 0x4b1   : > { %8252 = vmatmul.mubr.msk.f32.gmra.mrb[22].mxu1 %vm3135_vm4, %v10621_v53  ;;  %v5465_v53 = vrot.slane %v11253_v36, 1 }
 0x4b2   : > { %8254 = vmatprep.mubr.msk.f32.mxu1 %vm3135_vm4, %v10641_v13  ;;  %v5466_v13 = vrot.slane %v11259_v44, 1 }
 0x4b5   : > { %8255 = vmatmul.mubr.msk.f32.gmra.mrb[24].mxu1 %vm3135_vm4, %v10643_v4  ;;  %v3277_v4 = vld [vmem:[#allocation2 + $0x1a8] sm:$0x3] }
 0x4b6   : > { %8257 = vmatprep.mubr.msk.f32.mxu1 %vm3135_vm4, %v10661_v47  ;;  %v5468_v47 = vrot.slane %v3277_v4, 1 }
 0x4b8   : > { %v5469_v46 = vsel %vm326_vm1, %v5466_v13, %v5468_v47 }
 0x4b9   : > { %8258 = vmatmul.mubr.msk.f32.gmra.mrb[26].mxu1 %vm3135_vm4, %v10663_v48  ;;  %v5467_v48 = vsel %vm326_vm1, %v5465_v53, %v5466_v13 }
 0x4ba   : > { %8260 = vmatprep.mubr.msk.f32.mxu1 %vm3135_vm4, %v11029_v21  ;;  %v11399_v21 = vld [vmem:[%s11594_s4] ss:$0 sm:$0xff] }
 0x4bd   : > { %8261 = vmatmul.mubr.msk.f32.gmra.mrb[28].mxu1 %vm3135_vm4, %v11033_v61 }
 0x4be   : > { %8263 = vmatprep.mubr.msk.f32.mxu1 %vm3135_vm4, %v11253_v36 }
 0x4c1   : > { %8264 = vmatmul.mubr.msk.f32.gmra.mrb[30].mxu1 %vm3135_vm4, %v11259_v44 }
 0x4c2   : > { %8270 = vmatprep.mubr.msk.f32.mxu1 %vm3135_vm4, %v10358_v25  ;;  %v11924_v25 = vld [vmem:[#allocation30_spill] sm:$0xff] }
 0x4c5   : > { %8271 = vmatmul.mubr.msk.f32.vlgmr.msra.gmra.mrb[0].mxu1 %vm3135_vm4, %v10361_v14  ;;  %v11925_v14 = vld [vmem:[#allocation31_spill] sm:$0xff] }
 0x4c6   : > { %8405 = vmatpush3.bf16.msra.mxu1 %v8402_v8  ;;  %8273 = vmatprep.mubr.msk.f32.mxu1 %vm3135_vm4, %v10383_v0  ;;  %v11927_v0 = vld [vmem:[#allocation43_spill] sm:$0xff] }
 0x4c9   : > { %8274 = vmatmul.mubr.msk.f32.gmra.mrb[2].mxu1 %vm3135_vm4, %v11889_v32  ;;  %v11404_v32 = vld [vmem:[%s11594_s4 + $0x1] ss:$0 sm:$0xff] }
 0x4ca   : > { %8276 = vmatprep.mubr.msk.f32.mxu1 %vm3135_vm4, %v11890_v1 }
 0x4cd   : > { %8277 = vmatmul.mubr.msk.f32.gmra.mrb[4].mxu1 %vm3135_vm4, %v11891_v29 }
 0x4ce   : > { %8279 = vmatprep.mubr.msk.f32.mxu1 %vm3135_vm4, %v11923_v54 }
 0x4d1   : > { %8280 = vmatmul.mubr.msk.f32.gmra.mrb[6].mxu1 %vm3135_vm4, %v11924_v25 }
 0x4d2   : > { %8282 = vmatprep.mubr.msk.f32.mxu1 %vm3135_vm4, %v11925_v14 }
 0x4d5   : > { %8283 = vmatmul.mubr.msk.f32.gmra.mrb[8].mxu1 %vm3135_vm4, %v11926_v62 }
 0x4d6   : > { %8285 = vmatprep.mubr.msk.f32.mxu1 %vm3135_vm4, %v11927_v0 }
 0x4d9   : > { %8286 = vmatmul.mubr.msk.f32.gmra.mrb[10].mxu1 %vm3135_vm4, %v11928_v33 }
 0x4da   : > { %8288 = vmatprep.mubr.msk.f32.mxu1 %vm3135_vm4, %v11929_v39 }
 0x4dd   : > { %8289 = vmatmul.mubr.msk.f32.gmra.mrb[12].mxu1 %vm3135_vm4, %v11930_v50 }
 0x4de   : > { %8291 = vmatprep.mubr.msk.f32.mxu1 %vm3135_vm4, %v11931_v7 }
 0x4e1   : > { %8292 = vmatmul.mubr.msk.f32.gmra.mrb[14].mxu1 %vm3135_vm4, %v11932_v40 }
 0x4e2   : > { %8294 = vmatprep.mubr.msk.f32.mxu1 %vm3135_vm4, %v11933_v43 }
 0x4e5   : > { %8295 = vmatmul.mubr.msk.f32.gmra.mrb[16].mxu1 %vm3135_vm4, %v11934_v9 }
 0x4e6   : > { %8297 = vmatprep.mubr.msk.f32.mxu1 %vm3135_vm4, %v11935_v24 }
 0x4e9   : > { %8298 = vmatmul.mubr.msk.f32.gmra.mrb[18].mxu1 %vm3135_vm4, %v11936_v17 }
 0x4ea   : > { %8300 = vmatprep.mubr.msk.f32.mxu1 %vm3135_vm4, %v11937_v10 }
 0x4ed   : > { %8301 = vmatmul.mubr.msk.f32.gmra.mrb[20].mxu1 %vm3135_vm4, %v11938_v42 }
 0x4ee   : > { %8303 = vmatprep.mubr.msk.f32.mxu1 %vm3135_vm4, %v11908_v59 }
 0x4f1   : > { %8304 = vmatmul.mubr.msk.f32.gmra.mrb[22].mxu1 %vm3135_vm4, %v11939_v6 }
 0x4f2   : > { %8306 = vmatprep.mubr.msk.f32.mxu1 %vm3135_vm4, %v11940_v58 }
 0x4f5   : > { %8307 = vmatmul.mubr.msk.f32.gmra.mrb[24].mxu1 %vm3135_vm4, %v11941_v19 }
 0x4f6   : > { %8309 = vmatprep.mubr.msk.f32.mxu1 %vm3135_vm4, %v11942_v63 }
 0x4f9   : > { %8310 = vmatmul.mubr.msk.f32.gmra.mrb[26].mxu1 %vm3135_vm4, %v11913_v52 }
 0x4fa   : > { %8312 = vmatprep.mubr.msk.f32.mxu1 %vm3135_vm4, %v11106_v49 }
 0x4fd   : > { %8313 = vmatmul.mubr.msk.f32.gmra.mrb[28].mxu1 %vm3135_vm4, %v11111_v56 }
 0x4fe   : > { %8315 = vmatprep.mubr.msk.f32.mxu1 %vm3135_vm4, %v5467_v48 }
 0x501   : > { %8316 = vmatmul.mubr.msk.f32.gmra.mrb[30].mxu1 %vm3135_vm4, %v5469_v46 }
 0x502   : > { %8322 = vmatprep.mubr.msk.f32.mxu1 %vm3135_vm4, %v10784_v35  ;;  %v11943_v35 = vld [vmem:[#allocation32_spill] sm:$0xff] }
 0x505   : > { %8323 = vmatmul.mubr.msk.f32.vlgmr.msra.gmra.mrb[0].mxu1 %vm3135_vm4, %v10791_v60  ;;  %v11944_v60 = vld [vmem:[#allocation33_spill] sm:$0xff] }
 0x506   : > { %8325 = vmatprep.mubr.msk.f32.mxu1 %vm3135_vm4, %v10797_v18  ;;  %v11945_v18 = vld [vmem:[#allocation35_spill] sm:$0xff] }
 0x509   : > { %8326 = vmatmul.mubr.msk.f32.gmra.mrb[2].mxu1 %vm3135_vm4, %v10804_v2  ;;  %v11946_v2 = vld [vmem:[#allocation36_spill] sm:$0xff] }
 0x50a   : > { %8328 = vmatprep.mubr.msk.f32.mxu1 %vm3135_vm4, %v10810_v22  ;;  %v11947_v22 = vld [vmem:[#allocation39_spill] sm:$0xff] }
 0x50d   : > { %8329 = vmatmul.mubr.msk.f32.gmra.mrb[4].mxu1 %vm3135_vm4, %v10817_v45  ;;  %v11948_v45 = vld [vmem:[#allocation40_spill] sm:$0xff] }
 0x50e   : > { %8331 = vmatprep.mubr.msk.f32.mxu1 %vm3135_vm4, %v11914_v5 }
 0x511   : > { %8332 = vmatmul.mubr.msk.f32.gmra.mrb[6].mxu1 %vm3135_vm4, %v10830_v3  ;;  %v11950_v3 = vld [vmem:[#allocation42_spill] sm:$0xff] }
 0x512   : > { %8334 = vmatprep.mubr.msk.f32.mxu1 %vm3135_vm4, %v11915_v55 }
 0x515   : > { %8335 = vmatmul.mubr.msk.f32.gmra.mrb[8].mxu1 %vm3135_vm4, %v10843_v16  ;;  %v11949_v16 = vld [vmem:[#allocation41_spill] sm:$0xff] }
 0x516   : > { %8337 = vmatprep.mubr.msk.f32.mxu1 %vm3135_vm4, %v11916_v31 }
 0x519   : > { %8338 = vmatmul.mubr.msk.f32.gmra.mrb[10].mxu1 %vm3135_vm4, %v10856_v38  ;;  %v11951_v38 = vld [vmem:[#allocation44_spill] sm:$0xff] }
 0x51a   : > { %8340 = vmatprep.mubr.msk.f32.mxu1 %vm3135_vm4, %v11943_v35 }
 0x51d   : > { %8341 = vmatmul.mubr.msk.f32.gmra.mrb[12].mxu1 %vm3135_vm4, %v10869_v23  ;;  %v5734_v23 = vrot.slane %v11253_v36, 2 }
 0x51e   : > { %8343 = vmatprep.mubr.msk.f32.mxu1 %vm3135_vm4, %v11944_v60 }
 0x521   : > { %8344 = vmatmul.mubr.msk.f32.gmra.mrb[14].mxu1 %vm3135_vm4, %v10882_v26  ;;  %v5735_v26 = vrot.slane %v11259_v44, 2 }
 0x522   : > { %8346 = vmatprep.mubr.msk.f32.mxu1 %vm3135_vm4, %v11919_v15 }
 0x523   : > { %v5736_v30 = vsel %vm995_vm3, %v5734_v23, %v5735_v26 }
 0x525   : > { %8347 = vmatmul.mubr.msk.f32.gmra.mrb[16].mxu1 %vm3135_vm4, %v11945_v18 }
 0x526   : > { %8349 = vmatprep.mubr.msk.f32.mxu1 %vm3135_vm4, %v11946_v2 }
 0x529   : > { %8350 = vmatmul.mubr.msk.f32.gmra.mrb[18].mxu1 %vm3135_vm4, %v10908_v11  ;;  %v11952_v11 = vld [vmem:[#allocation45_spill] sm:$0xff] }
 0x52a   : > { %8352 = vmatprep.mubr.msk.f32.mxu1 %vm3135_vm4, %v11921_v41 }
 0x52d   : > { %8353 = vmatmul.mubr.msk.f32.gmra.mrb[20].mxu1 %vm3135_vm4, %v11947_v22 }
 0x52e   : > { %8355 = vmatprep.mubr.msk.f32.mxu1 %vm3135_vm4, %v11948_v45 }
 0x531   : > { %8356 = vmatmul.mubr.msk.f32.gmra.mrb[22].mxu1 %vm3135_vm4, %v10934_v34  ;;  %v5737_v34 = vrot.slane %v3277_v4, 2 }
 0x532   : > { %8358 = vmatprep.mubr.msk.f32.mxu1 %vm3135_vm4, %v11949_v16 }
 0x533   : > { %v5738_v20 = vsel %vm995_vm3, %v5735_v26, %v5737_v34 }
 0x535   : > { %8359 = vmatmul.mubr.msk.f32.gmra.mrb[24].mxu1 %vm3135_vm4, %v11950_v3 }
 0x536   : > { %8361 = vmatprep.mubr.msk.f32.mxu1 %vm3135_vm4, %v11951_v38 }
 0x539   : > { %8362 = vmatmul.mubr.msk.f32.gmra.mrb[26].mxu1 %vm3135_vm4, %v11952_v11 }
 0x53a   : > { %8364 = vmatprep.mubr.msk.f32.mxu1 %vm3135_vm4, %v11184_v57 }
 0x53d   : > { %8365 = vmatmul.mubr.msk.f32.gmra.mrb[28].mxu1 %vm3135_vm4, %v11189_v51 }
 0x53e   : > { %8367 = vmatprep.mubr.msk.f32.mxu1 %vm3135_vm4, %v5736_v30 }
 0x541   : > { %8368 = vmatmul.mubr.msk.f32.gmra.mrb[30].mxu1 %vm3135_vm4, %v5738_v20 }
 0x5d8   : > { %v8324_v61 = vpop.f32.mrb[0].mxu1 }
 0x5d9   : > { %v6011_v51 = vmul.f32 %v8324_v61, %v11399_v21  ;;  %v5812_v1 = vpop.f32.mrb[1].mxu1 }
 0x5da   : > { %v6010_v29 = vmul.f32 %v11399_v21, %v5812_v1 }
 0x5db   : > { %v6051_v52 = vadd.f32 %v11404_v32, %v6011_v51 }
 0x5dc   : > { %v6050_v56 = vadd.f32 %v11404_v32, %v6010_v29  ;;  %v8327_v59 = vpop.f32.mrb[2].mxu1 }
 0x5dd   : > { %v6083_v49 = vmax.f32 %v6051_v52, 0.0  ;;  %v6013_v12 = vmul.f32 %v8327_v59, %v11399_v21  ;;  %v5822_v5 = vpop.f32.mrb[3].mxu1 }
 0x5de   : > { %v6082_v55 = vmax.f32 %v6050_v56, 0.0  ;;  %v6012_v31 = vmul.f32 %v11399_v21, %v5822_v5 }
 0x5df   : > { %6115 = vst.msk [vmem:[%s11414_s10 + $0x8] sm:$0xff] %vm3135_vm4, %v6083_v49  ;;  %v6053_v41 = vadd.f32 %v11404_v32, %v6013_v12 }
 0x5e0   : > { %6114 = vst.msk [vmem:[%s11414_s10] sm:$0xff] %vm3135_vm4, %v6082_v55  ;;  %v6052_v57 = vadd.f32 %v11404_v32, %v6012_v31  ;;  %v8330_v15 = vpop.f32.mrb[4].mxu1 }
 0x5e1   : > { %v6085_v27 = vmax.f32 %v6053_v41, 0.0  ;;  %v6015_v8 = vmul.f32 %v8330_v15, %v11399_v21  ;;  %v5832_v37 = vpop.f32.mrb[5].mxu1 }
 0x5e2   : > { %v6084_v28 = vmax.f32 %v6052_v57, 0.0  ;;  %v6014_v36 = vmul.f32 %v11399_v21, %v5832_v37 }
 0x5e3   : > { %6117 = vst.msk [vmem:[%s11414_s10 + $0x18] sm:$0xff] %vm3135_vm4, %v6085_v27  ;;  %v6055_v44 = vadd.f32 %v11404_v32, %v6015_v8 }
 0x5e4   : > { %6116 = vst.msk [vmem:[%s11414_s10 + $0x10] sm:$0xff] %vm3135_vm4, %v6084_v28  ;;  %v6054_v54 = vadd.f32 %v11404_v32, %v6014_v36  ;;  %v8333_v25 = vpop.f32.mrb[6].mxu1 }
 0x5e5   : > { %v6087_v14 = vmax.f32 %v6055_v44, 0.0  ;;  %v6017_v62 = vmul.f32 %v8333_v25, %v11399_v21  ;;  %v5842_v0 = vpop.f32.mrb[7].mxu1 }
 0x5e6   : > { %v6086_v33 = vmax.f32 %v6054_v54, 0.0  ;;  %v6016_v39 = vmul.f32 %v11399_v21, %v5842_v0 }
 0x5e7   : > { %6119 = vst.msk [vmem:[%s11414_s10 + $0x28] sm:$0xff] %vm3135_vm4, %v6087_v14  ;;  %v6057_v50 = vadd.f32 %v11404_v32, %v6017_v62 }
 0x5e8   : > { %6118 = vst.msk [vmem:[%s11414_s10 + $0x20] sm:$0xff] %vm3135_vm4, %v6086_v33  ;;  %v6056_v7 = vadd.f32 %v11404_v32, %v6016_v39  ;;  %v8336_v40 = vpop.f32.mrb[8].mxu1 }
 0x5e9   : > { %v6089_v43 = vmax.f32 %v6057_v50, 0.0  ;;  %v6019_v9 = vmul.f32 %v8336_v40, %v11399_v21  ;;  %v5852_v24 = vpop.f32.mrb[9].mxu1 }
 0x5ea   : > { %v6088_v17 = vmax.f32 %v6056_v7, 0.0  ;;  %v6018_v10 = vmul.f32 %v11399_v21, %v5852_v24 }
 0x5eb   : > { %6121 = vst.msk [vmem:[%s11414_s10 + $0x38] sm:$0xff] %vm3135_vm4, %v6089_v43  ;;  %v6059_v42 = vadd.f32 %v11404_v32, %v6019_v9 }
 0x5ec   : > { %6120 = vst.msk [vmem:[%s11414_s10 + $0x30] sm:$0xff] %vm3135_vm4, %v6088_v17  ;;  %v6058_v6 = vadd.f32 %v11404_v32, %v6018_v10  ;;  %v8339_v58 = vpop.f32.mrb[10].mxu1 }
 0x5ed   : > { %v6091_v19 = vmax.f32 %v6059_v42, 0.0  ;;  %v6021_v63 = vmul.f32 %v8339_v58, %v11399_v21  ;;  %v5862_v53 = vpop.f32.mrb[11].mxu1 }
 0x5ee   : > { %v6090_v13 = vmax.f32 %v6058_v6, 0.0  ;;  %v6020_v4 = vmul.f32 %v11399_v21, %v5862_v53 }
 0x5ef   : > { %6123 = vst.msk [vmem:[%s11414_s10 + $0x48] sm:$0xff] %vm3135_vm4, %v6091_v19  ;;  %v6061_v47 = vadd.f32 %v11404_v32, %v6021_v63 }
 0x5f0   : > { %6122 = vst.msk [vmem:[%s11414_s10 + $0x40] sm:$0xff] %vm3135_vm4, %v6090_v13  ;;  %v6060_v48 = vadd.f32 %v11404_v32, %v6020_v4  ;;  %v8342_v46 = vpop.f32.mrb[12].mxu1 }
 0x5f1   : > { %v6093_v35 = vmax.f32 %v6061_v47, 0.0  ;;  %v6023_v60 = vmul.f32 %v8342_v46, %v11399_v21  ;;  %v5872_v18 = vpop.f32.mrb[13].mxu1 }
 0x5f2   : > { %v6092_v2 = vmax.f32 %v6060_v48, 0.0  ;;  %v6022_v22 = vmul.f32 %v11399_v21, %v5872_v18 }
 0x5f3   : > { %6125 = vst.msk [vmem:[%s11414_s10 + $0x58] sm:$0xff] %vm3135_vm4, %v6093_v35  ;;  %v6063_v45 = vadd.f32 %v11404_v32, %v6023_v60 }
 0x5f4   : > { %6124 = vst.msk [vmem:[%s11414_s10 + $0x50] sm:$0xff] %vm3135_vm4, %v6092_v2  ;;  %v6062_v16 = vadd.f32 %v11404_v32, %v6022_v22  ;;  %v8345_v3 = vpop.f32.mrb[14].mxu1 }
 0x5f5   : > { %v6095_v38 = vmax.f32 %v6063_v45, 0.0  ;;  %v6025_v23 = vmul.f32 %v8345_v3, %v11399_v21  ;;  %v5882_v26 = vpop.f32.mrb[15].mxu1 }
 0x5f6   : > { %v6094_v11 = vmax.f32 %v6062_v16, 0.0  ;;  %v6024_v34 = vmul.f32 %v11399_v21, %v5882_v26 }
 0x5f7   : > { %6127 = vst.msk [vmem:[%s11414_s10 + $0x68] sm:$0xff] %vm3135_vm4, %v6095_v38  ;;  %v6065_v30 = vadd.f32 %v11404_v32, %v6025_v23 }
 0x5f8   : > { %6126 = vst.msk [vmem:[%s11414_s10 + $0x60] sm:$0xff] %vm3135_vm4, %v6094_v11  ;;  %v6064_v20 = vadd.f32 %v11404_v32, %v6024_v34  ;;  %v8348_v61 = vpop.f32.mrb[16].mxu1 }
 0x5f9   : > { %v6097_v51 = vmax.f32 %v6065_v30, 0.0  ;;  %v6027_v1 = vmul.f32 %v8348_v61, %v11399_v21  ;;  %v5892_v29 = vpop.f32.mrb[17].mxu1 }
 0x5fa   : > { %v6096_v52 = vmax.f32 %v6064_v20, 0.0  ;;  %v6026_v56 = vmul.f32 %v11399_v21, %v5892_v29 }
 0x5fb   : > { %6129 = vst.msk [vmem:[%s11414_s10 + $0x78] sm:$0xff] %vm3135_vm4, %v6097_v51  ;;  %v6067_v59 = vadd.f32 %v11404_v32, %v6027_v1 }
 0x5fc   : > { %6128 = vst.msk [vmem:[%s11414_s10 + $0x70] sm:$0xff] %vm3135_vm4, %v6096_v52  ;;  %v6066_v49 = vadd.f32 %v11404_v32, %v6026_v56  ;;  %v8351_v12 = vpop.f32.mrb[18].mxu1 }
 0x5fd   : > { %v6099_v5 = vmax.f32 %v6067_v59, 0.0  ;;  %v6029_v55 = vmul.f32 %v8351_v12, %v11399_v21  ;;  %v5902_v31 = vpop.f32.mrb[19].mxu1 }
 0x5fe   : > { %v6098_v41 = vmax.f32 %v6066_v49, 0.0  ;;  %v6028_v57 = vmul.f32 %v11399_v21, %v5902_v31 }
 0x5ff   : > { %6131 = vst.msk [vmem:[%s11414_s10 + $0x88] sm:$0xff] %vm3135_vm4, %v6099_v5  ;;  %v6069_v15 = vadd.f32 %v11404_v32, %v6029_v55 }
 0x600   : > { %6130 = vst.msk [vmem:[%s11414_s10 + $0x80] sm:$0xff] %vm3135_vm4, %v6098_v41  ;;  %v6068_v27 = vadd.f32 %v11404_v32, %v6028_v57  ;;  %v8354_v8 = vpop.f32.mrb[20].mxu1 }
 0x601   : > { %v6101_v37 = vmax.f32 %v6069_v15, 0.0  ;;  %v6031_v28 = vmul.f32 %v8354_v8, %v11399_v21  ;;  %v5912_v36 = vpop.f32.mrb[21].mxu1 }
 0x602   : > { %v6100_v44 = vmax.f32 %v6068_v27, 0.0  ;;  %v6030_v54 = vmul.f32 %v11399_v21, %v5912_v36 }
 0x603   : > { %6133 = vst.msk [vmem:[%s11414_s10 + $0x98] sm:$0xff] %vm3135_vm4, %v6101_v37  ;;  %v6071_v25 = vadd.f32 %v11404_v32, %v6031_v28 }
 0x604   : > { %6132 = vst.msk [vmem:[%s11414_s10 + $0x90] sm:$0xff] %vm3135_vm4, %v6100_v44  ;;  %v6070_v14 = vadd.f32 %v11404_v32, %v6030_v54  ;;  %v8357_v62 = vpop.f32.mrb[22].mxu1 }
 0x605   : > { %v6103_v0 = vmax.f32 %v6071_v25, 0.0  ;;  %v6033_v33 = vmul.f32 %v8357_v62, %v11399_v21  ;;  %v5922_v39 = vpop.f32.mrb[23].mxu1 }
 0x606   : > { %v6102_v50 = vmax.f32 %v6070_v14, 0.0  ;;  %v6032_v7 = vmul.f32 %v11399_v21, %v5922_v39 }
 0x607   : > { %6135 = vst.msk [vmem:[%s11414_s10 + $0xa8] sm:$0xff] %vm3135_vm4, %v6103_v0  ;;  %v6073_v40 = vadd.f32 %v11404_v32, %v6033_v33 }
 0x608   : > { %6134 = vst.msk [vmem:[%s11414_s10 + $0xa0] sm:$0xff] %vm3135_vm4, %v6102_v50  ;;  %v6072_v43 = vadd.f32 %v11404_v32, %v6032_v7  ;;  %v8360_v9 = vpop.f32.mrb[24].mxu1 }
 0x609   : > { %v6105_v24 = vmax.f32 %v6073_v40, 0.0  ;;  %v6035_v17 = vmul.f32 %v8360_v9, %v11399_v21  ;;  %v5932_v10 = vpop.f32.mrb[25].mxu1 }
 0x60a   : > { %v6104_v42 = vmax.f32 %v6072_v43, 0.0  ;;  %v6034_v6 = vmul.f32 %v11399_v21, %v5932_v10 }
 0x60b   : > { %6137 = vst.msk [vmem:[%s11414_s10 + $0xb8] sm:$0xff] %vm3135_vm4, %v6105_v24  ;;  %v6075_v58 = vadd.f32 %v11404_v32, %v6035_v17 }
 0x60c   : > { %6136 = vst.msk [vmem:[%s11414_s10 + $0xb0] sm:$0xff] %vm3135_vm4, %v6104_v42  ;;  %v6074_v19 = vadd.f32 %v11404_v32, %v6034_v6  ;;  %v8363_v63 = vpop.f32.mrb[26].mxu1 }
 0x60d   : > { %v6107_v53 = vmax.f32 %v6075_v58, 0.0  ;;  %v6037_v13 = vmul.f32 %v8363_v63, %v11399_v21  ;;  %v5942_v4 = vpop.f32.mrb[27].mxu1 }
 0x60e   : > { %v6106_v47 = vmax.f32 %v6074_v19, 0.0  ;;  %v6036_v48 = vmul.f32 %v11399_v21, %v5942_v4 }
 0x60f   : > { %6139 = vst.msk [vmem:[%s11414_s10 + $0xc8] sm:$0xff] %vm3135_vm4, %v6107_v53  ;;  %v6077_v46 = vadd.f32 %v11404_v32, %v6037_v13 }
 0x610   : > { %6138 = vst.msk [vmem:[%s11414_s10 + $0xc0] sm:$0xff] %vm3135_vm4, %v6106_v47  ;;  %v6076_v35 = vadd.f32 %v11404_v32, %v6036_v48  ;;  %v8366_v60 = vpop.f32.mrb[28].mxu1 }
 0x611   : > { %v6109_v18 = vmax.f32 %v6077_v46, 0.0  ;;  %v6039_v2 = vmul.f32 %v8366_v60, %v11399_v21  ;;  %v5952_v22 = vpop.f32.mrb[29].mxu1 }
 0x612   : > { %v6108_v45 = vmax.f32 %v6076_v35, 0.0  ;;  %v6038_v16 = vmul.f32 %v11399_v21, %v5952_v22 }
 0x613   : > { %6141 = vst.msk [vmem:[%s11414_s10 + $0xd8] sm:$0xff] %vm3135_vm4, %v6109_v18  ;;  %v6079_v3 = vadd.f32 %v11404_v32, %v6039_v2 }
 0x614   : > { %6140 = vst.msk [vmem:[%s11414_s10 + $0xd0] sm:$0xff] %vm3135_vm4, %v6108_v45  ;;  %v6078_v38 = vadd.f32 %v11404_v32, %v6038_v16  ;;  %v8369_v23 = vpop.f32.mrb[30].mxu1 }
 0x615   : > { %v6111_v26 = vmax.f32 %v6079_v3, 0.0  ;;  %v6041_v11 = vmul.f32 %v8369_v23, %v11399_v21  ;;  %v5962_v34 = vpop.f32.mrb[31].mxu1 }
 0x616   : > { %v6110_v30 = vmax.f32 %v6078_v38, 0.0  ;;  %v6040_v20 = vmul.f32 %v11399_v21, %v5962_v34 }
 0x617   : > { %6143 = vst.msk [vmem:[%s11414_s10 + $0xe8] sm:$0xff] %vm3135_vm4, %v6111_v26  ;;  %v6081_v61 = vadd.f32 %v11404_v32, %v6041_v11 }
 0x618   : > { %6142 = vst.msk [vmem:[%s11414_s10 + $0xe0] sm:$0xff] %vm3135_vm4, %v6110_v30  ;;  %v6080_v51 = vadd.f32 %v11404_v32, %v6040_v20 }
 0x619   : > { %v6113_v1 = vmax.f32 %v6081_v61, 0.0 }
 0x61a   : > { %v6112_v21 = vmax.f32 %v6080_v51, 0.0 }
 0x61b   : > { %6145 = vst.msk [vmem:[%s11414_s10 + $0xf8] sm:$0xff] %vm3135_vm4, %v6113_v1 }
 0x61c   : > { %6144 = vst.msk [vmem:[%s11414_s10 + $0xf0] sm:$0xff] %vm3135_vm4, %v6112_v21 }
 0x61d   : > { %8978 = shalt.err (!%p8975_p3)
}
 0x61e   : > { %s8979_s26 = scalar_lea.hbm %s11539_s15, 4096  ;;  %s8983_s7 = scalar_lea.hbm %s11595_s5, 8192 }
 0x61f   : > { %p8980_p4 = scmp.ne.s32.totalorder %s11539_s15, %s8979_s26  ;;  %p8984_p9 = scmp.lt.u32.totalorder %s11539_s15, %s11595_s5 }
 0x620   : > { %p8985_p10 = scmp.lt.u32.totalorder %s8983_s7, %s8979_s26  ;;  %p8987_p12 = scmp.lt.u32.totalorder %s8979_s26, %s11539_s15 }
 0x621   : > { %p8981_p7 = pnand %p8980_p4, %p9101_p5 }
 0x622   : > { %p8986_p11 = por %p8985_p10, %p8984_p9 }
 0x623   : > { %p8982_p8 = pneg %p8981_p7 }
 0x624   : > { %p8988_p13 = por %p8987_p12, %p8986_p11 }
 0x626   : > { %p8989_p0 = pnand %p8988_p13, %p8982_p8 }
 0x628   : > { %8992 = shalt.err (!%p8989_p0)
}
 0x629   : > { %s9031_s10 = smov 128   ;;  %s9032_s11 = smov 8  }
 0x62a   : > { %8919 = dma.vmem_to_hbm [thread:$0]  (%p9101_p5), %s11541_s12, 4096, %s11539_s15, %s11549_s22, %s9031_s10, %s9031_s10, %s9032_s11  }
 0x62b PF: > { %p8925_p1 = scmp.ge.s32.totalorder %s9027_s21, 2  ;;  %s6175_s13 = sand.u32 1, %s9015_s18  }
 0x62c   : > { %s6176_s14 = scalar_lea.sflag [#allocation4], %s6175_s13 }
 0x62d   : > { %p8922_p2 = pnand %p8925_p1, %p9105_p6 }
 0x62f   : > { %9010 = dma.done.wait (!%p8922_p2), %s6176_s14, 4096  }
 0x630   : > { %9012 = vsyncadd (!%p8922_p2), %s6176_s14, 4294963200  ;;  %p15_p3 = scmp.ge.s32.totalorder %s9088_s24, 4   ;;  %s11953_s18 = smov %s9019_s19 }
 0x631   : > { %s11954_s19 = smov %s9023_s20  ;;  %s11955_s20 = smov %s9099_s27 }
 0x632   : > { %s11956_s21 = smov %s9088_s24  ;;  %17 = sbr.rel (!%p15_p3) target bundleno = 3 (0x3), region = 94 }
 0x639   :  { %6181 = vsyncpa [#allocation4], 1 }
 0x63a   :  { %6183 = vsyncpa [#allocation4 + $0x1], 1 }

</bundles_post_ra>
